<compile_context>
chip_gen: v7x
topology: tpu7x:2x2x1
jax: 0.10.0
libtpu: 0.0.40
codegen_flags: <defaults>
</compile_context>

<pallas_src>
import jax
import jax.numpy as jnp
from jax.experimental import pallas as pl
from jax.experimental.pallas import tpu as pltpu

EPS = 1e-5  # default eps for nn.GroupNorm and nn.LayerNorm


def _unet_block_kernel(
    x_ref, t_ref, pref_ref,                  # activations + packed [1,C] params
    gmi_ref, gmiT_ref, gmo_ref, gmoT_ref,    # group-membership matrices
    w1t_ref, w2_ref, wr_ref, wvoI_ref,       # fused / pre-composed weights
    out_ref,
):
    f32, bf16 = jnp.float32, jnp.bfloat16
    cin = x_ref.shape[-1]
    cout = out_ref.shape[-1]

    # Packed per-channel params: one [8, max(cin,cout)] f32 tile, row-sliced.
    pref = pref_ref[...]
    gn1_b = pref[0:1, :cin]
    b1t = pref[1:2, :cout]    # b1 + bt (conv1 & time_proj biases pre-summed)
    gn2_b = pref[2:3, :cout]
    b2 = pref[3:4, :cout]
    br = pref[4:5, :cout]
    bvo = pref[5:6, :cout]    # bv @ Wo + bo
    ln_g = pref[6:7, :cout]
    ln_b = pref[7:8, :cout]

    def silu(z):
        # z * sigmoid(z); sigmoid via tanh keeps the transcendental on the EUP
        # and the divide off the VALU.
        return z * (0.5 * jnp.tanh(0.5 * z) + 0.5)

    def group_norm(h, gm_ref, gmT_ref, beta):
        # h: [TB, C] f32.  gm_ref: [C, G] one-hot / group_size (f32).
        # gmT_ref: [G, C] one-hot * gamma (bf16; one-hot exact in bf16).
        # Stats (mean, E[h^2]) stay in f32; two dots against the same resident
        # RHS avoid materializing a [2TB, C] concat copy.
        mean = jnp.dot(h, gm_ref[...], preferred_element_type=f32)       # [TB,G]
        ex2 = jnp.dot(h * h, gm_ref[...], preferred_element_type=f32)    # [TB,G]
        inv = jax.lax.rsqrt(ex2 - mean * mean + EPS)
        # Group->channel broadcast with gamma folded in (bf16 single MXU pass).
        scale = jnp.dot(inv.astype(bf16), gmT_ref[...],
                        preferred_element_type=f32)                      # inv*gamma
        shift = jnp.dot((-mean * inv).astype(bf16), gmT_ref[...],
                        preferred_element_type=f32)                      # -mean*inv*gamma
        return h * scale + shift + beta

    # conv1: GroupNorm(8, Cin) -> SiLU -> Linear, fused with time_proj
    # (SiLU -> Linear) into a single K = Cin + T matmul.  Dropout = eval identity.
    x = x_ref[...].astype(f32)
    h1 = silu(group_norm(x, gmi_ref, gmiT_ref, gn1_b)).astype(bf16)
    ts = silu(t_ref[...].astype(f32)).astype(bf16)
    lhs = jnp.concatenate([h1, ts], axis=-1)                             # [TB, Cin+T]
    h = jnp.dot(lhs, w1t_ref[...], preferred_element_type=f32) + b1t     # conv1 + time

    # conv2: GroupNorm(8, Cout) -> SiLU -> Linear.
    h = silu(group_norm(h, gmo_ref, gmoT_ref, gn2_b))
    h = jnp.dot(h.astype(bf16), w2_ref[...], preferred_element_type=f32) + b2

    # attention with seq_len == 1: softmax over the single key is 1.0, so
    # attn_output == out_proj(v_proj(h)) and q/k are dead.  The residual add
    # inside SelfAttention is folded into the weight: z = h @ (I + Wv Wo) + bvo.
    z = jnp.dot(h.astype(bf16), wvoI_ref[...], preferred_element_type=f32) + bvo
    mean = jnp.mean(z, axis=-1, keepdims=True)
    zc = z - mean
    var = jnp.mean(zc * zc, axis=-1, keepdims=True)
    h = zc * jax.lax.rsqrt(var + EPS) * ln_g + ln_b

    # residual = residual_proj(x): x re-read straight from VMEM (short live range).
    res = jnp.dot(x_ref[...].astype(bf16), wr_ref[...],
                  preferred_element_type=f32) + br
    out_ref[...] = (h + res).astype(out_ref.dtype)


def prepare_params(params, *, in_channels: int, out_channels: int, groups: int = 8):
    """One-time offline prep: group matrices (gamma folded), fused conv1+time
    weight, attention+residual pre-composition, packed per-channel params."""
    f32, bf16 = jnp.float32, jnp.bfloat16
    cw = max(in_channels, out_channels)

    def gm_pair(channels, gamma):
        gs = channels // groups
        c = jnp.arange(channels)
        g = jnp.arange(groups)
        onehot = (c[:, None] // gs == g[None, :]).astype(f32)            # [C, G]
        gm_scaled = onehot / gs                                          # stats
        gmT_gamma = (onehot.T * gamma.reshape(1, channels)).astype(bf16)  # [G, C]
        return gm_scaled, gmT_gamma

    gmi, gmiT = gm_pair(in_channels, params["gn1_g"])
    gmo, gmoT = gm_pair(out_channels, params["gn2_g"])

    # conv1 linear + time_proj linear fused along K, biases pre-summed.
    w1t = jnp.concatenate([params["w1"], params["wt"]], axis=0).astype(bf16)
    b1t = params["b1"] + params["bt"]

    # seq_len == 1 attention (+ its internal residual) -> one affine map.
    wvoI = (jnp.eye(out_channels, dtype=f32)
            + params["wv"] @ params["wo"]).astype(bf16)
    bvo = params["bv"] @ params["wo"] + params["bo"]

    if "wr" in params:
        wr, br = params["wr"].astype(bf16), params["br"]
    else:  # in_channels == out_channels -> residual_proj is Identity
        wr = jnp.eye(out_channels, dtype=f32).astype(bf16)
        br = jnp.zeros((1, out_channels), f32)

    def pad_row(v):
        v = v.reshape(1, -1).astype(f32)
        return jnp.pad(v, ((0, 0), (0, cw - v.shape[1])))

    pref = jnp.concatenate([
        pad_row(params["gn1_b"]), pad_row(b1t), pad_row(params["gn2_b"]),
        pad_row(params["b2"]), pad_row(br), pad_row(bvo),
        pad_row(params["ln_g"]), pad_row(params["ln_b"]),
    ], axis=0)                                                            # [8, CW]

    return dict(pref=pref, gmi=gmi, gmiT=gmiT, gmo=gmo, gmoT=gmoT,
                w1t=w1t, w2=params["w2"].astype(bf16), wr=wr, wvoI=wvoI)


_WEIGHT_ORDER = ("pref", "gmi", "gmiT", "gmo", "gmoT", "w1t", "w2", "wr", "wvoI")


def unet_block_forward(x, time_emb, prep, *, block_rows: int = 128,
                       vmem_limit_bytes=None):
    """UNetBlock forward in one batch-gridded Pallas kernel.

    x:        [B, Cin]  float32
    time_emb: [B, T]    float32
    prep:     output of prepare_params(...)
    block_rows: batch tile.  128 works everywhere (>=2 grid steps for v7x's two
      TensorCores); on v6e with large B use 512-1024; on v5e keep <= 128 and set
      vmem_limit_bytes when channel widths grow.
    """
    B, cin = x.shape
    tdim = time_emb.shape[1]
    cout = prep["w2"].shape[1]

    tb = min(block_rows, B)
    grid = (pl.cdiv(B, tb),)
    weights = [prep[k] for k in _WEIGHT_ORDER]

    def build(weight_pipeline_mode):
        def rows(shape):
            return pl.BlockSpec(shape, lambda i: (i, 0))

        def resident(arr):
            if weight_pipeline_mode is None:
                return pl.BlockSpec(arr.shape, lambda i: (0, 0))
            return pl.BlockSpec(arr.shape, lambda i: (0, 0),
                                pipeline_mode=weight_pipeline_mode)

        in_specs = ([rows((tb, cin)), rows((tb, tdim))]
                    + [resident(w) for w in weights])
        return pl.pallas_call(
            _unet_block_kernel,
            out_shape=jax.ShapeDtypeStruct((B, cout), jnp.float32),
            grid=grid,
            in_specs=in_specs,
            out_specs=rows((tb, cout)),
            compiler_params=pltpu.CompilerParams(
                dimension_semantics=("parallel",),
                vmem_limit_bytes=vmem_limit_bytes),
        )

    try:
        # Constant index_map => weights fetched once; single-buffer them so real
        # UNet widths (C=512-1024) don't double their VMEM footprint.
        return jax.block_until_ready(build(pl.Buffered(1))(x, time_emb, *weights))
    except Exception:  # pragma: no cover - JAX build without pipeline_mode support
        return build(None)(x, time_emb, *weights)


def _reference_forward(x, time_emb, params, *, groups: int = 8):
    """Plain-JAX f32 reference (independent GroupNorm via reshape)."""
    def silu(z):
        return z * jax.nn.sigmoid(z)

    def gn(h, gamma, beta):
        B, C = h.shape
        hg = h.reshape(B, groups, C // groups)
        mean = hg.mean(axis=-1, keepdims=True)
        var = hg.var(axis=-1, keepdims=True)
        hg = (hg - mean) / jnp.sqrt(var + EPS)
        return hg.reshape(B, C) * gamma + beta

    residual = x @ params["wr"] + params["br"]
    h = gn(x, params["gn1_g"], params["gn1_b"])
    h = silu(h) @ params["w1"] + params["b1"]
    h = h + silu(time_emb) @ params["wt"] + params["bt"]
    h = gn(h, params["gn2_g"], params["gn2_b"])
    h = silu(h) @ params["w2"] + params["b2"]
    # attention with seq_len == 1 (softmax over one key == 1, dropout eval)
    v = h @ params["wv"] + params["bv"]
    ao = v @ params["wo"] + params["bo"]
    z = h + ao
    mean = z.mean(axis=-1, keepdims=True)
    var = z.var(axis=-1, keepdims=True)
    h = (z - mean) / jnp.sqrt(var + EPS) * params["ln_g"] + params["ln_b"]
    return h + residual


def make_params(key, in_channels, out_channels, time_embed_dim):
    ks = jax.random.split(key, 16)
    n = lambda k, shape, s=0.1: s * jax.random.normal(k, shape, jnp.float32)
    return {
        # conv1
        "gn1_g": 1.0 + n(ks[0], (1, in_channels)),
        "gn1_b": n(ks[1], (1, in_channels)),
        "w1": n(ks[2], (in_channels, out_channels)),
        "b1": n(ks[3], (1, out_channels)),
        # time_proj
        "wt": n(ks[4], (time_embed_dim, out_channels)),
        "bt": n(ks[5], (1, out_channels)),
        # conv2
        "gn2_g": 1.0 + n(ks[6], (1, out_channels)),
        "gn2_b": n(ks[7], (1, out_channels)),
        "w2": n(ks[8], (out_channels, out_channels)),
        "b2": n(ks[9], (1, out_channels)),
        # residual_proj (in_channels != out_channels -> Linear)
        "wr": n(ks[10], (in_channels, out_channels)),
        "br": n(ks[11], (1, out_channels)),
        # attention v_proj / out_proj / LayerNorm; q/k omitted (seq_len == 1)
        "wv": n(ks[12], (out_channels, out_channels)),
        "bv": n(ks[13], (1, out_channels)),
        "wo": n(ks[14], (out_channels, out_channels)),
        "bo": n(ks[15], (1, out_channels)),
        "ln_g": jnp.ones((1, out_channels), jnp.float32),
        "ln_b": jnp.zeros((1, out_channels), jnp.float32),
    }


if __name__ == "__main__":
    # TPU-friendly small shapes: Cout = 128 -> lane-dense output stores,
    # B = 256 with 128-row blocks -> 2 parallel, pipelined grid steps.
    B, CIN, COUT, TDIM = 256, 32, 128, 64

    key = jax.random.PRNGKey(0)
    kx, kt, kp = jax.random.split(key, 3)
    x = jax.random.normal(kx, (B, CIN), jnp.float32)
    time_emb = jax.random.normal(kt, (B, TDIM), jnp.float32)
    params = make_params(kp, CIN, COUT, TDIM)

    prep = prepare_params(params, in_channels=CIN, out_channels=COUT)
    out = unet_block_forward(x, time_emb, prep, block_rows=128)
    out = jax.block_until_ready(out)

    ref = _reference_forward(x, time_emb, params)
    assert out.shape == (B, COUT)
    # bf16 matmul inputs / pre-composed weights (f32 accumulation) -> slightly
    # looser tolerance vs. the f32 reference.
    err = float(jnp.max(jnp.abs(out - ref)))
    assert jnp.allclose(out, ref, atol=5e-2, rtol=5e-2), err

    print("KERNEL_OK")
</pallas_src>

<mosaic_0001>
module attributes {stable_mosaic.version = 11 : i64} {
  func.func @_unet_block_kernel(%arg0: i32, %arg1: memref<128x32xf32, #tpu.memory_space<vmem>>, %arg2: memref<128x64xf32, #tpu.memory_space<vmem>>, %arg3: memref<8x128xf32, #tpu.memory_space<vmem>>, %arg4: memref<32x8xf32, #tpu.memory_space<vmem>>, %arg5: memref<8x32xbf16, #tpu.memory_space<vmem>>, %arg6: memref<128x8xf32, #tpu.memory_space<vmem>>, %arg7: memref<8x128xbf16, #tpu.memory_space<vmem>>, %arg8: memref<96x128xbf16, #tpu.memory_space<vmem>>, %arg9: memref<128x128xbf16, #tpu.memory_space<vmem>>, %arg10: memref<32x128xbf16, #tpu.memory_space<vmem>>, %arg11: memref<128x128xbf16, #tpu.memory_space<vmem>>, %arg12: memref<128x128xf32, #tpu.memory_space<vmem>>) attributes {dimension_semantics = [#tpu.dimension_semantics<parallel>], iteration_bounds = array<i64: 2>, scalar_prefetch = 0 : i64, scratch_operands = 0 : i64, tpu.core_type = #tpu.core_type<tc>, window_params = [{transform_indices = @transform_0, window_bounds = array<i64: 128, 32>}, {transform_indices = @transform_1, window_bounds = array<i64: 128, 64>}, {pipeline_mode = #tpu.pipeline_mode<synchronous>, transform_indices = @transform_2, window_bounds = array<i64: 8, 128>}, {pipeline_mode = #tpu.pipeline_mode<synchronous>, transform_indices = @transform_3, window_bounds = array<i64: 32, 8>}, {pipeline_mode = #tpu.pipeline_mode<synchronous>, transform_indices = @transform_4, window_bounds = array<i64: 8, 32>}, {pipeline_mode = #tpu.pipeline_mode<synchronous>, transform_indices = @transform_5, window_bounds = array<i64: 128, 8>}, {pipeline_mode = #tpu.pipeline_mode<synchronous>, transform_indices = @transform_6, window_bounds = array<i64: 8, 128>}, {pipeline_mode = #tpu.pipeline_mode<synchronous>, transform_indices = @transform_7, window_bounds = array<i64: 96, 128>}, {pipeline_mode = #tpu.pipeline_mode<synchronous>, transform_indices = @transform_8, window_bounds = array<i64: 128, 128>}, {pipeline_mode = #tpu.pipeline_mode<synchronous>, transform_indices = @transform_9, window_bounds = array<i64: 32, 128>}, {pipeline_mode = #tpu.pipeline_mode<synchronous>, transform_indices = @transform_10, window_bounds = array<i64: 128, 128>}, {transform_indices = @transform_11, window_bounds = array<i64: 128, 128>}]} {
    %c0 = arith.constant 0 : index
    %c0_0 = arith.constant 0 : index
    %0 = vector.load %arg3[%c0, %c0_0] : memref<8x128xf32, #tpu.memory_space<vmem>>, vector<8x128xf32>
    %1 = vector.extract_strided_slice %0 {offsets = [0, 0], sizes = [1, 32], strides = [1, 1]} : vector<8x128xf32> to vector<1x32xf32>
    %2 = vector.extract_strided_slice %0 {offsets = [1, 0], sizes = [1, 128], strides = [1, 1]} : vector<8x128xf32> to vector<1x128xf32>
    %3 = vector.extract_strided_slice %0 {offsets = [2, 0], sizes = [1, 128], strides = [1, 1]} : vector<8x128xf32> to vector<1x128xf32>
    %4 = vector.extract_strided_slice %0 {offsets = [3, 0], sizes = [1, 128], strides = [1, 1]} : vector<8x128xf32> to vector<1x128xf32>
    %5 = vector.extract_strided_slice %0 {offsets = [4, 0], sizes = [1, 128], strides = [1, 1]} : vector<8x128xf32> to vector<1x128xf32>
    %6 = vector.extract_strided_slice %0 {offsets = [5, 0], sizes = [1, 128], strides = [1, 1]} : vector<8x128xf32> to vector<1x128xf32>
    %7 = vector.extract_strided_slice %0 {offsets = [6, 0], sizes = [1, 128], strides = [1, 1]} : vector<8x128xf32> to vector<1x128xf32>
    %8 = vector.extract_strided_slice %0 {offsets = [7, 0], sizes = [1, 128], strides = [1, 1]} : vector<8x128xf32> to vector<1x128xf32>
    %c0_1 = arith.constant 0 : index
    %c0_2 = arith.constant 0 : index
    %9 = vector.load %arg1[%c0_1, %c0_2] : memref<128x32xf32, #tpu.memory_space<vmem>>, vector<128x32xf32>
    %c0_3 = arith.constant 0 : index
    %c0_4 = arith.constant 0 : index
    %10 = vector.load %arg4[%c0_3, %c0_4] : memref<32x8xf32, #tpu.memory_space<vmem>>, vector<32x8xf32>
    %cst = arith.constant dense<0.000000e+00> : vector<128x8xf32>
    %11 = tpu.matmul %9, %10, %cst {dimension_numbers = #tpu.dot_dimension_numbers<[1], [0], [0], [1], [0, 0, 1, 1], [], []>} : vector<128x32xf32>, vector<32x8xf32>, vector<128x8xf32> -> vector<128x8xf32>
    %12 = arith.mulf %9, %9 : vector<128x32xf32>
    %c0_5 = arith.constant 0 : index
    %c0_6 = arith.constant 0 : index
    %13 = vector.load %arg4[%c0_5, %c0_6] : memref<32x8xf32, #tpu.memory_space<vmem>>, vector<32x8xf32>
    %cst_7 = arith.constant dense<0.000000e+00> : vector<128x8xf32>
    %14 = tpu.matmul %12, %13, %cst_7 {dimension_numbers = #tpu.dot_dimension_numbers<[1], [0], [0], [1], [0, 0, 1, 1], [], []>} : vector<128x32xf32>, vector<32x8xf32>, vector<128x8xf32> -> vector<128x8xf32>
    %15 = arith.mulf %11, %11 : vector<128x8xf32>
    %16 = arith.subf %14, %15 : vector<128x8xf32>
    %cst_8 = arith.constant 9.99999974E-6 : f32
    %17 = vector.broadcast %cst_8 : f32 to vector<128x8xf32>
    %18 = arith.addf %16, %17 : vector<128x8xf32>
    %19 = math.rsqrt %18 : vector<128x8xf32>
    %20 = arith.truncf %19 : vector<128x8xf32> to vector<128x8xbf16>
    %c0_9 = arith.constant 0 : index
    %c0_10 = arith.constant 0 : index
    %21 = vector.load %arg5[%c0_9, %c0_10] : memref<8x32xbf16, #tpu.memory_space<vmem>>, vector<8x32xbf16>
    %cst_11 = arith.constant dense<0.000000e+00> : vector<128x32xf32>
    %22 = tpu.matmul %20, %21, %cst_11 {dimension_numbers = #tpu.dot_dimension_numbers<[1], [0], [0], [1], [0, 0, 1, 1], [], []>} : vector<128x8xbf16>, vector<8x32xbf16>, vector<128x32xf32> -> vector<128x32xf32>
    %cst_12 = arith.constant 0.000000e+00 : f32
    %23 = vector.broadcast %cst_12 : f32 to vector<128x8xf32>
    %24 = arith.subf %23, %11 : vector<128x8xf32>
    %25 = arith.mulf %24, %19 : vector<128x8xf32>
    %26 = arith.truncf %25 : vector<128x8xf32> to vector<128x8xbf16>
    %c0_13 = arith.constant 0 : index
    %c0_14 = arith.constant 0 : index
    %27 = vector.load %arg5[%c0_13, %c0_14] : memref<8x32xbf16, #tpu.memory_space<vmem>>, vector<8x32xbf16>
    %cst_15 = arith.constant dense<0.000000e+00> : vector<128x32xf32>
    %28 = tpu.matmul %26, %27, %cst_15 {dimension_numbers = #tpu.dot_dimension_numbers<[1], [0], [0], [1], [0, 0, 1, 1], [], []>} : vector<128x8xbf16>, vector<8x32xbf16>, vector<128x32xf32> -> vector<128x32xf32>
    %29 = arith.mulf %9, %22 : vector<128x32xf32>
    %30 = arith.addf %29, %28 : vector<128x32xf32>
    %31 = vector.broadcast %1 : vector<1x32xf32> to vector<128x32xf32>
    %32 = arith.addf %30, %31 : vector<128x32xf32>
    %cst_16 = arith.constant 5.000000e-01 : f32
    %33 = vector.broadcast %cst_16 : f32 to vector<128x32xf32>
    %34 = arith.mulf %33, %32 : vector<128x32xf32>
    %35 = math.tanh %34 : vector<128x32xf32>
    %cst_17 = arith.constant 5.000000e-01 : f32
    %36 = vector.broadcast %cst_17 : f32 to vector<128x32xf32>
    %37 = arith.mulf %36, %35 : vector<128x32xf32>
    %cst_18 = arith.constant 5.000000e-01 : f32
    %38 = vector.broadcast %cst_18 : f32 to vector<128x32xf32>
    %39 = arith.addf %37, %38 : vector<128x32xf32>
    %40 = arith.mulf %32, %39 : vector<128x32xf32>
    %41 = arith.truncf %40 : vector<128x32xf32> to vector<128x32xbf16>
    %c0_19 = arith.constant 0 : index
    %c0_20 = arith.constant 0 : index
    %42 = vector.load %arg2[%c0_19, %c0_20] : memref<128x64xf32, #tpu.memory_space<vmem>>, vector<128x64xf32>
    %cst_21 = arith.constant 5.000000e-01 : f32
    %43 = vector.broadcast %cst_21 : f32 to vector<128x64xf32>
    %44 = arith.mulf %43, %42 : vector<128x64xf32>
    %45 = math.tanh %44 : vector<128x64xf32>
    %cst_22 = arith.constant 5.000000e-01 : f32
    %46 = vector.broadcast %cst_22 : f32 to vector<128x64xf32>
    %47 = arith.mulf %46, %45 : vector<128x64xf32>
    %cst_23 = arith.constant 5.000000e-01 : f32
    %48 = vector.broadcast %cst_23 : f32 to vector<128x64xf32>
    %49 = arith.addf %47, %48 : vector<128x64xf32>
    %50 = arith.mulf %42, %49 : vector<128x64xf32>
    %51 = arith.truncf %50 : vector<128x64xf32> to vector<128x64xbf16>
    %52 = tpu.concatenate %41, %51 in 1 : vector<128x32xbf16>, vector<128x64xbf16> -> vector<128x96xbf16>
    %c0_24 = arith.constant 0 : index
    %c0_25 = arith.constant 0 : index
    %53 = vector.load %arg8[%c0_24, %c0_25] : memref<96x128xbf16, #tpu.memory_space<vmem>>, vector<96x128xbf16>
    %cst_26 = arith.constant dense<0.000000e+00> : vector<128x128xf32>
    %54 = tpu.matmul %52, %53, %cst_26 {dimension_numbers = #tpu.dot_dimension_numbers<[1], [0], [0], [1], [0, 0, 1, 1], [], []>} : vector<128x96xbf16>, vector<96x128xbf16>, vector<128x128xf32> -> vector<128x128xf32>
    %55 = vector.broadcast %2 : vector<1x128xf32> to vector<128x128xf32>
    %56 = arith.addf %54, %55 : vector<128x128xf32>
    %c0_27 = arith.constant 0 : index
    %c0_28 = arith.constant 0 : index
    %57 = vector.load %arg6[%c0_27, %c0_28] : memref<128x8xf32, #tpu.memory_space<vmem>>, vector<128x8xf32>
    %cst_29 = arith.constant dense<0.000000e+00> : vector<128x8xf32>
    %58 = tpu.matmul %56, %57, %cst_29 {dimension_numbers = #tpu.dot_dimension_numbers<[1], [0], [0], [1], [0, 0, 1, 1], [], []>} : vector<128x128xf32>, vector<128x8xf32>, vector<128x8xf32> -> vector<128x8xf32>
    %59 = arith.mulf %56, %56 : vector<128x128xf32>
    %c0_30 = arith.constant 0 : index
    %c0_31 = arith.constant 0 : index
    %60 = vector.load %arg6[%c0_30, %c0_31] : memref<128x8xf32, #tpu.memory_space<vmem>>, vector<128x8xf32>
    %cst_32 = arith.constant dense<0.000000e+00> : vector<128x8xf32>
    %61 = tpu.matmul %59, %60, %cst_32 {dimension_numbers = #tpu.dot_dimension_numbers<[1], [0], [0], [1], [0, 0, 1, 1], [], []>} : vector<128x128xf32>, vector<128x8xf32>, vector<128x8xf32> -> vector<128x8xf32>
    %62 = arith.mulf %58, %58 : vector<128x8xf32>
    %63 = arith.subf %61, %62 : vector<128x8xf32>
    %cst_33 = arith.constant 9.99999974E-6 : f32
    %64 = vector.broadcast %cst_33 : f32 to vector<128x8xf32>
    %65 = arith.addf %63, %64 : vector<128x8xf32>
    %66 = math.rsqrt %65 : vector<128x8xf32>
    %67 = arith.truncf %66 : vector<128x8xf32> to vector<128x8xbf16>
    %c0_34 = arith.constant 0 : index
    %c0_35 = arith.constant 0 : index
    %68 = vector.load %arg7[%c0_34, %c0_35] : memref<8x128xbf16, #tpu.memory_space<vmem>>, vector<8x128xbf16>
    %cst_36 = arith.constant dense<0.000000e+00> : vector<128x128xf32>
    %69 = tpu.matmul %67, %68, %cst_36 {dimension_numbers = #tpu.dot_dimension_numbers<[1], [0], [0], [1], [0, 0, 1, 1], [], []>} : vector<128x8xbf16>, vector<8x128xbf16>, vector<128x128xf32> -> vector<128x128xf32>
    %cst_37 = arith.constant 0.000000e+00 : f32
    %70 = vector.broadcast %cst_37 : f32 to vector<128x8xf32>
    %71 = arith.subf %70, %58 : vector<128x8xf32>
    %72 = arith.mulf %71, %66 : vector<128x8xf32>
    %73 = arith.truncf %72 : vector<128x8xf32> to vector<128x8xbf16>
    %c0_38 = arith.constant 0 : index
    %c0_39 = arith.constant 0 : index
    %74 = vector.load %arg7[%c0_38, %c0_39] : memref<8x128xbf16, #tpu.memory_space<vmem>>, vector<8x128xbf16>
    %cst_40 = arith.constant dense<0.000000e+00> : vector<128x128xf32>
    %75 = tpu.matmul %73, %74, %cst_40 {dimension_numbers = #tpu.dot_dimension_numbers<[1], [0], [0], [1], [0, 0, 1, 1], [], []>} : vector<128x8xbf16>, vector<8x128xbf16>, vector<128x128xf32> -> vector<128x128xf32>
    %76 = arith.mulf %56, %69 : vector<128x128xf32>
    %77 = arith.addf %76, %75 : vector<128x128xf32>
    %78 = vector.broadcast %3 : vector<1x128xf32> to vector<128x128xf32>
    %79 = arith.addf %77, %78 : vector<128x128xf32>
    %cst_41 = arith.constant 5.000000e-01 : f32
    %80 = vector.broadcast %cst_41 : f32 to vector<128x128xf32>
    %81 = arith.mulf %80, %79 : vector<128x128xf32>
    %82 = math.tanh %81 : vector<128x128xf32>
    %cst_42 = arith.constant 5.000000e-01 : f32
    %83 = vector.broadcast %cst_42 : f32 to vector<128x128xf32>
    %84 = arith.mulf %83, %82 : vector<128x128xf32>
    %cst_43 = arith.constant 5.000000e-01 : f32
    %85 = vector.broadcast %cst_43 : f32 to vector<128x128xf32>
    %86 = arith.addf %84, %85 : vector<128x128xf32>
    %87 = arith.mulf %79, %86 : vector<128x128xf32>
    %88 = arith.truncf %87 : vector<128x128xf32> to vector<128x128xbf16>
    %c0_44 = arith.constant 0 : index
    %c0_45 = arith.constant 0 : index
    %89 = vector.load %arg9[%c0_44, %c0_45] : memref<128x128xbf16, #tpu.memory_space<vmem>>, vector<128x128xbf16>
    %cst_46 = arith.constant dense<0.000000e+00> : vector<128x128xf32>
    %90 = tpu.matmul %88, %89, %cst_46 {dimension_numbers = #tpu.dot_dimension_numbers<[1], [0], [0], [1], [0, 0, 1, 1], [], []>} : vector<128x128xbf16>, vector<128x128xbf16>, vector<128x128xf32> -> vector<128x128xf32>
    %91 = vector.broadcast %4 : vector<1x128xf32> to vector<128x128xf32>
    %92 = arith.addf %90, %91 : vector<128x128xf32>
    %93 = arith.truncf %92 : vector<128x128xf32> to vector<128x128xbf16>
    %c0_47 = arith.constant 0 : index
    %c0_48 = arith.constant 0 : index
    %94 = vector.load %arg11[%c0_47, %c0_48] : memref<128x128xbf16, #tpu.memory_space<vmem>>, vector<128x128xbf16>
    %cst_49 = arith.constant dense<0.000000e+00> : vector<128x128xf32>
    %95 = tpu.matmul %93, %94, %cst_49 {dimension_numbers = #tpu.dot_dimension_numbers<[1], [0], [0], [1], [0, 0, 1, 1], [], []>} : vector<128x128xbf16>, vector<128x128xbf16>, vector<128x128xf32> -> vector<128x128xf32>
    %96 = vector.broadcast %6 : vector<1x128xf32> to vector<128x128xf32>
    %97 = arith.addf %95, %96 : vector<128x128xf32>
    %cst_50 = arith.constant dense<0.000000e+00> : vector<128xf32>
    %98 = vector.multi_reduction <add>, %97, %cst_50 [1] : vector<128x128xf32> to vector<128xf32>
    %99 = vector.shape_cast %98 : vector<128xf32> to vector<128x1xf32>
    %cst_51 = arith.constant 1.280000e+02 : f32
    %100 = vector.broadcast %cst_51 : f32 to vector<128x1xf32>
    %101 = arith.divf %99, %100 : vector<128x1xf32>
    %102 = vector.broadcast %101 : vector<128x1xf32> to vector<128x128xf32>
    %103 = arith.subf %97, %102 : vector<128x128xf32>
    %104 = arith.mulf %103, %103 : vector<128x128xf32>
    %cst_52 = arith.constant dense<0.000000e+00> : vector<128xf32>
    %105 = vector.multi_reduction <add>, %104, %cst_52 [1] : vector<128x128xf32> to vector<128xf32>
    %106 = vector.shape_cast %105 : vector<128xf32> to vector<128x1xf32>
    %cst_53 = arith.constant 1.280000e+02 : f32
    %107 = vector.broadcast %cst_53 : f32 to vector<128x1xf32>
    %108 = arith.divf %106, %107 : vector<128x1xf32>
    %cst_54 = arith.constant 9.99999974E-6 : f32
    %109 = vector.broadcast %cst_54 : f32 to vector<128x1xf32>
    %110 = arith.addf %108, %109 : vector<128x1xf32>
    %111 = math.rsqrt %110 : vector<128x1xf32>
    %112 = vector.broadcast %111 : vector<128x1xf32> to vector<128x128xf32>
    %113 = arith.mulf %103, %112 : vector<128x128xf32>
    %114 = vector.broadcast %7 : vector<1x128xf32> to vector<128x128xf32>
    %115 = arith.mulf %113, %114 : vector<128x128xf32>
    %116 = vector.broadcast %8 : vector<1x128xf32> to vector<128x128xf32>
    %117 = arith.addf %115, %116 : vector<128x128xf32>
    %c0_55 = arith.constant 0 : index
    %c0_56 = arith.constant 0 : index
    %118 = vector.load %arg1[%c0_55, %c0_56] : memref<128x32xf32, #tpu.memory_space<vmem>>, vector<128x32xf32>
    %119 = arith.truncf %118 : vector<128x32xf32> to vector<128x32xbf16>
    %c0_57 = arith.constant 0 : index
    %c0_58 = arith.constant 0 : index
    %120 = vector.load %arg10[%c0_57, %c0_58] : memref<32x128xbf16, #tpu.memory_space<vmem>>, vector<32x128xbf16>
    %cst_59 = arith.constant dense<0.000000e+00> : vector<128x128xf32>
    %121 = tpu.matmul %119, %120, %cst_59 {dimension_numbers = #tpu.dot_dimension_numbers<[1], [0], [0], [1], [0, 0, 1, 1], [], []>} : vector<128x32xbf16>, vector<32x128xbf16>, vector<128x128xf32> -> vector<128x128xf32>
    %122 = vector.broadcast %5 : vector<1x128xf32> to vector<128x128xf32>
    %123 = arith.addf %121, %122 : vector<128x128xf32>
    %124 = arith.addf %117, %123 : vector<128x128xf32>
    %c0_60 = arith.constant 0 : index
    %c0_61 = arith.constant 0 : index
    %125 = vector.load %arg12[%c0_60, %c0_61] : memref<128x128xf32, #tpu.memory_space<vmem>>, vector<128x128xf32>
    tpu.vector_store %arg12[%c0_60, %c0_61], %124 {strides = array<i32>} : memref<128x128xf32, #tpu.memory_space<vmem>>, vector<128x128xf32>,
    return
  }
  func.func @transform_0(%arg0: i32) -> (i32, i32) {
    %c0_i32 = arith.constant 0 : i32
    %c0_i32_0 = arith.constant 0 : i32
    return %arg0, %c0_i32 : i32, i32
  }
  func.func @transform_1(%arg0: i32) -> (i32, i32) {
    %c0_i32 = arith.constant 0 : i32
    %c0_i32_0 = arith.constant 0 : i32
    return %arg0, %c0_i32 : i32, i32
  }
  func.func @transform_2(%arg0: i32) -> (i32, i32) {
    %c0_i32 = arith.constant 0 : i32
    %c0_i32_0 = arith.constant 0 : i32
    %c0_i32_1 = arith.constant 0 : i32
    return %c0_i32, %c0_i32_0 : i32, i32
  }
  func.func @transform_3(%arg0: i32) -> (i32, i32) {
    %c0_i32 = arith.constant 0 : i32
    %c0_i32_0 = arith.constant 0 : i32
    %c0_i32_1 = arith.constant 0 : i32
    return %c0_i32, %c0_i32_0 : i32, i32
  }
  func.func @transform_4(%arg0: i32) -> (i32, i32) {
    %c0_i32 = arith.constant 0 : i32
    %c0_i32_0 = arith.constant 0 : i32
    %c0_i32_1 = arith.constant 0 : i32
    return %c0_i32, %c0_i32_0 : i32, i32
  }
  func.func @transform_5(%arg0: i32) -> (i32, i32) {
    %c0_i32 = arith.constant 0 : i32
    %c0_i32_0 = arith.constant 0 : i32
    %c0_i32_1 = arith.constant 0 : i32
    return %c0_i32, %c0_i32_0 : i32, i32
  }
  func.func @transform_6(%arg0: i32) -> (i32, i32) {
    %c0_i32 = arith.constant 0 : i32
    %c0_i32_0 = arith.constant 0 : i32
    %c0_i32_1 = arith.constant 0 : i32
    return %c0_i32, %c0_i32_0 : i32, i32
  }
  func.func @transform_7(%arg0: i32) -> (i32, i32) {
    %c0_i32 = arith.constant 0 : i32
    %c0_i32_0 = arith.constant 0 : i32
    %c0_i32_1 = arith.constant 0 : i32
    return %c0_i32, %c0_i32_0 : i32, i32
  }
  func.func @transform_8(%arg0: i32) -> (i32, i32) {
    %c0_i32 = arith.constant 0 : i32
    %c0_i32_0 = arith.constant 0 : i32
    %c0_i32_1 = arith.constant 0 : i32
    return %c0_i32, %c0_i32_0 : i32, i32
  }
  func.func @transform_9(%arg0: i32) -> (i32, i32) {
    %c0_i32 = arith.constant 0 : i32
    %c0_i32_0 = arith.constant 0 : i32
    %c0_i32_1 = arith.constant 0 : i32
    return %c0_i32, %c0_i32_0 : i32, i32
  }
  func.func @transform_10(%arg0: i32) -> (i32, i32) {
    %c0_i32 = arith.constant 0 : i32
    %c0_i32_0 = arith.constant 0 : i32
    %c0_i32_1 = arith.constant 0 : i32
    return %c0_i32, %c0_i32_0 : i32, i32
  }
  func.func @transform_11(%arg0: i32) -> (i32, i32) {
    %c0_i32 = arith.constant 0 : i32
    %c0_i32_0 = arith.constant 0 : i32
    return %arg0, %c0_i32 : i32, i32
  }
}

module attributes {stable_mosaic.version = 11 : i64} {
  func.func @_unet_block_kernel(%arg0: i32, %arg1: memref<128x32xf32, #tpu.memory_space<vmem>>, %arg2: memref<128x64xf32, #tpu.memory_space<vmem>>, %arg3: memref<8x128xf32, #tpu.memory_space<vmem>>, %arg4: memref<32x8xf32, #tpu.memory_space<vmem>>, %arg5: memref<8x32xbf16, #tpu.memory_space<vmem>>, %arg6: memref<128x8xf32, #tpu.memory_space<vmem>>, %arg7: memref<8x128xbf16, #tpu.memory_space<vmem>>, %arg8: memref<96x128xbf16, #tpu.memory_space<vmem>>, %arg9: memref<128x128xbf16, #tpu.memory_space<vmem>>, %arg10: memref<32x128xbf16, #tpu.memory_space<vmem>>, %arg11: memref<128x128xbf16, #tpu.memory_space<vmem>>, %arg12: memref<128x128xf32, #tpu.memory_space<vmem>>) attributes {dimension_semantics = [#tpu.dimension_semantics<parallel>], iteration_bounds = array<i64: 2>, scalar_prefetch = 0 : i64, scratch_operands = 0 : i64, tpu.core_type = #tpu.core_type<tc>, window_params = [{transform_indices = @transform_0, window_bounds = array<i64: 128, 32>}, {transform_indices = @transform_1, window_bounds = array<i64: 128, 64>}, {pipeline_mode = #tpu.pipeline_mode<synchronous>, transform_indices = @transform_2, window_bounds = array<i64: 8, 128>}, {pipeline_mode = #tpu.pipeline_mode<synchronous>, transform_indices = @transform_3, window_bounds = array<i64: 32, 8>}, {pipeline_mode = #tpu.pipeline_mode<synchronous>, transform_indices = @transform_4, window_bounds = array<i64: 8, 32>}, {pipeline_mode = #tpu.pipeline_mode<synchronous>, transform_indices = @transform_5, window_bounds = array<i64: 128, 8>}, {pipeline_mode = #tpu.pipeline_mode<synchronous>, transform_indices = @transform_6, window_bounds = array<i64: 8, 128>}, {pipeline_mode = #tpu.pipeline_mode<synchronous>, transform_indices = @transform_7, window_bounds = array<i64: 96, 128>}, {pipeline_mode = #tpu.pipeline_mode<synchronous>, transform_indices = @transform_8, window_bounds = array<i64: 128, 128>}, {pipeline_mode = #tpu.pipeline_mode<synchronous>, transform_indices = @transform_9, window_bounds = array<i64: 32, 128>}, {pipeline_mode = #tpu.pipeline_mode<synchronous>, transform_indices = @transform_10, window_bounds = array<i64: 128, 128>}, {transform_indices = @transform_11, window_bounds = array<i64: 128, 128>}]} {
    %c0 = arith.constant 0 : index
    %c0_0 = arith.constant 0 : index
    %0 = vector.load %arg3[%c0, %c0_0] : memref<8x128xf32, #tpu.memory_space<vmem>>, vector<8x128xf32>
    %1 = vector.extract_strided_slice %0 {offsets = [0, 0], sizes = [1, 32], strides = [1, 1]} : vector<8x128xf32> to vector<1x32xf32>
    %2 = vector.extract_strided_slice %0 {offsets = [1, 0], sizes = [1, 128], strides = [1, 1]} : vector<8x128xf32> to vector<1x128xf32>
    %3 = vector.extract_strided_slice %0 {offsets = [2, 0], sizes = [1, 128], strides = [1, 1]} : vector<8x128xf32> to vector<1x128xf32>
    %4 = vector.extract_strided_slice %0 {offsets = [3, 0], sizes = [1, 128], strides = [1, 1]} : vector<8x128xf32> to vector<1x128xf32>
    %5 = vector.extract_strided_slice %0 {offsets = [4, 0], sizes = [1, 128], strides = [1, 1]} : vector<8x128xf32> to vector<1x128xf32>
    %6 = vector.extract_strided_slice %0 {offsets = [5, 0], sizes = [1, 128], strides = [1, 1]} : vector<8x128xf32> to vector<1x128xf32>
    %7 = vector.extract_strided_slice %0 {offsets = [6, 0], sizes = [1, 128], strides = [1, 1]} : vector<8x128xf32> to vector<1x128xf32>
    %8 = vector.extract_strided_slice %0 {offsets = [7, 0], sizes = [1, 128], strides = [1, 1]} : vector<8x128xf32> to vector<1x128xf32>
    %c0_1 = arith.constant 0 : index
    %c0_2 = arith.constant 0 : index
    %9 = vector.load %arg1[%c0_1, %c0_2] : memref<128x32xf32, #tpu.memory_space<vmem>>, vector<128x32xf32>
    %c0_3 = arith.constant 0 : index
    %c0_4 = arith.constant 0 : index
    %10 = vector.load %arg4[%c0_3, %c0_4] : memref<32x8xf32, #tpu.memory_space<vmem>>, vector<32x8xf32>
    %cst = arith.constant dense<0.000000e+00> : vector<128x8xf32>
    %11 = tpu.matmul %9, %10, %cst {dimension_numbers = #tpu.dot_dimension_numbers<[1], [0], [0], [1], [0, 0, 1, 1], [], []>} : vector<128x32xf32>, vector<32x8xf32>, vector<128x8xf32> -> vector<128x8xf32>
    %12 = arith.mulf %9, %9 : vector<128x32xf32>
    %c0_5 = arith.constant 0 : index
    %c0_6 = arith.constant 0 : index
    %13 = vector.load %arg4[%c0_5, %c0_6] : memref<32x8xf32, #tpu.memory_space<vmem>>, vector<32x8xf32>
    %cst_7 = arith.constant dense<0.000000e+00> : vector<128x8xf32>
    %14 = tpu.matmul %12, %13, %cst_7 {dimension_numbers = #tpu.dot_dimension_numbers<[1], [0], [0], [1], [0, 0, 1, 1], [], []>} : vector<128x32xf32>, vector<32x8xf32>, vector<128x8xf32> -> vector<128x8xf32>
    %15 = arith.mulf %11, %11 : vector<128x8xf32>
    %16 = arith.subf %14, %15 : vector<128x8xf32>
    %cst_8 = arith.constant 9.99999974E-6 : f32
    %17 = vector.broadcast %cst_8 : f32 to vector<128x8xf32>
    %18 = arith.addf %16, %17 : vector<128x8xf32>
    %19 = math.rsqrt %18 : vector<128x8xf32>
    %20 = arith.truncf %19 : vector<128x8xf32> to vector<128x8xbf16>
    %c0_9 = arith.constant 0 : index
    %c0_10 = arith.constant 0 : index
    %21 = vector.load %arg5[%c0_9, %c0_10] : memref<8x32xbf16, #tpu.memory_space<vmem>>, vector<8x32xbf16>
    %cst_11 = arith.constant dense<0.000000e+00> : vector<128x32xf32>
    %22 = tpu.matmul %20, %21, %cst_11 {dimension_numbers = #tpu.dot_dimension_numbers<[1], [0], [0], [1], [0, 0, 1, 1], [], []>} : vector<128x8xbf16>, vector<8x32xbf16>, vector<128x32xf32> -> vector<128x32xf32>
    %cst_12 = arith.constant 0.000000e+00 : f32
    %23 = vector.broadcast %cst_12 : f32 to vector<128x8xf32>
    %24 = arith.subf %23, %11 : vector<128x8xf32>
    %25 = arith.mulf %24, %19 : vector<128x8xf32>
    %26 = arith.truncf %25 : vector<128x8xf32> to vector<128x8xbf16>
    %c0_13 = arith.constant 0 : index
    %c0_14 = arith.constant 0 : index
    %27 = vector.load %arg5[%c0_13, %c0_14] : memref<8x32xbf16, #tpu.memory_space<vmem>>, vector<8x32xbf16>
    %cst_15 = arith.constant dense<0.000000e+00> : vector<128x32xf32>
    %28 = tpu.matmul %26, %27, %cst_15 {dimension_numbers = #tpu.dot_dimension_numbers<[1], [0], [0], [1], [0, 0, 1, 1], [], []>} : vector<128x8xbf16>, vector<8x32xbf16>, vector<128x32xf32> -> vector<128x32xf32>
    %29 = arith.mulf %9, %22 : vector<128x32xf32>
    %30 = arith.addf %29, %28 : vector<128x32xf32>
    %31 = vector.broadcast %1 : vector<1x32xf32> to vector<128x32xf32>
    %32 = arith.addf %30, %31 : vector<128x32xf32>
    %cst_16 = arith.constant 5.000000e-01 : f32
    %33 = vector.broadcast %cst_16 : f32 to vector<128x32xf32>
    %34 = arith.mulf %33, %32 : vector<128x32xf32>
    %35 = math.tanh %34 : vector<128x32xf32>
    %cst_17 = arith.constant 5.000000e-01 : f32
    %36 = vector.broadcast %cst_17 : f32 to vector<128x32xf32>
    %37 = arith.mulf %36, %35 : vector<128x32xf32>
    %cst_18 = arith.constant 5.000000e-01 : f32
    %38 = vector.broadcast %cst_18 : f32 to vector<128x32xf32>
    %39 = arith.addf %37, %38 : vector<128x32xf32>
    %40 = arith.mulf %32, %39 : vector<128x32xf32>
    %41 = arith.truncf %40 : vector<128x32xf32> to vector<128x32xbf16>
    %c0_19 = arith.constant 0 : index
    %c0_20 = arith.constant 0 : index
    %42 = vector.load %arg2[%c0_19, %c0_20] : memref<128x64xf32, #tpu.memory_space<vmem>>, vector<128x64xf32>
    %cst_21 = arith.constant 5.000000e-01 : f32
    %43 = vector.broadcast %cst_21 : f32 to vector<128x64xf32>
    %44 = arith.mulf %43, %42 : vector<128x64xf32>
    %45 = math.tanh %44 : vector<128x64xf32>
    %cst_22 = arith.constant 5.000000e-01 : f32
    %46 = vector.broadcast %cst_22 : f32 to vector<128x64xf32>
    %47 = arith.mulf %46, %45 : vector<128x64xf32>
    %cst_23 = arith.constant 5.000000e-01 : f32
    %48 = vector.broadcast %cst_23 : f32 to vector<128x64xf32>
    %49 = arith.addf %47, %48 : vector<128x64xf32>
    %50 = arith.mulf %42, %49 : vector<128x64xf32>
    %51 = arith.truncf %50 : vector<128x64xf32> to vector<128x64xbf16>
    %52 = tpu.concatenate %41, %51 in 1 : vector<128x32xbf16>, vector<128x64xbf16> -> vector<128x96xbf16>
    %c0_24 = arith.constant 0 : index
    %c0_25 = arith.constant 0 : index
    %53 = vector.load %arg8[%c0_24, %c0_25] : memref<96x128xbf16, #tpu.memory_space<vmem>>, vector<96x128xbf16>
    %cst_26 = arith.constant dense<0.000000e+00> : vector<128x128xf32>
    %54 = tpu.matmul %52, %53, %cst_26 {dimension_numbers = #tpu.dot_dimension_numbers<[1], [0], [0], [1], [0, 0, 1, 1], [], []>} : vector<128x96xbf16>, vector<96x128xbf16>, vector<128x128xf32> -> vector<128x128xf32>
    %55 = vector.broadcast %2 : vector<1x128xf32> to vector<128x128xf32>
    %56 = arith.addf %54, %55 : vector<128x128xf32>
    %c0_27 = arith.constant 0 : index
    %c0_28 = arith.constant 0 : index
    %57 = vector.load %arg6[%c0_27, %c0_28] : memref<128x8xf32, #tpu.memory_space<vmem>>, vector<128x8xf32>
    %cst_29 = arith.constant dense<0.000000e+00> : vector<128x8xf32>
    %58 = tpu.matmul %56, %57, %cst_29 {dimension_numbers = #tpu.dot_dimension_numbers<[1], [0], [0], [1], [0, 0, 1, 1], [], []>} : vector<128x128xf32>, vector<128x8xf32>, vector<128x8xf32> -> vector<128x8xf32>
    %59 = arith.mulf %56, %56 : vector<128x128xf32>
    %c0_30 = arith.constant 0 : index
    %c0_31 = arith.constant 0 : index
    %60 = vector.load %arg6[%c0_30, %c0_31] : memref<128x8xf32, #tpu.memory_space<vmem>>, vector<128x8xf32>
    %cst_32 = arith.constant dense<0.000000e+00> : vector<128x8xf32>
    %61 = tpu.matmul %59, %60, %cst_32 {dimension_numbers = #tpu.dot_dimension_numbers<[1], [0], [0], [1], [0, 0, 1, 1], [], []>} : vector<128x128xf32>, vector<128x8xf32>, vector<128x8xf32> -> vector<128x8xf32>
    %62 = arith.mulf %58, %58 : vector<128x8xf32>
    %63 = arith.subf %61, %62 : vector<128x8xf32>
    %cst_33 = arith.constant 9.99999974E-6 : f32
    %64 = vector.broadcast %cst_33 : f32 to vector<128x8xf32>
    %65 = arith.addf %63, %64 : vector<128x8xf32>
    %66 = math.rsqrt %65 : vector<128x8xf32>
    %67 = arith.truncf %66 : vector<128x8xf32> to vector<128x8xbf16>
    %c0_34 = arith.constant 0 : index
    %c0_35 = arith.constant 0 : index
    %68 = vector.load %arg7[%c0_34, %c0_35] : memref<8x128xbf16, #tpu.memory_space<vmem>>, vector<8x128xbf16>
    %cst_36 = arith.constant dense<0.000000e+00> : vector<128x128xf32>
    %69 = tpu.matmul %67, %68, %cst_36 {dimension_numbers = #tpu.dot_dimension_numbers<[1], [0], [0], [1], [0, 0, 1, 1], [], []>} : vector<128x8xbf16>, vector<8x128xbf16>, vector<128x128xf32> -> vector<128x128xf32>
    %cst_37 = arith.constant 0.000000e+00 : f32
    %70 = vector.broadcast %cst_37 : f32 to vector<128x8xf32>
    %71 = arith.subf %70, %58 : vector<128x8xf32>
    %72 = arith.mulf %71, %66 : vector<128x8xf32>
    %73 = arith.truncf %72 : vector<128x8xf32> to vector<128x8xbf16>
    %c0_38 = arith.constant 0 : index
    %c0_39 = arith.constant 0 : index
    %74 = vector.load %arg7[%c0_38, %c0_39] : memref<8x128xbf16, #tpu.memory_space<vmem>>, vector<8x128xbf16>
    %cst_40 = arith.constant dense<0.000000e+00> : vector<128x128xf32>
    %75 = tpu.matmul %73, %74, %cst_40 {dimension_numbers = #tpu.dot_dimension_numbers<[1], [0], [0], [1], [0, 0, 1, 1], [], []>} : vector<128x8xbf16>, vector<8x128xbf16>, vector<128x128xf32> -> vector<128x128xf32>
    %76 = arith.mulf %56, %69 : vector<128x128xf32>
    %77 = arith.addf %76, %75 : vector<128x128xf32>
    %78 = vector.broadcast %3 : vector<1x128xf32> to vector<128x128xf32>
    %79 = arith.addf %77, %78 : vector<128x128xf32>
    %cst_41 = arith.constant 5.000000e-01 : f32
    %80 = vector.broadcast %cst_41 : f32 to vector<128x128xf32>
    %81 = arith.mulf %80, %79 : vector<128x128xf32>
    %82 = math.tanh %81 : vector<128x128xf32>
    %cst_42 = arith.constant 5.000000e-01 : f32
    %83 = vector.broadcast %cst_42 : f32 to vector<128x128xf32>
    %84 = arith.mulf %83, %82 : vector<128x128xf32>
    %cst_43 = arith.constant 5.000000e-01 : f32
    %85 = vector.broadcast %cst_43 : f32 to vector<128x128xf32>
    %86 = arith.addf %84, %85 : vector<128x128xf32>
    %87 = arith.mulf %79, %86 : vector<128x128xf32>
    %88 = arith.truncf %87 : vector<128x128xf32> to vector<128x128xbf16>
    %c0_44 = arith.constant 0 : index
    %c0_45 = arith.constant 0 : index
    %89 = vector.load %arg9[%c0_44, %c0_45] : memref<128x128xbf16, #tpu.memory_space<vmem>>, vector<128x128xbf16>
    %cst_46 = arith.constant dense<0.000000e+00> : vector<128x128xf32>
    %90 = tpu.matmul %88, %89, %cst_46 {dimension_numbers = #tpu.dot_dimension_numbers<[1], [0], [0], [1], [0, 0, 1, 1], [], []>} : vector<128x128xbf16>, vector<128x128xbf16>, vector<128x128xf32> -> vector<128x128xf32>
    %91 = vector.broadcast %4 : vector<1x128xf32> to vector<128x128xf32>
    %92 = arith.addf %90, %91 : vector<128x128xf32>
    %93 = arith.truncf %92 : vector<128x128xf32> to vector<128x128xbf16>
    %c0_47 = arith.constant 0 : index
    %c0_48 = arith.constant 0 : index
    %94 = vector.load %arg11[%c0_47, %c0_48] : memref<128x128xbf16, #tpu.memory_space<vmem>>, vector<128x128xbf16>
    %cst_49 = arith.constant dense<0.000000e+00> : vector<128x128xf32>
    %95 = tpu.matmul %93, %94, %cst_49 {dimension_numbers = #tpu.dot_dimension_numbers<[1], [0], [0], [1], [0, 0, 1, 1], [], []>} : vector<128x128xbf16>, vector<128x128xbf16>, vector<128x128xf32> -> vector<128x128xf32>
    %96 = vector.broadcast %6 : vector<1x128xf32> to vector<128x128xf32>
    %97 = arith.addf %95, %96 : vector<128x128xf32>
    %cst_50 = arith.constant dense<0.000000e+00> : vector<128xf32>
    %98 = vector.multi_reduction <add>, %97, %cst_50 [1] : vector<128x128xf32> to vector<128xf32>
    %99 = vector.shape_cast %98 : vector<128xf32> to vector<128x1xf32>
    %cst_51 = arith.constant 1.280000e+02 : f32
    %100 = vector.broadcast %cst_51 : f32 to vector<128x1xf32>
    %101 = arith.divf %99, %100 : vector<128x1xf32>
    %102 = vector.broadcast %101 : vector<128x1xf32> to vector<128x128xf32>
    %103 = arith.subf %97, %102 : vector<128x128xf32>
    %104 = arith.mulf %103, %103 : vector<128x128xf32>
    %cst_52 = arith.constant dense<0.000000e+00> : vector<128xf32>
    %105 = vector.multi_reduction <add>, %104, %cst_52 [1] : vector<128x128xf32> to vector<128xf32>
    %106 = vector.shape_cast %105 : vector<128xf32> to vector<128x1xf32>
    %cst_53 = arith.constant 1.280000e+02 : f32
    %107 = vector.broadcast %cst_53 : f32 to vector<128x1xf32>
    %108 = arith.divf %106, %107 : vector<128x1xf32>
    %cst_54 = arith.constant 9.99999974E-6 : f32
    %109 = vector.broadcast %cst_54 : f32 to vector<128x1xf32>
    %110 = arith.addf %108, %109 : vector<128x1xf32>
    %111 = math.rsqrt %110 : vector<128x1xf32>
    %112 = vector.broadcast %111 : vector<128x1xf32> to vector<128x128xf32>
    %113 = arith.mulf %103, %112 : vector<128x128xf32>
    %114 = vector.broadcast %7 : vector<1x128xf32> to vector<128x128xf32>
    %115 = arith.mulf %113, %114 : vector<128x128xf32>
    %116 = vector.broadcast %8 : vector<1x128xf32> to vector<128x128xf32>
    %117 = arith.addf %115, %116 : vector<128x128xf32>
    %c0_55 = arith.constant 0 : index
    %c0_56 = arith.constant 0 : index
    %118 = vector.load %arg1[%c0_55, %c0_56] : memref<128x32xf32, #tpu.memory_space<vmem>>, vector<128x32xf32>
    %119 = arith.truncf %118 : vector<128x32xf32> to vector<128x32xbf16>
    %c0_57 = arith.constant 0 : index
    %c0_58 = arith.constant 0 : index
    %120 = vector.load %arg10[%c0_57, %c0_58] : memref<32x128xbf16, #tpu.memory_space<vmem>>, vector<32x128xbf16>
    %cst_59 = arith.constant dense<0.000000e+00> : vector<128x128xf32>
    %121 = tpu.matmul %119, %120, %cst_59 {dimension_numbers = #tpu.dot_dimension_numbers<[1], [0], [0], [1], [0, 0, 1, 1], [], []>} : vector<128x32xbf16>, vector<32x128xbf16>, vector<128x128xf32> -> vector<128x128xf32>
    %122 = vector.broadcast %5 : vector<1x128xf32> to vector<128x128xf32>
    %123 = arith.addf %121, %122 : vector<128x128xf32>
    %124 = arith.addf %117, %123 : vector<128x128xf32>
    %c0_60 = arith.constant 0 : index
    %c0_61 = arith.constant 0 : index
    %125 = vector.load %arg12[%c0_60, %c0_61] : memref<128x128xf32, #tpu.memory_space<vmem>>, vector<128x128xf32>
    tpu.vector_store %arg12[%c0_60, %c0_61], %124 {strides = array<i32>} : memref<128x128xf32, #tpu.memory_space<vmem>>, vector<128x128xf32>,
    return
  }
  func.func @transform_0(%arg0: i32) -> (i32, i32) {
    %c0_i32 = arith.constant 0 : i32
    %c0_i32_0 = arith.constant 0 : i32
    return %arg0, %c0_i32 : i32, i32
  }
  func.func @transform_1(%arg0: i32) -> (i32, i32) {
    %c0_i32 = arith.constant 0 : i32
    %c0_i32_0 = arith.constant 0 : i32
    return %arg0, %c0_i32 : i32, i32
  }
  func.func @transform_2(%arg0: i32) -> (i32, i32) {
    %c0_i32 = arith.constant 0 : i32
    %c0_i32_0 = arith.constant 0 : i32
    %c0_i32_1 = arith.constant 0 : i32
    return %c0_i32, %c0_i32_0 : i32, i32
  }
  func.func @transform_3(%arg0: i32) -> (i32, i32) {
    %c0_i32 = arith.constant 0 : i32
    %c0_i32_0 = arith.constant 0 : i32
    %c0_i32_1 = arith.constant 0 : i32
    return %c0_i32, %c0_i32_0 : i32, i32
  }
  func.func @transform_4(%arg0: i32) -> (i32, i32) {
    %c0_i32 = arith.constant 0 : i32
    %c0_i32_0 = arith.constant 0 : i32
    %c0_i32_1 = arith.constant 0 : i32
    return %c0_i32, %c0_i32_0 : i32, i32
  }
  func.func @transform_5(%arg0: i32) -> (i32, i32) {
    %c0_i32 = arith.constant 0 : i32
    %c0_i32_0 = arith.constant 0 : i32
    %c0_i32_1 = arith.constant 0 : i32
    return %c0_i32, %c0_i32_0 : i32, i32
  }
  func.func @transform_6(%arg0: i32) -> (i32, i32) {
    %c0_i32 = arith.constant 0 : i32
    %c0_i32_0 = arith.constant 0 : i32
    %c0_i32_1 = arith.constant 0 : i32
    return %c0_i32, %c0_i32_0 : i32, i32
  }
  func.func @transform_7(%arg0: i32) -> (i32, i32) {
    %c0_i32 = arith.constant 0 : i32
    %c0_i32_0 = arith.constant 0 : i32
    %c0_i32_1 = arith.constant 0 : i32
    return %c0_i32, %c0_i32_0 : i32, i32
  }
  func.func @transform_8(%arg0: i32) -> (i32, i32) {
    %c0_i32 = arith.constant 0 : i32
    %c0_i32_0 = arith.constant 0 : i32
    %c0_i32_1 = arith.constant 0 : i32
    return %c0_i32, %c0_i32_0 : i32, i32
  }
  func.func @transform_9(%arg0: i32) -> (i32, i32) {
    %c0_i32 = arith.constant 0 : i32
    %c0_i32_0 = arith.constant 0 : i32
    %c0_i32_1 = arith.constant 0 : i32
    return %c0_i32, %c0_i32_0 : i32, i32
  }
  func.func @transform_10(%arg0: i32) -> (i32, i32) {
    %c0_i32 = arith.constant 0 : i32
    %c0_i32_0 = arith.constant 0 : i32
    %c0_i32_1 = arith.constant 0 : i32
    return %c0_i32, %c0_i32_0 : i32, i32
  }
  func.func @transform_11(%arg0: i32) -> (i32, i32) {
    %c0_i32 = arith.constant 0 : i32
    %c0_i32_0 = arith.constant 0 : i32
    return %arg0, %c0_i32 : i32, i32
  }
}

</mosaic_0001>

<bundles_post_ra>
// kernel: tpu_custom_call.1
= control target key start
LH: loop header
LB: loop body
LE: loop exit
PB: predicated region body
PF: predicated region fallthrough
CT: control target
= control target key end

     0   :  { %s5700_s0 = inlined_call_operand.vmem [shape: f32[256,32], index: 0, kind: input, shape index: {}]   ;;  %s5701_s1 = inlined_call_operand.vmem [shape: f32[256,64], index: 1, kind: input, shape index: {}]   ;;  %s5702_s2 = inlined_call_operand.vmem [shape: f32[8,128], index: 2, kind: input, shape index: {}]   ;;  %s5703_s3 = inlined_call_operand.vmem [shape: f32[32,8], index: 3, kind: input, shape index: {}]   ;;  %s5704_s4 = inlined_call_operand.vmem [shape: bf16[8,32], index: 4, kind: input, shape index: {}]   ;;  %s5705_s5 = inlined_call_operand.vmem [shape: f32[128,8], index: 5, kind: input, shape index: {}]   ;;  %s5706_s6 = inlined_call_operand.vmem [shape: bf16[8,128], index: 6, kind: input, shape index: {}]   ;;  %s5707_s7 = inlined_call_operand.vmem [shape: bf16[96,128], index: 7, kind: input, shape index: {}]   ;;  %s5708_s8 = inlined_call_operand.vmem [shape: bf16[128,128], index: 8, kind: input, shape index: {}]   ;;  %s5709_s9 = inlined_call_operand.vmem [shape: bf16[32,128], index: 9, kind: input, shape index: {}]   ;;  %s5710_s10 = inlined_call_operand.vmem [shape: bf16[128,128], index: 10, kind: input, shape index: {}]   ;;  %s5711_s11 = inlined_call_operand.hbm [shape: f32[256,128], index: 11, kind: output, shape index: {}]  }
   0x1   :  { %5712 = sst [smem:[#allocation5_spill]] %s5700_s0 }
   0x2   :  { %16 = vsyncpa [#allocation3], 0 }
   0x3   :  { %18 = vsyncpa [#allocation3 + $0x1], 0  ;;  %s4459_s17 = smov 0   ;;  %s4461_s18 = smov 0  }
   0x4   :  { %s4463_s19 = smov 0   ;;  %s4465_s20 = smov 0  }
   0x5 LB: > { %s4480_s21 = sadd.s32 4294967295, %s4393_s20   ;;  %s3297_s22 = sadd.s32 4294967294, %s4393_s20   ;;  %s4393_s20 = sphi %s4465_s20, %s5719_s20   ;;  %s4389_s19 = sphi %s4463_s19, %s5718_s19   ;;  %s4385_s18 = sphi %s4461_s18, %s5717_s18   ;;  %s4381_s17 = sphi %s4459_s17, %s5716_s17  }
   0x6   : > { %s4484_s23 = sadd.s32 1, %s4393_s20   ;;  %s272_s24 = sadd.s32 1, %s4389_s19 }
   0x7   : > { %s269_s25 = ssub.s32 %s4393_s20, %s4484_s23  ;;  %p282_p0 = scmp.ne.s32.totalorder %s4389_s19, %s4385_s18 }
   0x8   : > { %p270_p1 = scmp.eq.s32.totalorder %s269_s25, 0  ;;  %p283_p2 = scmp.eq.s32.totalorder %s4480_s21, 1 }
   0x9   : > { %p288_p3 = scmp.ne.s32.totalorder %s4385_s18, %s4381_s17  ;;  %p289_p4 = scmp.eq.s32.totalorder %s3297_s22, 1 }
   0xa   : > { %s4495_s26 = scalar_select %p270_p1, %s4389_s19, %s272_s24  }
   0xb   : > { %p4497_p5 = por %p283_p2, %p282_p0  ;;  %p4501_p6 = por %p289_p4, %p288_p3 }
   0xc   : > { %p3300_p7 = scmp.ge.s32.totalorder %s4393_s20, 1  ;;  %p352_p8 = scmp.lt.s32.totalorder %s4393_s20, 3 }
   0xe   : > { %p353_p9 = pnand %p3300_p7, %p352_p8 }
   0xf   : > { %v428_v0 = vld [vmem:[%s5703_s3] sm:$0xff] (!%p353_p9)  ;;  %v429_v1 = vld [vmem:[%s5703_s3 + $0x8] sm:$0xff] (!%p353_p9)  ;;  %v430_v2 = vld [vmem:[%s5703_s3 + $0x10] sm:$0xff] (!%p353_p9)  ;;  %s3302_s16 = sshll.u32 (!%p353_p9), %s4480_s21, 4  ;;  %vm432_vm0 = vcmask (!%p353_p9), 261120   ;;  %s5715_s0 = sld [smem:[#allocation5_spill]] (!%p353_p9) }
  0x10   : > { %356 = sbr.rel (%p353_p9) target bundleno = 2003 (0x7d3), region = 64  ;;  %v3972_v3 = vpack.c.bf16 (!%p353_p9), %v429_v1, %v428_v0  ;;  %v431_v4 = vld [vmem:[%s5703_s3 + $0x18] sm:$0xff] (!%p353_p9)  ;;  %p398_p10 = scmp.lt.s32.totalorder (!%p353_p9), %s3302_s16, 31  ;;  %v907_v6 = vld [vmem:[%s5704_s4] sm:$0xf] (!%p353_p9)  ;;  %vm933_vm1 = vcmask (!%p353_p9), 1043456  }
  0x11   : > { %v3976_v5 = vpack.c.bf16 (!%p353_p9), %v431_v4, %v430_v2  ;;  %v935_v15 = vsel (!%p353_p9), %vm933_vm1, %v907_v6, 0  ;;  %vm908_vm2 = vcmask (!%p353_p9), 64512   ;;  %vm1539_vm3 = vcmask (!%p353_p9), 785408  }
  0x12   : > { %3973 = vmatprep.subr.bf16.mxu0 (!%p353_p9), %v3972_v3  ;;  %3981 = vmatprep.subr.bf16.mxu1 (!%p353_p9), %v3972_v3 }
  0x13   : > { %3975 = vmatpush3.bf16.msra.mxu0 (!%p353_p9), %v3972_v3  ;;  %3983 = vmatpush3.bf16.msra.mxu1 (!%p353_p9), %v3972_v3 }
  0x14   : > { %3977 = vmatprep.subr.bf16.mxu0 (!%p353_p9), %v3976_v5  ;;  %3985 = vmatprep.subr.bf16.mxu1 (!%p353_p9), %v3976_v5 }
  0x17   : > { %s5721_s16 = smov (!%p398_p10, %s3302_s16), 31  ;;  %3979 = vmatpush3.bf16.msra.mxu0 %v3976_v5  ;;  %3987 = vmatpush3.bf16.msra.mxu1 %v3976_v5 }
  0x18   : > { %s3303_s25 = sshll.u32 %s5721_s16, 3  ;;  %4052 = vmatprep.subr.msk.bf16.mxu0 %vm933_vm1, %v907_v6  ;;  %4053 = vmatprep.subr.msk.bf16.mxu1 %vm933_vm1, %v907_v6  ;;  %s4395_s16 = smov 32  }
  0x19   : > { %s4531_s14 = scalar_lea.vmem %s5715_s0, %s3303_s25  ;;  %s4669_s24 = scalar_lea.vmem %s5701_s1, %s3303_s25 }
  0x1a   : > { %v4534_v7 = vld [vmem:[%s4531_s14] sm:$0xff]  ;;  %v4537_v8 = vld [vmem:[%s4531_s14 + $0x8] sm:$0xff]  ;;  %v4540_v9 = vld [vmem:[%s4531_s14 + $0x10] sm:$0xff]  ;;  %s4396_s0 = smov [#allocation2]  }
  0x1b   : > { %v626_v10 = vmul.f32 %v4534_v7, %v4534_v7  ;;  %v627_v11 = vmul.f32 %v4537_v8, %v4537_v8  ;;  %v4547_v12 = vld [vmem:[%s4531_s14 + $0x18] sm:$0xff]  ;;  %v628_v13 = vmul.f32 %v4540_v9, %v4540_v9  ;;  %3620 = vmatprep.mubr.msk.f32.mxu0 %vm432_vm0, %v4534_v7  ;;  %v4554_v14 = vld [vmem:[%s4531_s14 + $0x20] sm:$0xff]  ;;  %v4565_v17 = vld [vmem:[%s4531_s14 + $0x28] sm:$0xff]  ;;  %s4335_s15 = sshll.u32 %s4396_s0, 4  ;;  %s4336_s15 = int_to_ptr.vmem [resolvable:$false] %s4335_s15 }
  0x1c   : > { %3621 = vmatmul.mubr.msk.f32.vlgmr.msra.gmra.mrb[0].mxu0 %vm432_vm0, %v4537_v8  ;;  %v629_v16 = vmul.f32 %v4547_v12, %v4547_v12  ;;  %v630_v18 = vmul.f32 %v4554_v14, %v4554_v14  ;;  %v4573_v19 = vld [vmem:[%s4531_s14 + $0x30] sm:$0xff]  ;;  %v4577_v20 = vld [vmem:[%s4531_s14 + $0x38] sm:$0xff]  ;;  %v631_v21 = vmul.f32 %v4565_v17, %v4565_v17  ;;  %v4585_v22 = vld [vmem:[%s4531_s14 + $0x40] sm:$0xff] }
  0x1d   : > { %3652 = vmatprep.mubr.msk.f32.mxu1 %vm432_vm0, %v626_v10  ;;  %3623 = vmatprep.mubr.msk.f32.mxu0 %vm432_vm0, %v4540_v9  ;;  %v632_v23 = vmul.f32 %v4573_v19, %v4573_v19  ;;  %v4593_v24 = vld [vmem:[%s4531_s14 + $0x48] sm:$0xff]  ;;  %v633_v25 = vmul.f32 %v4577_v20, %v4577_v20  ;;  %v4601_v26 = vld [vmem:[%s4531_s14 + $0x50] sm:$0xff]  ;;  %v634_v27 = vmul.f32 %v4585_v22, %v4585_v22  ;;  %v4617_v29 = vld [vmem:[%s4531_s14 + $0x58] sm:$0xff] }
  0x1e   : > { %3653 = vmatmul.mubr.msk.f32.vlgmr.msra.gmra.mrb[0].mxu1 %vm432_vm0, %v627_v11  ;;  %3677 = vmatpush3.bf16.msra.mxu0 %v935_v15  ;;  %v635_v28 = vmul.f32 %v4593_v24, %v4593_v24  ;;  %v636_v30 = vmul.f32 %v4601_v26, %v4601_v26  ;;  %v4622_v31 = vld [vmem:[%s4531_s14 + $0x60] sm:$0xff]  ;;  %v637_v32 = vmul.f32 %v4617_v29, %v4617_v29  ;;  %v4633_v33 = vld [vmem:[%s4531_s14 + $0x68] sm:$0xff]  ;;  %v4638_v35 = vld [vmem:[%s4531_s14 + $0x70] sm:$0xff] }
  0x1f   : > { %3655 = vmatprep.mubr.msk.f32.mxu1 %vm432_vm0, %v628_v13  ;;  %3695 = vmatpush3.bf16.msra.mxu1 %v935_v15  ;;  %v638_v34 = vmul.f32 %v4622_v31, %v4622_v31  ;;  %v639_v36 = vmul.f32 %v4633_v33, %v4633_v33  ;;  %v4649_v37 = vld [vmem:[%s4531_s14 + $0x78] sm:$0xff]  ;;  %v640_v38 = vmul.f32 %v4638_v35, %v4638_v35  ;;  %v1335_v40 = vld [vmem:[%s4669_s24] sm:$0xff]  ;;  %v4673_v41 = vld [vmem:[%s4669_s24 + $0x8] sm:$0xff] }
  0x20   : > { %3624 = vmatmul.mubr.msk.f32.gmra.mrb[2].mxu0 %vm432_vm0, %v4547_v12  ;;  %v641_v39 = vmul.f32 %v4649_v37, %v4649_v37  ;;  %v4676_v42 = vld [vmem:[%s4669_s24 + $0x10] sm:$0xff]  ;;  %v1351_v43 = vmul.f32 0.5, %v1335_v40  ;;  %v1352_v44 = vmul.f32 0.5, %v4673_v41  ;;  %v4680_v45 = vld [vmem:[%s4669_s24 + $0x18] sm:$0xff]  ;;  %v4684_v47 = vld [vmem:[%s4669_s24 + $0x20] sm:$0xff] }
  0x21   : > { %3626 = vmatprep.mubr.msk.f32.mxu0 %vm432_vm0, %v4554_v14  ;;  %v1353_v46 = vmul.f32 0.5, %v4676_v42  ;;  %v4687_v48 = vld [vmem:[%s4669_s24 + $0x28] sm:$0xff]  ;;  %v1354_v49 = vmul.f32 0.5, %v4680_v45  ;;  %v4691_v50 = vld [vmem:[%s4669_s24 + $0x30] sm:$0xff]  ;;  %v1355_v51 = vmul.f32 0.5, %v4684_v47  ;;  %v4695_v52 = vld [vmem:[%s4669_s24 + $0x38] sm:$0xff] }
  0x22   : > { %3656 = vmatmul.mubr.msk.f32.gmra.mrb[2].mxu1 %vm432_vm0, %v629_v16  ;;  %4122 = vtanh.f32 %v1351_v43  ;;  %v1356_v53 = vmul.f32 0.5, %v4687_v48  ;;  %v4699_v54 = vld [vmem:[%s4669_s24 + $0x50] sm:$0xff]  ;;  %v1357_v55 = vmul.f32 0.5, %v4691_v50  ;;  %v4703_v56 = vld [vmem:[%s4669_s24 + $0x58] sm:$0xff]  ;;  %v1358_v57 = vmul.f32 0.5, %v4695_v52  ;;  %v4707_v58 = vld [vmem:[%s4669_s24 + $0x40] sm:$0xff] }
  0x23   : > { %3658 = vmatprep.mubr.msk.f32.mxu1 %vm432_vm0, %v630_v18  ;;  %4124 = vtanh.f32 %v1352_v44  ;;  %v1361_v59 = vmul.f32 0.5, %v4699_v54  ;;  %v4711_v60 = vld [vmem:[%s4669_s24 + $0x48] sm:$0xff]  ;;  %v1362_v61 = vmul.f32 0.5, %v4703_v56  ;;  %v4715_v62 = vld [vmem:[%s4669_s24 + $0x70] sm:$0xff]  ;;  %v1359_v63 = vmul.f32 0.5, %v4707_v58  ;;  %v4719_v0 = vld [vmem:[%s4669_s24 + $0x78] sm:$0xff] }
  0x24   : > { %3627 = vmatmul.mubr.msk.f32.gmra.mrb[4].mxu0 %vm432_vm0, %v4565_v17  ;;  %4126 = vtanh.f32 %v1353_v46  ;;  %v1360_v1 = vmul.f32 0.5, %v4711_v60  ;;  %v4723_v2 = vld [vmem:[%s4669_s24 + $0x60] sm:$0xff]  ;;  %v1365_v3 = vmul.f32 0.5, %v4715_v62  ;;  %v4727_v4 = vld [vmem:[%s4669_s24 + $0x68] sm:$0xff]  ;;  %v1366_v5 = vmul.f32 0.5, %v4719_v0 }
  0x25   : > { %3629 = vmatprep.mubr.msk.f32.mxu0 %vm432_vm0, %v4573_v19  ;;  %4128 = vtanh.f32 %v1354_v49  ;;  %v1363_v10 = vmul.f32 0.5, %v4723_v2  ;;  %v1364_v15 = vmul.f32 0.5, %v4727_v4 }
  0x26   : > { %3659 = vmatmul.mubr.msk.f32.gmra.mrb[4].mxu1 %vm432_vm0, %v631_v21  ;;  %4130 = vtanh.f32 %v1355_v51 }
  0x27   : > { %3661 = vmatprep.mubr.msk.f32.mxu1 %vm432_vm0, %v632_v23  ;;  %4132 = vtanh.f32 %v1356_v53 }
  0x28   : > { %3630 = vmatmul.mubr.msk.f32.gmra.mrb[6].mxu0 %vm432_vm0, %v4577_v20  ;;  %4134 = vtanh.f32 %v1357_v55 }
  0x29   : > { %3632 = vmatprep.mubr.msk.f32.mxu0 %vm432_vm0, %v4585_v22  ;;  %4136 = vtanh.f32 %v1358_v57 }
  0x2a   : > { %3662 = vmatmul.mubr.msk.f32.gmra.mrb[6].mxu1 %vm432_vm0, %v633_v25  ;;  %4138 = vtanh.f32 %v1361_v59 }
  0x2b   : > { %3664 = vmatprep.mubr.msk.f32.mxu1 %vm432_vm0, %v634_v27  ;;  %4140 = vtanh.f32 %v1362_v61 }
  0x2c   : > { %3633 = vmatmul.mubr.msk.f32.gmra.mrb[8].mxu0 %vm432_vm0, %v4593_v24  ;;  %v4123_v6 = vpop.eup %4122  ;;  %4142 = vtanh.f32 %v1359_v63 }
  0x2d   : > { %3635 = vmatprep.mubr.msk.f32.mxu0 %vm432_vm0, %v4601_v26  ;;  %v4125_v11 = vpop.eup %4124  ;;  %v1383_v13 = vmul.f32 0.5, %v4123_v6  ;;  %4144 = vtanh.f32 %v1360_v1 }
  0x2e   : > { %3665 = vmatmul.mubr.msk.f32.gmra.mrb[8].mxu1 %vm432_vm0, %v635_v28  ;;  %v4127_v16 = vpop.eup %4126  ;;  %v1384_v18 = vmul.f32 0.5, %v4125_v11  ;;  %4146 = vtanh.f32 %v1365_v3 }
  0x2f   : > { %3667 = vmatprep.mubr.msk.f32.mxu1 %vm432_vm0, %v636_v30  ;;  %v4129_v21 = vpop.eup %4128  ;;  %v1399_v23 = vadd.f32 0.5, %v1383_v13  ;;  %v1385_v25 = vmul.f32 0.5, %v4127_v16  ;;  %4148 = vtanh.f32 %v1366_v5 }
  0x30   : > { %3636 = vmatmul.mubr.msk.f32.gmra.mrb[10].mxu0 %vm432_vm0, %v4617_v29  ;;  %v4131_v27 = vpop.eup %4130  ;;  %v1400_v28 = vadd.f32 0.5, %v1384_v18  ;;  %v1386_v30 = vmul.f32 0.5, %v4129_v21  ;;  %4150 = vtanh.f32 %v1363_v10 }
  0x31   : > { %3638 = vmatprep.mubr.msk.f32.mxu0 %vm432_vm0, %v4622_v31  ;;  %4152 = vtanh.f32 %v1364_v15 }
  0x32   : > { %3668 = vmatmul.mubr.msk.f32.gmra.mrb[10].mxu1 %vm432_vm0, %v637_v32  ;;  %v4133_v32 = vpop.eup %4132  ;;  %v1416_v43 = vmul.f32 %v1400_v28, %v4673_v41  ;;  %v1402_v44 = vadd.f32 0.5, %v1386_v30 }
  0x33   : > { %3670 = vmatprep.mubr.msk.f32.mxu1 %vm432_vm0, %v638_v34  ;;  %v1415_v34 = vmul.f32 %v1399_v23, %v1335_v40  ;;  %v1388_v46 = vmul.f32 0.5, %v4133_v32 }
  0x34   : > { %3639 = vmatmul.mubr.msk.f32.gmra.mrb[12].mxu0 %vm432_vm0, %v4633_v33  ;;  %v1418_v61 = vmul.f32 %v1402_v44, %v4680_v45 }
  0x35   : > { %3641 = vmatprep.mubr.msk.f32.mxu0 %vm432_vm0, %v4638_v35  ;;  %v1431_v59 = vpack.c.bf16 %v1416_v43, %v1415_v34  ;;  %v1404_v63 = vadd.f32 0.5, %v1388_v46 }
  0x36   : > { %3671 = vmatmul.mubr.msk.f32.gmra.mrb[12].mxu1 %vm432_vm0, %v639_v36  ;;  %v1401_v36 = vadd.f32 0.5, %v1385_v25 }
  0x37   : > { %3673 = vmatprep.mubr.msk.f32.mxu1 %vm432_vm0, %v640_v38  ;;  %v1387_v38 = vmul.f32 0.5, %v4131_v27  ;;  %1447 = vrot.lane.b32.xlu0 %v1431_v59, %s4395_s16 }
  0x38   : > { %3642 = vmatmul.mubr.msk.f32.gmra.mrb[14].mxu0 %vm432_vm0, %v4649_v37  ;;  %v1417_v51 = vmul.f32 %v1401_v36, %v4676_v42  ;;  %v1420_v42 = vmul.f32 %v1404_v63, %v4687_v48 }
  0x39   : > { %v1403_v53 = vadd.f32 0.5, %v1387_v38 }
  0x3a   : > { %3674 = vmatmul.mubr.msk.f32.gmra.mrb[14].mxu1 %vm432_vm0, %v641_v39  ;;  %v4135_v39 = vpop.eup %4134  ;;  %v1432_v41 = vpack.c.bf16 %v1418_v61, %v1417_v51 }
  0x3b   : > { %v4137_v49 = vpop.eup %4136  ;;  %v1389_v55 = vmul.f32 0.5, %v4135_v39  ;;  %v1419_v3 = vmul.f32 %v1403_v53, %v4684_v47 }
  0x3c   : > { %v4139_v57 = vpop.eup %4138  ;;  %v1390_v1 = vmul.f32 0.5, %v4137_v49  ;;  %1449 = vrot.lane.b32.xlu0 %v1432_v41, %s4395_s16 }
  0x3d   : > { %v4141_v40 = vpop.eup %4140  ;;  %v1405_v5 = vadd.f32 0.5, %v1389_v55  ;;  %v1393_v6 = vmul.f32 0.5, %v4139_v57  ;;  %v1433_v23 = vpack.c.bf16 %v1420_v42, %v1419_v3 }
  0x3e   : > { %v4143_v10 = vpop.eup %4142  ;;  %v1406_v11 = vadd.f32 0.5, %v1390_v1  ;;  %v1394_v13 = vmul.f32 0.5, %v4141_v40 }
  0x3f   : > { %v4145_v15 = vpop.eup %4144  ;;  %v1421_v16 = vmul.f32 %v1405_v5, %v4691_v50  ;;  %v1409_v45 = vadd.f32 0.5, %v1393_v6  ;;  %v1391_v18 = vmul.f32 0.5, %v4143_v10  ;;  %1451 = vrot.lane.b32.xlu1 %v1433_v23, %s4395_s16 }
  0x40   : > { %v4147_v21 = vpop.eup %4146  ;;  %v1422_v47 = vmul.f32 %v1406_v11, %v4695_v52  ;;  %v1410_v25 = vadd.f32 0.5, %v1394_v13  ;;  %v1392_v27 = vmul.f32 0.5, %v4145_v15 }
  0x41   : > { %v4149_v28 = vpop.eup %4148  ;;  %v1425_v30 = vmul.f32 %v1409_v45, %v4699_v54  ;;  %v1407_v32 = vadd.f32 0.5, %v1391_v18  ;;  %v1397_v34 = vmul.f32 0.5, %v4147_v21 }
  0x42   : > { %v4151_v36 = vpop.eup %4150  ;;  %v1434_v48 = vpack.c.bf16 %v1422_v47, %v1421_v16  ;;  %v1426_v50 = vmul.f32 %v1410_v25, %v4703_v56  ;;  %v1408_v38 = vadd.f32 0.5, %v1392_v27  ;;  %v1398_v39 = vmul.f32 0.5, %v4149_v28 }
  0x43   : > { %v4153_v43 = vpop.eup %4152  ;;  %v1423_v52 = vmul.f32 %v1407_v32, %v4707_v58  ;;  %v1413_v44 = vadd.f32 0.5, %v1397_v34  ;;  %v1395_v46 = vmul.f32 0.5, %v4151_v36 }
  0x44   : > { %v1424_v49 = vmul.f32 %v1408_v38, %v4711_v60  ;;  %v1414_v54 = vadd.f32 0.5, %v1398_v39  ;;  %v1396_v51 = vmul.f32 0.5, %v4153_v43  ;;  %v1436_v53 = vpack.c.bf16 %v1426_v50, %v1425_v30  ;;  %1453 = vrot.lane.b32.xlu1 %v1434_v48, %s4395_s16 }
  0x45   : > { %v1411_v55 = vadd.f32 0.5, %v1395_v46  ;;  %v1429_v59 = vmul.f32 %v1413_v44, %v4715_v62 }
  0x46   : > { %v1435_v57 = vpack.c.bf16 %v1424_v49, %v1423_v52  ;;  %v1430_v56 = vmul.f32 %v1414_v54, %v4719_v0  ;;  %v1412_v61 = vadd.f32 0.5, %v1396_v51 }
  0x47   : > { %v1427_v63 = vmul.f32 %v1411_v55, %v4723_v2 }
  0x48   : > { %1455 = vrot.lane.b32.xlu0 %v1435_v57, %s4395_s16  ;;  %v1428_v58 = vmul.f32 %v1412_v61, %v4727_v4  ;;  %1457 = vrot.lane.b32.xlu1 %v1436_v53, %s4395_s16  ;;  %v1438_v60 = vpack.c.bf16 %v1430_v56, %v1429_v59 }
  0x4a   : > { %v1437_v1 = vpack.c.bf16 %v1428_v58, %v1427_v63 }
  0x4c   : > { %1459 = vrot.lane.b32.xlu0 %v1437_v1, %s4395_s16  ;;  %1461 = vrot.lane.b32.xlu1 %v1438_v60, %s4395_s16  ;;  %s3415_s16 = sshll.u32 %s4480_s21, 11 }
  0x4d   : > { %s5652_s12 = scalar_lea.hbm %s5711_s11, %s3415_s16 }
  0xef   : > { %v3622_v40 = vpop.f32.mrb[0].mxu0 }
  0xf0   : > { %v836_v62 = vmul.f32 %v3622_v40, %v3622_v40  ;;  %v547_v5 = vpop.f32.mrb[1].mxu0  ;;  %v1035_v51 = vsub.f32 0.0, %v3622_v40 }
  0xf1   : > { %v3654_v3 = vpop.f32.mrb[0].mxu1  ;;  %v835_v6 = vmul.f32 %v547_v5, %v547_v5  ;;  %v1034_v56 = vsub.f32 0.0, %v547_v5 }
  0xf2   : > { %v756_v0 = vpop.f32.mrb[1].mxu1  ;;  %v852_v10 = vsub.f32 %v3654_v3, %v836_v62 }
  0xf3   : > { %v851_v2 = vsub.f32 %v756_v0, %v835_v6  ;;  %v4755_v41 = vpop.f32.mrb[2].mxu0 }
  0xf4   : > { %v868_v4 = vadd.f32 1e-05, %v852_v10  ;;  %v838_v11 = vmul.f32 %v4755_v41, %v4755_v41  ;;  %v4759_v13 = vpop.f32.mrb[3].mxu0  ;;  %v1037_v5 = vsub.f32 0.0, %v4755_v41 }
  0xf5   : > { %v3657_v42 = vpop.f32.mrb[2].mxu1  ;;  %v867_v16 = vadd.f32 1e-05, %v851_v2  ;;  %v837_v45 = vmul.f32 %v4759_v13, %v4759_v13 }
  0xf6   : > { %v766_v15 = vpop.f32.mrb[3].mxu1  ;;  %4154 = vrsqrt.f32 %v868_v4  ;;  %v854_v18 = vsub.f32 %v3657_v42, %v838_v11 }
  0xf7   : > { %4156 = vrsqrt.f32 %v867_v16  ;;  %v853_v21 = vsub.f32 %v766_v15, %v837_v45  ;;  %v4763_v23 = vpop.f32.mrb[4].mxu0  ;;  %v1036_v15 = vsub.f32 0.0, %v4759_v13 }
  0xf8   : > { %v870_v25 = vadd.f32 1e-05, %v854_v18  ;;  %v840_v27 = vmul.f32 %v4763_v23, %v4763_v23  ;;  %v4767_v28 = vpop.f32.mrb[5].mxu0 }
  0xf9   : > { %v3660_v47 = vpop.f32.mrb[4].mxu1  ;;  %v869_v32 = vadd.f32 1e-05, %v853_v21  ;;  %v839_v34 = vmul.f32 %v4767_v28, %v4767_v28 }
  0xfa   : > { %v776_v30 = vpop.f32.mrb[5].mxu1  ;;  %4158 = vrsqrt.f32 %v870_v25  ;;  %v856_v36 = vsub.f32 %v3660_v47, %v840_v27 }
  0xfb   : > { %4160 = vrsqrt.f32 %v869_v32  ;;  %v855_v48 = vsub.f32 %v776_v30, %v839_v34  ;;  %v4771_v50 = vpop.f32.mrb[6].mxu0 }
  0xfc   : > { %v872_v39 = vadd.f32 1e-05, %v856_v36  ;;  %v842_v43 = vmul.f32 %v4771_v50, %v4771_v50  ;;  %v4775_v52 = vpop.f32.mrb[7].mxu0  ;;  %v1039_v36 = vsub.f32 0.0, %v4763_v23 }
  0xfd   : > { %v3663_v38 = vpop.f32.mrb[6].mxu1  ;;  %v871_v46 = vadd.f32 1e-05, %v855_v48  ;;  %v841_v49 = vmul.f32 %v4775_v52, %v4775_v52 }
  0xfe   : > { %v786_v44 = vpop.f32.mrb[7].mxu1  ;;  %4162 = vrsqrt.f32 %v872_v39  ;;  %v858_v54 = vsub.f32 %v3663_v38, %v842_v43 }
  0xff   : > { %4164 = vrsqrt.f32 %v871_v46  ;;  %v857_v53 = vsub.f32 %v786_v44, %v841_v49  ;;  %v4779_v55 = vpop.f32.mrb[8].mxu0  ;;  %v1038_v46 = vsub.f32 0.0, %v4767_v28 }
 0x100   : > { %v4155_v59 = vpop.eup %4154  ;;  %v874_v61 = vadd.f32 1e-05, %v858_v54  ;;  %v844_v63 = vmul.f32 %v4779_v55, %v4779_v55  ;;  %v4783_v58 = vpop.f32.mrb[9].mxu0 }
 0x101   : > { %v3666_v57 = vpop.f32.mrb[8].mxu1  ;;  %v4157_v1 = vpop.eup %4156  ;;  %v873_v3 = vadd.f32 1e-05, %v857_v53  ;;  %v843_v62 = vmul.f32 %v4783_v58, %v4783_v58  ;;  %v1051_v40 = vmul.f32 %v4155_v59, %v1035_v51 }
 0x102   : > { %v796_v60 = vpop.f32.mrb[9].mxu1  ;;  %4166 = vrsqrt.f32 %v874_v61  ;;  %v860_v0 = vsub.f32 %v3666_v57, %v844_v63  ;;  %v899_v6 = vpack.c.bf16 %v4155_v59, %v4157_v1  ;;  %v1050_v10 = vmul.f32 %v4157_v1, %v1034_v56 }
 0x103   : > { %4168 = vrsqrt.f32 %v873_v3  ;;  %v859_v2 = vsub.f32 %v796_v60, %v843_v62  ;;  %v4788_v42 = vpop.f32.mrb[10].mxu0  ;;  %v1041_v60 = vsub.f32 0.0, %v4771_v50 }
 0x104   : > { %v4159_v11 = vpop.eup %4158  ;;  %v876_v16 = vadd.f32 1e-05, %v860_v0  ;;  %v846_v45 = vmul.f32 %v4788_v42, %v4788_v42  ;;  %v4793_v18 = vpop.f32.mrb[11].mxu0  ;;  %3678 = vmatprep.mubr.msk.bf16.mxu0 %vm908_vm2, %v899_v6  ;;  %v1066_v47 = vpack.c.bf16 %v1051_v40, %v1050_v10  ;;  %v1040_v0 = vsub.f32 0.0, %v4775_v52 }
 0x105   : > { %v3669_v4 = vpop.f32.mrb[10].mxu1  ;;  %v4161_v25 = vpop.eup %4160  ;;  %v1053_v41 = vmul.f32 %v4159_v11, %v1037_v5  ;;  %v875_v27 = vadd.f32 1e-05, %v859_v2  ;;  %v845_v30 = vmul.f32 %v4793_v18, %v4793_v18 }
 0x106   : > { %v806_v21 = vpop.f32.mrb[11].mxu1  ;;  %v900_v32 = vpack.c.bf16 %v4159_v11, %v4161_v25  ;;  %v1052_v34 = vmul.f32 %v4161_v25, %v1036_v15  ;;  %4170 = vrsqrt.f32 %v876_v16  ;;  %v862_v13 = vsub.f32 %v3669_v4, %v846_v45  ;;  %3696 = vmatprep.mubr.msk.bf16.mxu1 %vm908_vm2, %v1066_v47 }
 0x107   : > { %4172 = vrsqrt.f32 %v875_v27  ;;  %v861_v48 = vsub.f32 %v806_v21, %v845_v30  ;;  %v4800_v38 = vpop.f32.mrb[12].mxu0  ;;  %v1043_v25 = vsub.f32 0.0, %v4779_v55  ;;  %v1042_v27 = vsub.f32 0.0, %v4783_v58 }
 0x108   : > { %v4163_v43 = vpop.eup %4162  ;;  %v1067_v44 = vpack.c.bf16 %v1053_v41, %v1052_v34  ;;  %v878_v49 = vadd.f32 1e-05, %v862_v13  ;;  %v848_v54 = vmul.f32 %v4800_v38, %v4800_v38  ;;  %v4805_v51 = vpop.f32.mrb[13].mxu0  ;;  %3679 = vmatmul.mubr.msk.bf16.vlgmr.msra.gmra.mrb[16].mxu0 %vm908_vm2, %v900_v32 }
 0x109   : > { %v3672_v39 = vpop.f32.mrb[12].mxu1  ;;  %v4165_v57 = vpop.eup %4164  ;;  %v877_v23 = vadd.f32 1e-05, %v861_v48  ;;  %v847_v59 = vmul.f32 %v4805_v51, %v4805_v51  ;;  %v1055_v56 = vmul.f32 %v4163_v43, %v1039_v36 }
 0x10a   : > { %v816_v53 = vpop.f32.mrb[13].mxu1  ;;  %4174 = vrsqrt.f32 %v878_v49  ;;  %v864_v61 = vsub.f32 %v3672_v39, %v848_v54  ;;  %3697 = vmatmul.mubr.msk.bf16.vlgmr.msra.gmra.mrb[16].mxu1 %vm908_vm2, %v1067_v44  ;;  %v1054_v28 = vmul.f32 %v4165_v57, %v1038_v46  ;;  %v901_v63 = vpack.c.bf16 %v4163_v43, %v4165_v57 }
 0x10b   : > { %4176 = vrsqrt.f32 %v877_v23  ;;  %v863_v1 = vsub.f32 %v816_v53, %v847_v59  ;;  %v3643_v3 = vpop.f32.mrb[14].mxu0  ;;  %v1045_v43 = vsub.f32 0.0, %v4788_v42  ;;  %v1044_v44 = vsub.f32 0.0, %v4793_v18 }
 0x10c   : > { %v4167_v40 = vpop.eup %4166  ;;  %v880_v6 = vadd.f32 1e-05, %v864_v61  ;;  %v850_v10 = vmul.f32 %v3643_v3, %v3643_v3  ;;  %v617_v5 = vpop.f32.mrb[15].mxu0  ;;  %v1068_v4 = vpack.c.bf16 %v1055_v56, %v1054_v28  ;;  %3682 = vmatprep.mubr.msk.bf16.mxu0 %vm908_vm2, %v901_v63  ;;  %v1047_v57 = vsub.f32 0.0, %v4800_v38 }
 0x10d   : > { %v3675_v62 = vpop.f32.mrb[14].mxu1  ;;  %v4169_v11 = vpop.eup %4168  ;;  %v879_v15 = vadd.f32 1e-05, %v863_v1  ;;  %v849_v16 = vmul.f32 %v617_v5, %v617_v5  ;;  %v1057_v45 = vmul.f32 %v4167_v40, %v1041_v60  ;;  %v1046_v59 = vsub.f32 0.0, %v4805_v51 }
 0x10e   : > { %v826_v2 = vpop.f32.mrb[15].mxu1  ;;  %4178 = vrsqrt.f32 %v880_v6  ;;  %v866_v50 = vsub.f32 %v3675_v62, %v850_v10  ;;  %3700 = vmatprep.mubr.msk.bf16.mxu1 %vm908_vm2, %v1068_v4  ;;  %v902_v21 = vpack.c.bf16 %v4167_v40, %v4169_v11  ;;  %v1056_v47 = vmul.f32 %v4169_v11, %v1040_v0  ;;  %v4099_v10 = vld [vmem:[%s5707_s7 + $0x8] sm:$0xff]   ;;  %v4102_v4 = vld [vmem:[%s5707_s7 + $0x20] sm:$0xff]  }
 0x10f   : > { %4180 = vrsqrt.f32 %v879_v15  ;;  %v865_v52 = vsub.f32 %v826_v2, %v849_v16  ;;  %v1049_v63 = vsub.f32 0.0, %v3643_v3  ;;  %v1048_v1 = vsub.f32 0.0, %v617_v5  ;;  %v4098_v3 = vld [vmem:[%s5707_s7] sm:$0xff]   ;;  %v4100_v5 = vld [vmem:[%s5707_s7 + $0x10] sm:$0xff]   ;;  %v4101_v2 = vld [vmem:[%s5707_s7 + $0x18] sm:$0xff]  }
 0x110   : > { %v4171_v41 = vpop.eup %4170  ;;  %v882_v30 = vadd.f32 1e-05, %v866_v50  ;;  %3683 = vmatmul.mubr.msk.bf16.gmra.mrb[20].mxu0 %vm908_vm2, %v902_v21  ;;  %v1069_v32 = vpack.c.bf16 %v1057_v45, %v1056_v47  ;;  %3712 = vmatprep.subr.bf16.mxu0 %v4098_v3  ;;  %v4103_v11 = vld [vmem:[%s5707_s7 + $0x28] sm:$0xff]   ;;  %v1653_v15 = vld [vmem:[%s5705_s5] sm:$0xff]  ;;  %v1655_v45 = vld [vmem:[%s5705_s5 + $0x10] sm:$0xff] }
 0x111   : > { %v4173_v34 = vpop.eup %4172  ;;  %v881_v13 = vadd.f32 1e-05, %v865_v52  ;;  %v1059_v36 = vmul.f32 %v4171_v41, %v1043_v25  ;;  %3713 = vmatpush3.bf16.msra.mxu0 %v4098_v3  ;;  %v1654_v16 = vld [vmem:[%s5705_s5 + $0x8] sm:$0xff]  ;;  %v1656_v21 = vld [vmem:[%s5705_s5 + $0x18] sm:$0xff]  ;;  %v1657_v25 = vld [vmem:[%s5705_s5 + $0x20] sm:$0xff] }
 0x112   : > { %4182 = vrsqrt.f32 %v882_v30  ;;  %3701 = vmatmul.mubr.msk.bf16.gmra.mrb[20].mxu1 %vm908_vm2, %v1069_v32  ;;  %v1058_v48 = vmul.f32 %v4173_v34, %v1042_v27  ;;  %v903_v39 = vpack.c.bf16 %v4171_v41, %v4173_v34  ;;  %3714 = vmatprep.subr.bf16.mxu0 %v4099_v10  ;;  %v4858_v50 = vpack.c.bf16 %v1654_v16, %v1653_v15  ;;  %v1658_v52 = vld [vmem:[%s5705_s5 + $0x28] sm:$0xff]  ;;  %v1659_v27 = vld [vmem:[%s5705_s5 + $0x30] sm:$0xff]  ;;  %v1660_v30 = vld [vmem:[%s5705_s5 + $0x38] sm:$0xff] }
 0x113   : > { %4184 = vrsqrt.f32 %v881_v13  ;;  %v4863_v47 = vpack.c.bf16 %v1656_v21, %v1655_v45  ;;  %v4875_v41 = vpack.c.bf16 %v1658_v52, %v1657_v25  ;;  %v4885_v32 = vpack.c.bf16 %v1660_v30, %v1659_v27  ;;  %v1661_v34 = vld [vmem:[%s5705_s5 + $0x40] sm:$0xff]  ;;  %v1662_v13 = vld [vmem:[%s5705_s5 + $0x48] sm:$0xff] }
 0x114   : > { %v4175_v55 = vpop.eup %4174  ;;  %v1070_v46 = vpack.c.bf16 %v1059_v36, %v1058_v48  ;;  %3686 = vmatprep.mubr.msk.bf16.mxu0 %vm908_vm2, %v903_v39  ;;  %3989 = vmatprep.subr.bf16.mxu1 %v4858_v50  ;;  %v4895_v36 = vpack.c.bf16 %v1662_v13, %v1661_v34  ;;  %v1663_v48 = vld [vmem:[%s5705_s5 + $0x50] sm:$0xff]  ;;  %v1664_v39 = vld [vmem:[%s5705_s5 + $0x58] sm:$0xff] }
 0x115   : > { %v4177_v58 = vpop.eup %4176  ;;  %v1061_v49 = vmul.f32 %v4175_v55, %v1045_v43  ;;  %3715 = vmatpush3.bf16.msra.mxu0 %v4099_v10  ;;  %3991 = vmatpush3.bf16.msra.mxu1 %v4858_v50  ;;  %v4905_v43 = vpack.c.bf16 %v1664_v39, %v1663_v48 }
 0x116   : > { %3704 = vmatprep.mubr.msk.bf16.mxu1 %vm908_vm2, %v1070_v46  ;;  %v904_v54 = vpack.c.bf16 %v4175_v55, %v4177_v58  ;;  %v1060_v53 = vmul.f32 %v4177_v58, %v1044_v44  ;;  %3716 = vmatprep.subr.bf16.mxu0 %v4100_v5  ;;  %v1665_v55 = vld [vmem:[%s5705_s5 + $0x60] sm:$0xff]  ;;  %v1666_v44 = vld [vmem:[%s5705_s5 + $0x68] sm:$0xff]  ;;  %v1227_v58 = vlaneseq }
 0x117   : > { %3993 = vmatprep.subr.bf16.mxu1 %v4863_v47  ;;  %v4915_v46 = vpack.c.bf16 %v1666_v44, %v1665_v55 }
 0x118   : > { %v4179_v23 = vpop.eup %4178  ;;  %3687 = vmatmul.mubr.msk.bf16.gmra.mrb[24].mxu0 %vm908_vm2, %v904_v54  ;;  %v1071_v42 = vpack.c.bf16 %v1061_v49, %v1060_v53  ;;  %v4920_v49 = vshrl.u32 %v1227_v58, 7  ;;  %v4926_v53 = vld [vmem:[%s5702_s2] sm:$0xff] }
 0x119   : > { %v4181_v56 = vpop.eup %4180  ;;  %v1063_v61 = vmul.f32 %v4179_v23, %v1047_v57  ;;  %3717 = vmatpush3.bf16.msra.mxu0 %v4100_v5  ;;  %3995 = vmatpush3.bf16.msra.mxu1 %v4863_v47 }
 0x11a   : > { %3705 = vmatmul.mubr.msk.bf16.gmra.mrb[24].mxu1 %vm908_vm2, %v1071_v42  ;;  %v1062_v18 = vmul.f32 %v4181_v56, %v1046_v59  ;;  %v905_v28 = vpack.c.bf16 %v4179_v23, %v4181_v56  ;;  %3718 = vmatprep.subr.bf16.mxu0 %v4101_v2  ;;  %v1229_v54 = vsub.s32 0, %v4920_v49 }
 0x11b   : > { %3997 = vmatprep.subr.bf16.mxu1 %v4875_v41 }
 0x11c   : > { %v4183_v60 = vpop.eup %4182  ;;  %v1072_v62 = vpack.c.bf16 %v1063_v61, %v1062_v18  ;;  %3690 = vmatprep.mubr.msk.bf16.mxu0 %vm908_vm2, %v905_v28  ;;  %v4930_v42 = vrot.slane %v4926_v53, %v1229_v54 }
 0x11d   : > { %v4185_v40 = vpop.eup %4184  ;;  %v1065_v38 = vmul.f32 %v4183_v60, %v1049_v63  ;;  %3719 = vmatpush3.bf16.msra.mxu0 %v4101_v2  ;;  %3999 = vmatpush3.bf16.msra.mxu1 %v4875_v41 }
 0x11e   : > { %3708 = vmatprep.mubr.msk.bf16.mxu1 %vm908_vm2, %v1072_v62  ;;  %v906_v51 = vpack.c.bf16 %v4183_v60, %v4185_v40  ;;  %v1064_v0 = vmul.f32 %v4185_v40, %v1048_v1  ;;  %3720 = vmatprep.subr.bf16.mxu0 %v4102_v4 }
 0x11f   : > { %4001 = vmatprep.subr.bf16.mxu1 %v4885_v32 }
 0x120   : > { %3691 = vmatmul.mubr.msk.bf16.gmra.mrb[28].mxu0 %vm908_vm2, %v906_v51  ;;  %v1073_v6 = vpack.c.bf16 %v1065_v38, %v1064_v0 }
 0x121   : > { %3721 = vmatpush3.bf16.msra.mxu0 %v4102_v4  ;;  %4003 = vmatpush3.bf16.msra.mxu1 %v4885_v32 }
 0x122   : > { %3709 = vmatmul.mubr.msk.bf16.gmra.mrb[28].mxu1 %vm908_vm2, %v1073_v6  ;;  %3722 = vmatprep.subr.bf16.mxu0 %v4103_v11 }
 0x123   : > { %4005 = vmatprep.subr.bf16.mxu1 %v4895_v36 }
 0x125   : > { %3723 = vmatpush3.bf16.msra.mxu0 %v4103_v11  ;;  %4007 = vmatpush3.bf16.msra.mxu1 %v4895_v36 }
 0x126   : > { %4021 = vmatprep.subr.bf16.mxu0 %v4858_v50  ;;  %4009 = vmatprep.subr.bf16.mxu1 %v4905_v43 }
 0x129   : > { %4011 = vmatpush3.bf16.msra.mxu1 %v4905_v43 }
 0x12a   : > { %4013 = vmatprep.subr.bf16.mxu1 %v4915_v46 }
 0x12d   : > { %4015 = vmatpush3.bf16.msra.mxu1 %v4915_v46 }
 0x1db   : > { %v3680_v57 = vpop.f32.mrb[16].mxu0 }
 0x1dc   : > { %v1197_v23 = vmul.f32 %v3680_v57, %v4540_v9  ;;  %v971_v59 = vpop.f32.mrb[17].mxu0 }
 0x1dd   : > { %v1195_v56 = vmul.f32 %v971_v59, %v4534_v7  ;;  %v3681_v61 = vpop.f32.mrb[18].mxu0  ;;  %v3698_v18 = vpop.f32.mrb[16].mxu1 }
 0x1de   : > { %v1198_v28 = vmul.f32 %v3681_v61, %v4547_v12  ;;  %v1213_v63 = vadd.f32 %v3698_v18, %v1197_v23  ;;  %v974_v60 = vpop.f32.mrb[19].mxu0  ;;  %v1132_v1 = vpop.f32.mrb[17].mxu1 }
 0x1df   : > { %v1196_v62 = vmul.f32 %v974_v60, %v4537_v8  ;;  %v1211_v40 = vadd.f32 %v1195_v56, %v1132_v1  ;;  %v3699_v38 = vpop.f32.mrb[18].mxu1 }
 0x1e0   : > { %v4936_v51 = vadd.f32 %v4930_v42, %v1213_v63  ;;  %v1214_v9 = vadd.f32 %v3699_v38, %v1198_v28  ;;  %v1135_v0 = vpop.f32.mrb[19].mxu1 }
 0x1e1   : > { %v4939_v6 = vadd.f32 %v4930_v42, %v1211_v40  ;;  %v1212_v7 = vadd.f32 %v1196_v62, %v1135_v0 }
 0x1e2   : > { %v1249_v3 = vmul.f32 0.5, %v4936_v51  ;;  %v4943_v12 = vadd.f32 %v4930_v42, %v1214_v9 }
 0x1e3   : > { %v1247_v10 = vmul.f32 0.5, %v4939_v6  ;;  %v4947_v8 = vadd.f32 %v4930_v42, %v1212_v7  ;;  %v3684_v5 = vpop.f32.mrb[20].mxu0 }
 0x1e4   : > { %4186 = vtanh.f32 %v1249_v3  ;;  %v1250_v2 = vmul.f32 0.5, %v4943_v12  ;;  %v1201_v4 = vmul.f32 %v3684_v5, %v4573_v19  ;;  %v987_v11 = vpop.f32.mrb[21].mxu0 }
 0x1e5   : > { %4188 = vtanh.f32 %v1247_v10  ;;  %v1248_v15 = vmul.f32 0.5, %v4947_v8  ;;  %v1199_v16 = vmul.f32 %v987_v11, %v4554_v14  ;;  %v3685_v45 = vpop.f32.mrb[22].mxu0  ;;  %v3702_v21 = vpop.f32.mrb[20].mxu1 }
 0x1e6   : > { %4190 = vtanh.f32 %v1250_v2  ;;  %v1202_v25 = vmul.f32 %v3685_v45, %v4577_v20  ;;  %v1217_v52 = vadd.f32 %v3702_v21, %v1201_v4  ;;  %v990_v27 = vpop.f32.mrb[23].mxu0  ;;  %v1148_v30 = vpop.f32.mrb[21].mxu1 }
 0x1e7   : > { %4192 = vtanh.f32 %v1248_v15  ;;  %v1200_v34 = vmul.f32 %v990_v27, %v4565_v17  ;;  %v1215_v13 = vadd.f32 %v1199_v16, %v1148_v30  ;;  %v3703_v48 = vpop.f32.mrb[22].mxu1 }
 0x1e8   : > { %v4956_v19 = vadd.f32 %v4930_v42, %v1217_v52  ;;  %v1218_v39 = vadd.f32 %v3703_v48, %v1202_v25  ;;  %v1151_v55 = vpop.f32.mrb[23].mxu1 }
 0x1e9   : > { %v4959_v14 = vadd.f32 %v4930_v42, %v1215_v13  ;;  %v1216_v44 = vadd.f32 %v1200_v34, %v1151_v55 }
 0x1ea   : > { %v1253_v58 = vmul.f32 0.5, %v4956_v19  ;;  %v4963_v20 = vadd.f32 %v4930_v42, %v1218_v39  ;;  %v1448_v39 = vpop.permute.xlu0 %1447 }
 0x1eb   : > { %v1251_v54 = vmul.f32 0.5, %v4959_v14  ;;  %v4967_v17 = vadd.f32 %v4930_v42, %v1216_v44  ;;  %v3688_v57 = vpop.f32.mrb[24].mxu0 }
 0x1ec   : > { %4194 = vtanh.f32 %v1253_v58  ;;  %v1254_v23 = vmul.f32 0.5, %v4963_v20  ;;  %v1205_v59 = vmul.f32 %v3688_v57, %v4601_v26  ;;  %v1003_v56 = vpop.f32.mrb[25].mxu0 }
 0x1ed   : > { %4196 = vtanh.f32 %v1251_v54  ;;  %v1252_v61 = vmul.f32 0.5, %v4967_v17  ;;  %v1203_v18 = vmul.f32 %v1003_v56, %v4585_v22  ;;  %v3689_v28 = vpop.f32.mrb[26].mxu0  ;;  %v3706_v63 = vpop.f32.mrb[24].mxu1 }
 0x1ee   : > { %v4187_v60 = vpop.eup %4186  ;;  %4198 = vtanh.f32 %v1254_v23  ;;  %v1206_v1 = vmul.f32 %v3689_v28, %v4617_v29  ;;  %v1221_v62 = vadd.f32 %v3706_v63, %v1205_v59  ;;  %v1006_v40 = vpop.f32.mrb[27].mxu0 }
 0x1ef   : > { %v1164_v38 = vpop.f32.mrb[25].mxu1  ;;  %v4189_v9 = vpop.eup %4188  ;;  %v1281_v0 = vmul.f32 0.5, %v4187_v60  ;;  %4200 = vtanh.f32 %v1252_v61  ;;  %v1204_v26 = vmul.f32 %v1006_v40, %v4593_v24 }
 0x1f0   : > { %v1219_v7 = vadd.f32 %v1203_v18, %v1164_v38  ;;  %v3707_v3 = vpop.f32.mrb[26].mxu1  ;;  %v4191_v10 = vpop.eup %4190  ;;  %v1279_v5 = vmul.f32 0.5, %v4189_v9  ;;  %v4976_v22 = vadd.f32 %v4930_v42, %v1221_v62 }
 0x1f1   : > { %v1222_v2 = vadd.f32 %v3707_v3, %v1206_v1  ;;  %v1167_v4 = vpop.f32.mrb[27].mxu1  ;;  %v4193_v11 = vpop.eup %4192  ;;  %v1297_v29 = vadd.f32 0.5, %v1281_v0  ;;  %v1282_v15 = vmul.f32 0.5, %v4191_v10 }
 0x1f2   : > { %v4979_v16 = vadd.f32 %v4930_v42, %v1219_v7  ;;  %v1220_v45 = vadd.f32 %v1204_v26, %v1167_v4  ;;  %v1295_v21 = vadd.f32 0.5, %v1279_v5  ;;  %v1280_v25 = vmul.f32 0.5, %v4193_v11  ;;  %v1450_v5 = vpop.permute.xlu0 %1449 }
 0x1f3   : > { %v1257_v24 = vmul.f32 0.5, %v4976_v22  ;;  %v4983_v52 = vadd.f32 %v4930_v42, %v1222_v2  ;;  %v1313_v27 = vmul.f32 %v1297_v29, %v4936_v51  ;;  %v1298_v30 = vadd.f32 0.5, %v1282_v15  ;;  %v3692_v48 = vpop.f32.mrb[28].mxu0 }
 0x1f4   : > { %v1255_v34 = vmul.f32 0.5, %v4979_v16  ;;  %v4988_v13 = vadd.f32 %v4930_v42, %v1220_v45  ;;  %v1311_v55 = vmul.f32 %v1295_v21, %v4939_v6  ;;  %v1296_v44 = vadd.f32 0.5, %v1280_v25  ;;  %v1019_v54 = vpop.f32.mrb[29].mxu0  ;;  %v1452_v25 = vpop.permute.xlu1 %1451 }
 0x1f5   : > { %4202 = vtanh.f32 %v1257_v24  ;;  %v1258_v58 = vmul.f32 0.5, %v4983_v52  ;;  %v1314_v57 = vmul.f32 %v1298_v30, %v4943_v12  ;;  %v1209_v23 = vmul.f32 %v3692_v48, %v4638_v35  ;;  %v3693_v59 = vpop.f32.mrb[30].mxu0  ;;  %v3710_v56 = vpop.f32.mrb[28].mxu1 }
 0x1f6   : > { %4204 = vtanh.f32 %v1255_v34  ;;  %v1256_v51 = vmul.f32 0.5, %v4988_v13  ;;  %v4195_v61 = vpop.eup %4194  ;;  %v1312_v18 = vmul.f32 %v1296_v44, %v4947_v8  ;;  %v1207_v6 = vmul.f32 %v1019_v54, %v4622_v31  ;;  %v1022_v63 = vpop.f32.mrb[31].mxu0 }
 0x1f7   : > { %4206 = vtanh.f32 %v1258_v58  ;;  %v1210_v28 = vmul.f32 %v3693_v59, %v4649_v37  ;;  %v1180_v60 = vpop.f32.mrb[29].mxu1  ;;  %v4197_v1 = vpop.eup %4196  ;;  %v1285_v62 = vmul.f32 0.5, %v4195_v61  ;;  %v1225_v12 = vadd.f32 %v3710_v56, %v1209_v23 }
 0x1f8   : > { %4208 = vtanh.f32 %v1256_v51  ;;  %v1208_v40 = vmul.f32 %v1022_v63, %v4633_v33  ;;  %v3711_v38 = vpop.f32.mrb[30].mxu1  ;;  %v4199_v35 = vpop.eup %4198  ;;  %v1283_v9 = vmul.f32 0.5, %v4197_v1  ;;  %v1327_v0 = vpack.c.bf16 %v1312_v18, %v1311_v55 }
 0x1f9   : > { %v1223_v26 = vadd.f32 %v1207_v6, %v1180_v60  ;;  %v1226_v7 = vadd.f32 %v3711_v38, %v1210_v28  ;;  %v1183_v8 = vpop.f32.mrb[31].mxu1  ;;  %v4201_v3 = vpop.eup %4200  ;;  %v1301_v10 = vadd.f32 0.5, %v1285_v62  ;;  %v1286_v31 = vmul.f32 0.5, %v4199_v35 }
 0x1fa   : > { %v5000_v37 = vadd.f32 %v4930_v42, %v1225_v12  ;;  %v1328_v2 = vpack.c.bf16 %v1314_v57, %v1313_v27  ;;  %v1299_v4 = vadd.f32 0.5, %v1283_v9  ;;  %v1284_v11 = vmul.f32 0.5, %v4201_v3  ;;  %v1454_v28 = vpop.permute.xlu1 %1453  ;;  %v1456_v9 = vpop.permute.xlu0 %1455 }
 0x1fb   : > { %v1465_v29 = vsel %vm432_vm0, %v1327_v0, %v1448_v39  ;;  %v5004_v33 = vadd.f32 %v4930_v42, %v1223_v26  ;;  %v1302_v15 = vadd.f32 0.5, %v1286_v31  ;;  %v5008_v21 = vadd.f32 %v4930_v42, %v1226_v7 }
 0x1fc   : > { %v1261_v45 = vmul.f32 0.5, %v5000_v37  ;;  %3724 = vmatprep.mubr.msk.bf16.mxu0 %vm1539_vm3, %v1465_v29  ;;  %v1317_v24 = vmul.f32 %v1301_v10, %v4956_v19  ;;  %v1300_v30 = vadd.f32 0.5, %v1284_v11  ;;  %v1468_v34 = vsel %vm432_vm0, %v1328_v2, %v1450_v5 }
 0x1fd   : > { %v1259_v27 = vmul.f32 0.5, %v5004_v33  ;;  %v1318_v48 = vmul.f32 %v1302_v15, %v4963_v20  ;;  %v1262_v39 = vmul.f32 0.5, %v5008_v21  ;;  %v1224_v55 = vadd.f32 %v1208_v40, %v1183_v8  ;;  %3725 = vmatmul.mubr.msk.bf16.vlgmr.msra.gmra.mrb[32].mxu0 %vm1539_vm3, %v1468_v34 }
 0x1fe   : > { %4210 = vtanh.f32 %v1261_v45  ;;  %v1315_v58 = vmul.f32 %v1299_v4, %v4959_v14  ;;  %v1316_v54 = vmul.f32 %v1300_v30, %v4967_v17  ;;  %4023 = vmatpush3.bf16.msra.mxu0 %v4858_v50 }
 0x1ff   : > { %v4203_v44 = vpop.eup %4202  ;;  %4212 = vtanh.f32 %v1259_v27  ;;  %v1244_v51 = vadd.f32 %v4930_v42, %v1224_v55  ;;  %v1330_v20 = vpack.c.bf16 %v1318_v48, %v1317_v24  ;;  %4025 = vmatprep.subr.bf16.mxu0 %v4863_v47  ;;  %v1501_v27 = vsub.s32 1, %v4920_v49 }
 0x200   : > { %v4205_v19 = vpop.eup %4204  ;;  %v1289_v57 = vmul.f32 0.5, %v4203_v44  ;;  %4214 = vtanh.f32 %v1262_v39  ;;  %v1329_v56 = vpack.c.bf16 %v1316_v54, %v1315_v58 }
 0x201   : > { %v4207_v23 = vpop.eup %4206  ;;  %v1287_v59 = vmul.f32 0.5, %v4205_v19  ;;  %v1260_v14 = vmul.f32 0.5, %v1244_v51  ;;  %v1474_v1 = vsel %vm432_vm0, %v1330_v20, %v1454_v28  ;;  %v5065_v34 = vrot.slane %v4926_v53, %v1501_v27 }
 0x202   : > { %v4209_v61 = vpop.eup %4208  ;;  %v1305_v18 = vadd.f32 0.5, %v1289_v57  ;;  %v1290_v6 = vmul.f32 0.5, %v4207_v23  ;;  %v1471_v50 = vsel %vm432_vm0, %v1329_v56, %v1452_v25  ;;  %4027 = vmatpush3.bf16.msra.mxu0 %v4863_v47  ;;  %v1460_v25 = vpop.permute.xlu0 %1459 }
 0x203   : > { %v1303_v17 = vadd.f32 0.5, %v1287_v59  ;;  %v1288_v63 = vmul.f32 0.5, %v4209_v61  ;;  %4216 = vtanh.f32 %v1260_v14  ;;  %3728 = vmatprep.mubr.msk.bf16.mxu0 %vm1539_vm3, %v1471_v50  ;;  %4029 = vmatprep.subr.bf16.mxu0 %v4875_v41 }
 0x204   : > { %v1306_v60 = vadd.f32 0.5, %v1290_v6  ;;  %v1321_v62 = vmul.f32 %v1305_v18, %v4976_v22  ;;  %v1458_v22 = vpop.permute.xlu1 %1457 }
 0x205   : > { %v1304_v42 = vadd.f32 0.5, %v1288_v63  ;;  %3729 = vmatmul.mubr.msk.bf16.gmra.mrb[36].mxu0 %vm1539_vm3, %v1474_v1  ;;  %v1319_v40 = vmul.f32 %v1303_v17, %v4979_v16 }
 0x206   : > { %v1322_v12 = vmul.f32 %v1306_v60, %v4983_v52  ;;  %4031 = vmatpush3.bf16.msra.mxu0 %v4875_v41 }
 0x207   : > { %v1320_v38 = vmul.f32 %v1304_v42, %v4988_v13  ;;  %4033 = vmatprep.subr.bf16.mxu0 %v4885_v32 }
 0x208   : > { %v4211_v47 = vpop.eup %4210  ;;  %v1332_v35 = vpack.c.bf16 %v1322_v12, %v1321_v62  ;;  %v1462_v24 = vpop.permute.xlu1 %1461 }
 0x209   : > { %v4213_v0 = vpop.eup %4212  ;;  %v1293_v26 = vmul.f32 0.5, %v4211_v47  ;;  %v1331_v7 = vpack.c.bf16 %v1320_v38, %v1319_v40 }
 0x20a   : > { %v4215_v8 = vpop.eup %4214  ;;  %v1291_v52 = vmul.f32 0.5, %v4213_v0  ;;  %4035 = vmatpush3.bf16.msra.mxu0 %v4885_v32  ;;  %v1480_v16 = vsel %vm432_vm0, %v1332_v35, %v1458_v22 }
 0x20b   : > { %v1309_v3 = vadd.f32 0.5, %v1293_v26  ;;  %v1294_v10 = vmul.f32 0.5, %v4215_v8  ;;  %v1477_v31 = vsel %vm432_vm0, %v1331_v7, %v1456_v9  ;;  %4037 = vmatprep.subr.bf16.mxu0 %v4895_v36 }
 0x20c   : > { %3732 = vmatprep.mubr.msk.bf16.mxu0 %vm1539_vm3, %v1477_v31  ;;  %v1307_v2 = vadd.f32 0.5, %v1291_v52 }
 0x20d   : > { %v1310_v41 = vadd.f32 0.5, %v1294_v10  ;;  %v4217_v13 = vpop.eup %4216  ;;  %3733 = vmatmul.mubr.msk.bf16.gmra.mrb[40].mxu0 %vm1539_vm3, %v1480_v16  ;;  %v1325_v5 = vmul.f32 %v1309_v3, %v5000_v37 }
 0x20e   : > { %v1292_v11 = vmul.f32 0.5, %v4217_v13  ;;  %4039 = vmatpush3.bf16.msra.mxu0 %v4895_v36  ;;  %v1323_v15 = vmul.f32 %v1307_v2, %v5004_v33  ;;  %v1667_v33 = vld [vmem:[%s5705_s5 + $0x70] sm:$0xff] }
 0x20f   : > { %v1326_v4 = vmul.f32 %v1310_v41, %v5008_v21  ;;  %4041 = vmatprep.subr.bf16.mxu0 %v4905_v43 }
 0x210   : > { %v1308_v32 = vadd.f32 0.5, %v1292_v11 }
 0x211   : > { %v1334_v29 = vpack.c.bf16 %v1326_v4, %v1325_v5 }
 0x212   : > { %v1324_v45 = vmul.f32 %v1308_v32, %v1244_v51  ;;  %4043 = vmatpush3.bf16.msra.mxu0 %v4905_v43  ;;  %v1668_v43 = vld [vmem:[%s5705_s5 + $0x78] sm:$0xff] }
 0x213   : > { %4045 = vmatprep.subr.bf16.mxu0 %v4915_v46  ;;  %v1486_v36 = vsel %vm432_vm0, %v1334_v29, %v1462_v24  ;;  %v4016_v21 = vpack.c.bf16 %v1668_v43, %v1667_v33  ;;  %v5167_v29 = vld [vmem:[%s5708_s8] sm:$0xff]  }
 0x214   : > { %v1333_v37 = vpack.c.bf16 %v1324_v45, %v1323_v15 }
 0x215   : > { %4017 = vmatprep.subr.bf16.mxu1 %v4016_v21 }
 0x216   : > { %v1483_v30 = vsel %vm432_vm0, %v1333_v37, %v1460_v25  ;;  %4047 = vmatpush3.bf16.msra.mxu0 %v4915_v46  ;;  %4019 = vmatpush3.bf16.msra.mxu1 %v4016_v21  ;;  %v2047_v46 = vld [vmem:[%s5706_s6] sm:$0xf] }
 0x217   : > { %3736 = vmatprep.mubr.msk.bf16.mxu0 %vm1539_vm3, %v1483_v30  ;;  %4049 = vmatprep.subr.bf16.mxu0 %v4016_v21  ;;  %v2073_v53 = vsel %vm933_vm1, %v2047_v46, 0 }
 0x218   : > { %3737 = vmatmul.mubr.msk.bf16.gmra.mrb[44].mxu0 %vm1539_vm3, %v1486_v36  ;;  %4054 = vmatprep.subr.msk.bf16.mxu1 %vm933_vm1, %v2047_v46 }
 0x21a   : > { %4051 = vmatpush3.bf16.msra.mxu0 %v4016_v21 }
 0x21b   : > { %4055 = vmatprep.subr.msk.bf16.mxu0 %vm933_vm1, %v2047_v46 }
 0x2d0   : > { %v3726_v48 = vpop.f32.mrb[32].mxu0 }
 0x2d1   : > { %v1590_v39 = vpop.f32.mrb[33].mxu0  ;;  %v5071_v58 = vadd.f32 %v3726_v48, %v5065_v34 }
 0x2d2   : > { %v5068_v55 = vadd.f32 %v1590_v39, %v5065_v34  ;;  %v3727_v44 = vpop.f32.mrb[34].mxu0 }
 0x2d3   : > { %v1593_v54 = vpop.f32.mrb[35].mxu0  ;;  %v5081_v51 = vadd.f32 %v3727_v44, %v5065_v34  ;;  %v1816_v23 = vmul.f32 %v5071_v58, %v5071_v58 }
 0x2d4   : > { %v5074_v19 = vadd.f32 %v1593_v54, %v5065_v34  ;;  %3772 = vmatprep.mubr.f32.mxu1 %v5068_v55  ;;  %v1814_v57 = vmul.f32 %v5068_v55, %v5068_v55 }
 0x2d5   : > { %v1817_v6 = vmul.f32 %v5081_v51, %v5081_v51 }
 0x2d6   : > { %v1815_v20 = vmul.f32 %v5074_v19, %v5074_v19  ;;  %3773 = vmatmul.mubr.f32.vlgmr.msra.gmra.mrb[32].mxu1 %v5074_v19  ;;  %3828 = vmatprep.mubr.f32.mxu0 %v1814_v57 }
 0x2d7   : > { %3775 = vmatprep.mubr.f32.mxu1 %v5071_v58  ;;  %3853 = vmatpush3.bf16.msra.mxu1 %v2073_v53 }
 0x2d8   : > { %v3730_v59 = vpop.f32.mrb[36].mxu0  ;;  %3829 = vmatmul.mubr.f32.vlgmr.msra.gmra.mrb[48].mxu0 %v1815_v20  ;;  %3888 = vmatprep.subr.bf16.mxu1 %v5167_v29 }
 0x2d9   : > { %v1606_v56 = vpop.f32.mrb[37].mxu0  ;;  %3831 = vmatprep.mubr.f32.mxu0 %v1816_v23  ;;  %3871 = vmatpush3.bf16.msra.mxu0 %v2073_v53  ;;  %v5096_v14 = vadd.f32 %v3730_v59, %v5065_v34 }
 0x2da   : > { %v5090_v61 = vadd.f32 %v1606_v56, %v5065_v34  ;;  %v3731_v18 = vpop.f32.mrb[38].mxu0  ;;  %3776 = vmatmul.mubr.f32.gmra.mrb[34].mxu1 %v5081_v51 }
 0x2db   : > { %v1609_v28 = vpop.f32.mrb[39].mxu0  ;;  %v5105_v50 = vadd.f32 %v3731_v18, %v5065_v34  ;;  %v1820_v42 = vmul.f32 %v5096_v14, %v5096_v14 }
 0x2dc   : > { %v5099_v17 = vadd.f32 %v1609_v28, %v5065_v34  ;;  %3778 = vmatprep.mubr.f32.mxu1 %v5090_v61  ;;  %3832 = vmatmul.mubr.f32.gmra.mrb[50].mxu0 %v1817_v6  ;;  %v1818_v63 = vmul.f32 %v5090_v61, %v5090_v61 }
 0x2dd   : > { %v1821_v38 = vmul.f32 %v5105_v50, %v5105_v50 }
 0x2de   : > { %3779 = vmatmul.mubr.f32.gmra.mrb[36].mxu1 %v5099_v17  ;;  %3834 = vmatprep.mubr.f32.mxu0 %v1818_v63  ;;  %v1819_v60 = vmul.f32 %v5099_v17, %v5099_v17 }
 0x2df   : > { %3781 = vmatprep.mubr.f32.mxu1 %v5096_v14 }
 0x2e0   : > { %v3734_v1 = vpop.f32.mrb[40].mxu0  ;;  %3835 = vmatmul.mubr.f32.gmra.mrb[52].mxu0 %v1819_v60 }
 0x2e1   : > { %v1622_v62 = vpop.f32.mrb[41].mxu0  ;;  %3837 = vmatprep.mubr.f32.mxu0 %v1820_v42  ;;  %v5120_v47 = vadd.f32 %v3734_v1, %v5065_v34 }
 0x2e2   : > { %v5114_v12 = vadd.f32 %v1622_v62, %v5065_v34  ;;  %v3735_v40 = vpop.f32.mrb[42].mxu0  ;;  %3782 = vmatmul.mubr.f32.gmra.mrb[38].mxu1 %v5105_v50 }
 0x2e3   : > { %v1625_v35 = vpop.f32.mrb[43].mxu0  ;;  %v5129_v26 = vadd.f32 %v3735_v40, %v5065_v34  ;;  %v1824_v8 = vmul.f32 %v5120_v47, %v5120_v47 }
 0x2e4   : > { %v5123_v9 = vadd.f32 %v1625_v35, %v5065_v34  ;;  %3784 = vmatprep.mubr.f32.mxu1 %v5114_v12  ;;  %3838 = vmatmul.mubr.f32.gmra.mrb[54].mxu0 %v1821_v38  ;;  %v1822_v0 = vmul.f32 %v5114_v12, %v5114_v12 }
 0x2e5   : > { %v1825_v22 = vmul.f32 %v5129_v26, %v5129_v26 }
 0x2e6   : > { %3785 = vmatmul.mubr.f32.gmra.mrb[40].mxu1 %v5123_v9  ;;  %3840 = vmatprep.mubr.f32.mxu0 %v1822_v0  ;;  %v1823_v7 = vmul.f32 %v5123_v9, %v5123_v9 }
 0x2e7   : > { %3787 = vmatprep.mubr.f32.mxu1 %v5120_v47 }
 0x2e8   : > { %3841 = vmatmul.mubr.f32.gmra.mrb[56].mxu0 %v1823_v7 }
 0x2e9   : > { %3843 = vmatprep.mubr.f32.mxu0 %v1824_v8 }
 0x2ea   : > { %3788 = vmatmul.mubr.f32.gmra.mrb[42].mxu1 %v5129_v26 }
 0x2eb   : > { %v3738_v3 = vpop.f32.mrb[44].mxu0 }
 0x2ec   : > { %v1638_v52 = vpop.f32.mrb[45].mxu0  ;;  %3844 = vmatmul.mubr.f32.gmra.mrb[58].mxu0 %v1825_v22  ;;  %v5144_v41 = vadd.f32 %v3738_v3, %v5065_v34 }
 0x2ed   : > { %v5141_v10 = vadd.f32 %v1638_v52, %v5065_v34  ;;  %v3739_v31 = vpop.f32.mrb[46].mxu0 }
 0x2ee   : > { %v1641_v16 = vpop.f32.mrb[47].mxu0  ;;  %v5153_v2 = vadd.f32 %v3739_v31, %v5065_v34  ;;  %v1828_v11 = vmul.f32 %v5144_v41, %v5144_v41 }
 0x2ef   : > { %v5147_v13 = vadd.f32 %v1641_v16, %v5065_v34  ;;  %3790 = vmatprep.mubr.f32.mxu1 %v5141_v10  ;;  %v1826_v5 = vmul.f32 %v5141_v10, %v5141_v10 }
 0x2f0   : > { %v1829_v32 = vmul.f32 %v5153_v2, %v5153_v2 }
 0x2f1   : > { %3791 = vmatmul.mubr.f32.gmra.mrb[44].mxu1 %v5147_v13  ;;  %3846 = vmatprep.mubr.f32.mxu0 %v1826_v5  ;;  %v1827_v4 = vmul.f32 %v5147_v13, %v5147_v13 }
 0x2f2   : > { %3793 = vmatprep.mubr.f32.mxu1 %v5144_v41 }
 0x2f3   : > { %3847 = vmatmul.mubr.f32.gmra.mrb[60].mxu0 %v1827_v4 }
 0x2f4   : > { %3849 = vmatprep.mubr.f32.mxu0 %v1828_v11 }
 0x2f5   : > { %3794 = vmatmul.mubr.f32.gmra.mrb[46].mxu1 %v5153_v2 }
 0x2f7   : > { %3850 = vmatmul.mubr.f32.gmra.mrb[62].mxu0 %v1829_v32 }
 0x3a9   : > { %v3774_v15 = vpop.f32.mrb[32].mxu1 }
 0x3aa   : > { %v1976_v45 = vmul.f32 %v3774_v15, %v3774_v15  ;;  %v1735_v25 = vpop.f32.mrb[33].mxu1  ;;  %v2173_v22 = vsub.f32 0.0, %v3774_v15 }
 0x3ab   : > { %v1975_v24 = vmul.f32 %v1735_v25, %v1735_v25  ;;  %v3830_v37 = vpop.f32.mrb[48].mxu0  ;;  %v2172_v16 = vsub.f32 0.0, %v1735_v25 }
 0x3ac   : > { %v1992_v30 = vsub.f32 %v3830_v37, %v1976_v45  ;;  %v1896_v36 = vpop.f32.mrb[49].mxu0 }
 0x3ad   : > { %v1991_v33 = vsub.f32 %v1896_v36, %v1975_v24  ;;  %v5170_v43 = vpop.f32.mrb[34].mxu1 }
 0x3ae   : > { %v2008_v21 = vadd.f32 1e-05, %v1992_v30  ;;  %v1978_v46 = vmul.f32 %v5170_v43, %v5170_v43  ;;  %v5174_v27 = vpop.f32.mrb[35].mxu1  ;;  %v2175_v25 = vsub.f32 0.0, %v5170_v43 }
 0x3af   : > { %v2007_v34 = vadd.f32 1e-05, %v1991_v33  ;;  %v1977_v48 = vmul.f32 %v5174_v27, %v5174_v27  ;;  %v3833_v39 = vpop.f32.mrb[50].mxu0 }
 0x3b0   : > { %4218 = vrsqrt.f32 %v2008_v21  ;;  %v1994_v44 = vsub.f32 %v3833_v39, %v1978_v46  ;;  %v1906_v54 = vpop.f32.mrb[51].mxu0  ;;  %v2174_v39 = vsub.f32 0.0, %v5174_v27 }
 0x3b1   : > { %4220 = vrsqrt.f32 %v2007_v34  ;;  %v1993_v57 = vsub.f32 %v1906_v54, %v1977_v48  ;;  %v5178_v53 = vpop.f32.mrb[36].mxu1 }
 0x3b2   : > { %v2010_v20 = vadd.f32 1e-05, %v1994_v44  ;;  %v1980_v23 = vmul.f32 %v5178_v53, %v5178_v53  ;;  %v5182_v59 = vpop.f32.mrb[37].mxu1 }
 0x3b3   : > { %v2009_v56 = vadd.f32 1e-05, %v1993_v57  ;;  %v1979_v18 = vmul.f32 %v5182_v59, %v5182_v59  ;;  %v3836_v6 = vpop.f32.mrb[52].mxu0 }
 0x3b4   : > { %4222 = vrsqrt.f32 %v2010_v20  ;;  %v1996_v28 = vsub.f32 %v3836_v6, %v1980_v23  ;;  %v1916_v63 = vpop.f32.mrb[53].mxu0 }
 0x3b5   : > { %4224 = vrsqrt.f32 %v2009_v56  ;;  %v1995_v60 = vsub.f32 %v1916_v63, %v1979_v18  ;;  %v5186_v42 = vpop.f32.mrb[38].mxu1 }
 0x3b6   : > { %v2012_v1 = vadd.f32 1e-05, %v1996_v28  ;;  %v1982_v62 = vmul.f32 %v5186_v42, %v5186_v42  ;;  %v5190_v40 = vpop.f32.mrb[39].mxu1 }
 0x3b7   : > { %v2011_v38 = vadd.f32 1e-05, %v1995_v60  ;;  %v1981_v35 = vmul.f32 %v5190_v40, %v5190_v40  ;;  %v3839_v0 = vpop.f32.mrb[54].mxu0 }
 0x3b8   : > { %4226 = vrsqrt.f32 %v2012_v1  ;;  %v1998_v7 = vsub.f32 %v3839_v0, %v1982_v62  ;;  %v1926_v8 = vpop.f32.mrb[55].mxu0  ;;  %v2177_v1 = vsub.f32 0.0, %v5178_v53  ;;  %v2176_v0 = vsub.f32 0.0, %v5182_v59 }
 0x3b9   : > { %4228 = vrsqrt.f32 %v2011_v38  ;;  %v1997_v3 = vsub.f32 %v1926_v8, %v1981_v35  ;;  %v5194_v52 = vpop.f32.mrb[40].mxu1 }
 0x3ba   : > { %v4219_v31 = vpop.eup %4218  ;;  %v2014_v5 = vadd.f32 1e-05, %v1998_v7  ;;  %v1984_v4 = vmul.f32 %v5194_v52, %v5194_v52  ;;  %v5198_v11 = vpop.f32.mrb[41].mxu1 }
 0x3bb   : > { %v4221_v32 = vpop.eup %4220  ;;  %v2013_v45 = vadd.f32 1e-05, %v1997_v3  ;;  %v1983_v24 = vmul.f32 %v5198_v11, %v5198_v11  ;;  %v3842_v37 = vpop.f32.mrb[56].mxu0  ;;  %v2189_v30 = vmul.f32 %v4219_v31, %v2173_v22 }
 0x3bc   : > { %4230 = vrsqrt.f32 %v2014_v5  ;;  %v2000_v15 = vsub.f32 %v3842_v37, %v1984_v4  ;;  %v1936_v36 = vpop.f32.mrb[57].mxu0  ;;  %v2039_v33 = vpack.c.bf16 %v4219_v31, %v4221_v32  ;;  %v2188_v21 = vmul.f32 %v4221_v32, %v2172_v16 }
 0x3bd   : > { %4232 = vrsqrt.f32 %v2013_v45  ;;  %v1999_v46 = vsub.f32 %v1936_v36, %v1983_v24  ;;  %v5203_v34 = vpop.f32.mrb[42].mxu1  ;;  %v2179_v5 = vsub.f32 0.0, %v5186_v42  ;;  %v2178_v45 = vsub.f32 0.0, %v5190_v40 }
 0x3be   : > { %v4223_v48 = vpop.eup %4222  ;;  %v2016_v44 = vadd.f32 1e-05, %v2000_v15  ;;  %v1986_v54 = vmul.f32 %v5203_v34, %v5203_v34  ;;  %v5208_v57 = vpop.f32.mrb[43].mxu1  ;;  %3854 = vmatprep.mubr.msk.bf16.mxu1 %vm908_vm2, %v2039_v33  ;;  %v2204_v20 = vpack.c.bf16 %v2189_v30, %v2188_v21 }
 0x3bf   : > { %v4225_v23 = vpop.eup %4224  ;;  %v2191_v56 = vmul.f32 %v4223_v48, %v2175_v25  ;;  %v2015_v18 = vadd.f32 1e-05, %v1999_v46  ;;  %v1985_v43 = vmul.f32 %v5208_v57, %v5208_v57  ;;  %v3845_v6 = vpop.f32.mrb[58].mxu0 }
 0x3c0   : > { %v2040_v28 = vpack.c.bf16 %v4223_v48, %v4225_v23  ;;  %v2190_v63 = vmul.f32 %v4225_v23, %v2174_v39  ;;  %4234 = vrsqrt.f32 %v2016_v44  ;;  %v2002_v27 = vsub.f32 %v3845_v6, %v1986_v54  ;;  %v1946_v60 = vpop.f32.mrb[59].mxu0  ;;  %3872 = vmatprep.mubr.msk.bf16.mxu0 %vm908_vm2, %v2204_v20 }
 0x3c1   : > { %4236 = vrsqrt.f32 %v2015_v18  ;;  %v2001_v62 = vsub.f32 %v1946_v60, %v1985_v43  ;;  %v2181_v48 = vsub.f32 0.0, %v5194_v52  ;;  %v2180_v20 = vsub.f32 0.0, %v5198_v11 }
 0x3c2   : > { %v4227_v38 = vpop.eup %4226  ;;  %v2205_v35 = vpack.c.bf16 %v2191_v56, %v2190_v63  ;;  %v2018_v7 = vadd.f32 1e-05, %v2002_v27  ;;  %3855 = vmatmul.mubr.msk.bf16.vlgmr.msra.gmra.mrb[48].mxu1 %vm908_vm2, %v2040_v28 }
 0x3c3   : > { %v4229_v8 = vpop.eup %4228  ;;  %v2017_v22 = vadd.f32 1e-05, %v2001_v62  ;;  %v2193_v3 = vmul.f32 %v4227_v38, %v2177_v1  ;;  %3889 = vmatpush3.bf16.msra.mxu1 %v5167_v29  ;;  %v2183_v62 = vsub.f32 0.0, %v5203_v34 }
 0x3c4   : > { %4238 = vrsqrt.f32 %v2018_v7  ;;  %v5218_v31 = vpop.f32.mrb[44].mxu1  ;;  %3873 = vmatmul.mubr.msk.bf16.vlgmr.msra.gmra.mrb[64].mxu0 %vm908_vm2, %v2205_v35  ;;  %v2041_v53 = vpack.c.bf16 %v4227_v38, %v4229_v8  ;;  %v2192_v16 = vmul.f32 %v4229_v8, %v2176_v0  ;;  %v2182_v35 = vsub.f32 0.0, %v5208_v57 }
 0x3c5   : > { %4240 = vrsqrt.f32 %v2017_v22  ;;  %v1988_v59 = vmul.f32 %v5218_v31, %v5218_v31  ;;  %v1795_v4 = vpop.f32.mrb[45].mxu1  ;;  %v2185_v34 = vsub.f32 0.0, %v5218_v31 }
 0x3c6   : > { %v4231_v32 = vpop.eup %4230  ;;  %v1987_v24 = vmul.f32 %v1795_v4, %v1795_v4  ;;  %v3848_v37 = vpop.f32.mrb[60].mxu0  ;;  %3858 = vmatprep.mubr.msk.bf16.mxu1 %vm908_vm2, %v2041_v53  ;;  %v2206_v29 = vpack.c.bf16 %v2193_v3, %v2192_v16 }
 0x3c7   : > { %v4233_v30 = vpop.eup %4232  ;;  %v2004_v15 = vsub.f32 %v3848_v37, %v1988_v59  ;;  %v1956_v36 = vpop.f32.mrb[61].mxu0  ;;  %v2195_v33 = vmul.f32 %v4231_v32, %v2179_v5  ;;  %v2184_v5 = vsub.f32 0.0, %v1795_v4  ;;  %v4105_v4 = vld [vmem:[%s5708_s8 + $0x8] sm:$0xff]  }
 0x3c8   : > { %v2003_v21 = vsub.f32 %v1956_v36, %v1987_v24  ;;  %v3795_v25 = vpop.f32.mrb[46].mxu1  ;;  %3876 = vmatprep.mubr.msk.bf16.mxu0 %vm908_vm2, %v2206_v29  ;;  %v2042_v42 = vpack.c.bf16 %v4231_v32, %v4233_v30  ;;  %v2194_v46 = vmul.f32 %v4233_v30, %v2178_v45  ;;  %3890 = vmatprep.subr.bf16.mxu1 %v4105_v4 }
 0x3c9   : > { %v2020_v39 = vadd.f32 1e-05, %v2004_v15  ;;  %v1990_v44 = vmul.f32 %v3795_v25, %v3795_v25  ;;  %v1805_v40 = vpop.f32.mrb[47].mxu1  ;;  %v2187_v37 = vsub.f32 0.0, %v3795_v25  ;;  %3891 = vmatpush3.bf16.msra.mxu1 %v4105_v4  ;;  %v4106_v25 = vld [vmem:[%s5708_s8 + $0x10] sm:$0xff]  }
 0x3ca   : > { %v4235_v54 = vpop.eup %4234  ;;  %v2019_v23 = vadd.f32 1e-05, %v2003_v21  ;;  %v1989_v56 = vmul.f32 %v1805_v40, %v1805_v40  ;;  %v3851_v18 = vpop.f32.mrb[62].mxu0  ;;  %3859 = vmatmul.mubr.msk.bf16.gmra.mrb[52].mxu1 %vm908_vm2, %v2042_v42  ;;  %v2207_v43 = vpack.c.bf16 %v2195_v33, %v2194_v46  ;;  %v2186_v30 = vsub.f32 0.0, %v1805_v40  ;;  %3892 = vmatprep.subr.bf16.mxu1 %v4106_v25  ;;  %v4107_v46 = vld [vmem:[%s5708_s8 + $0x18] sm:$0xff]  }
 0x3cb   : > { %v4237_v6 = vpop.eup %4236  ;;  %4242 = vrsqrt.f32 %v2020_v39  ;;  %v2006_v28 = vsub.f32 %v3851_v18, %v1990_v44  ;;  %v1966_v63 = vpop.f32.mrb[63].mxu0  ;;  %v2197_v27 = vmul.f32 %v4235_v54, %v2181_v48  ;;  %v4108_v48 = vld [vmem:[%s5708_s8 + $0x20] sm:$0xff]   ;;  %v4109_v39 = vld [vmem:[%s5708_s8 + $0x28] sm:$0xff]   ;;  %v4110_v44 = vld [vmem:[%s5708_s8 + $0x30] sm:$0xff]  }
 0x3cc   : > { %4244 = vrsqrt.f32 %v2019_v23  ;;  %v2005_v60 = vsub.f32 %v1966_v63, %v1989_v56  ;;  %3877 = vmatmul.mubr.msk.bf16.gmra.mrb[68].mxu0 %vm908_vm2, %v2207_v43  ;;  %v2043_v52 = vpack.c.bf16 %v4235_v54, %v4237_v6  ;;  %v2196_v1 = vmul.f32 %v4237_v6, %v2180_v20  ;;  %v4111_v40 = vld [vmem:[%s5708_s8 + $0x38] sm:$0xff]   ;;  %v4112_v54 = vld [vmem:[%s5710_s10] sm:$0xff]   ;;  %v4113_v20 = vld [vmem:[%s5710_s10 + $0x8] sm:$0xff]  }
 0x3cd   : > { %v2022_v11 = vadd.f32 1e-05, %v2006_v28  ;;  %3893 = vmatpush3.bf16.msra.mxu1 %v4106_v25  ;;  %3920 = vmatprep.subr.bf16.mxu0 %v4112_v54  ;;  %v4114_v23 = vld [vmem:[%s5710_s10 + $0x10] sm:$0xff]   ;;  %v4115_v56 = vld [vmem:[%s5710_s10 + $0x18] sm:$0xff]   ;;  %v4116_v18 = vld [vmem:[%s5710_s10 + $0x20] sm:$0xff]   ;;  %v2367_v6 = vsub.s32 2, %v4920_v49 }
 0x3ce   : > { %v4239_v38 = vpop.eup %4238  ;;  %v2021_v0 = vadd.f32 1e-05, %v2005_v60  ;;  %3862 = vmatprep.mubr.msk.bf16.mxu1 %vm908_vm2, %v2043_v52  ;;  %v2208_v7 = vpack.c.bf16 %v2197_v27, %v2196_v1  ;;  %3894 = vmatprep.subr.bf16.mxu1 %v4107_v46  ;;  %v4117_v43 = vld [vmem:[%s5710_s10 + $0x28] sm:$0xff]   ;;  %v5286_v60 = vld [vmem:[%s5702_s2] sm:$0xff] }
 0x3cf   : > { %v4241_v8 = vpop.eup %4240  ;;  %4246 = vrsqrt.f32 %v2022_v11  ;;  %v2199_v22 = vmul.f32 %v4239_v38, %v2183_v62  ;;  %3921 = vmatpush3.bf16.msra.mxu0 %v4112_v54  ;;  %v5289_v52 = vrot.slane %v5286_v60, %v2367_v6 }
 0x3d0   : > { %4248 = vrsqrt.f32 %v2021_v0  ;;  %3880 = vmatprep.mubr.msk.bf16.mxu0 %vm908_vm2, %v2208_v7  ;;  %v2044_v3 = vpack.c.bf16 %v4239_v38, %v4241_v8  ;;  %v2198_v53 = vmul.f32 %v4241_v8, %v2182_v35  ;;  %3922 = vmatprep.subr.bf16.mxu0 %v4113_v20 }
 0x3d1   : > { %3895 = vmatpush3.bf16.msra.mxu1 %v4107_v46 }
 0x3d2   : > { %3863 = vmatmul.mubr.msk.bf16.gmra.mrb[56].mxu1 %vm908_vm2, %v2044_v3  ;;  %v2209_v16 = vpack.c.bf16 %v2199_v22, %v2198_v53  ;;  %3896 = vmatprep.subr.bf16.mxu1 %v4108_v48 }
 0x3d3   : > { %3923 = vmatpush3.bf16.msra.mxu0 %v4113_v20 }
 0x3d4   : > { %3881 = vmatmul.mubr.msk.bf16.gmra.mrb[72].mxu0 %vm908_vm2, %v2209_v16  ;;  %3924 = vmatprep.subr.bf16.mxu0 %v4114_v23 }
 0x3d5   : > { %v4243_v57 = vpop.eup %4242  ;;  %3897 = vmatpush3.bf16.msra.mxu1 %v4108_v48 }
 0x3d6   : > { %v4245_v59 = vpop.eup %4244  ;;  %v2201_v32 = vmul.f32 %v4243_v57, %v2185_v34  ;;  %3898 = vmatprep.subr.bf16.mxu1 %v4109_v39 }
 0x3d7   : > { %v2045_v45 = vpack.c.bf16 %v4243_v57, %v4245_v59  ;;  %v2200_v24 = vmul.f32 %v4245_v59, %v2184_v5  ;;  %3925 = vmatpush3.bf16.msra.mxu0 %v4114_v23 }
 0x3d8   : > { %3926 = vmatprep.subr.bf16.mxu0 %v4115_v56 }
 0x3d9   : > { %v4247_v29 = vpop.eup %4246  ;;  %3866 = vmatprep.mubr.msk.bf16.mxu1 %vm908_vm2, %v2045_v45  ;;  %v2210_v15 = vpack.c.bf16 %v2201_v32, %v2200_v24  ;;  %3899 = vmatpush3.bf16.msra.mxu1 %v4109_v39 }
 0x3da   : > { %v4249_v36 = vpop.eup %4248  ;;  %v2203_v33 = vmul.f32 %v4247_v29, %v2187_v37  ;;  %3900 = vmatprep.subr.bf16.mxu1 %v4110_v44 }
 0x3db   : > { %3884 = vmatprep.mubr.msk.bf16.mxu0 %vm908_vm2, %v2210_v15  ;;  %v2046_v21 = vpack.c.bf16 %v4247_v29, %v4249_v36  ;;  %v2202_v31 = vmul.f32 %v4249_v36, %v2186_v30  ;;  %3927 = vmatpush3.bf16.msra.mxu0 %v4115_v56 }
 0x3dc   : > { %3928 = vmatprep.subr.bf16.mxu0 %v4116_v18 }
 0x3dd   : > { %3867 = vmatmul.mubr.msk.bf16.gmra.mrb[60].mxu1 %vm908_vm2, %v2046_v21  ;;  %v2211_v42 = vpack.c.bf16 %v2203_v33, %v2202_v31 }
 0x3de   : > { %3901 = vmatpush3.bf16.msra.mxu1 %v4110_v44 }
 0x3df   : > { %3885 = vmatmul.mubr.msk.bf16.gmra.mrb[76].mxu0 %vm908_vm2, %v2211_v42  ;;  %3902 = vmatprep.subr.bf16.mxu1 %v4111_v40 }
 0x3e0   : > { %3929 = vmatpush3.bf16.msra.mxu0 %v4116_v18 }
 0x3e1   : > { %3930 = vmatprep.subr.bf16.mxu0 %v4117_v43 }
 0x3e2   : > { %3903 = vmatpush3.bf16.msra.mxu1 %v4111_v40 }
 0x3e4   : > { %3931 = vmatpush3.bf16.msra.mxu0 %v4117_v43 }
 0x495   : > { %v3856_v28 = vpop.f32.mrb[48].mxu1 }
 0x496   : > { %v2335_v63 = vmul.f32 %v3856_v28, %v5071_v58  ;;  %v2109_v27 = vpop.f32.mrb[49].mxu1 }
 0x497   : > { %v2333_v1 = vmul.f32 %v2109_v27, %v5068_v55  ;;  %v3857_v62 = vpop.f32.mrb[50].mxu1  ;;  %v3874_v11 = vpop.f32.mrb[64].mxu0 }
 0x498   : > { %v2336_v38 = vmul.f32 %v3857_v62, %v5081_v51  ;;  %v2351_v35 = vadd.f32 %v3874_v11, %v2335_v63  ;;  %v2112_v0 = vpop.f32.mrb[51].mxu1  ;;  %v2270_v7 = vpop.f32.mrb[65].mxu0 }
 0x499   : > { %v2334_v58 = vmul.f32 %v2112_v0, %v5074_v19  ;;  %v2349_v8 = vadd.f32 %v2333_v1, %v2270_v7  ;;  %v3875_v22 = vpop.f32.mrb[66].mxu0 }
 0x49a   : > { %v5295_v3 = vadd.f32 %v5289_v52, %v2351_v35  ;;  %v2352_v53 = vadd.f32 %v3875_v22, %v2336_v38  ;;  %v2273_v16 = vpop.f32.mrb[67].mxu0 }
 0x49b   : > { %v5298_v34 = vadd.f32 %v5289_v52, %v2349_v8  ;;  %v2350_v55 = vadd.f32 %v2334_v58, %v2273_v16 }
 0x49c   : > { %v2387_v57 = vmul.f32 0.5, %v5295_v3  ;;  %v5302_v51 = vadd.f32 %v5289_v52, %v2352_v53 }
 0x49d   : > { %v2385_v5 = vmul.f32 0.5, %v5298_v34  ;;  %v5306_v19 = vadd.f32 %v5289_v52, %v2350_v55  ;;  %v3860_v59 = vpop.f32.mrb[52].mxu1 }
 0x49e   : > { %4250 = vtanh.f32 %v2387_v57  ;;  %v2388_v32 = vmul.f32 0.5, %v5302_v51  ;;  %v2339_v45 = vmul.f32 %v3860_v59, %v5096_v14  ;;  %v2125_v24 = vpop.f32.mrb[53].mxu1 }
 0x49f   : > { %4252 = vtanh.f32 %v2385_v5  ;;  %v2386_v37 = vmul.f32 0.5, %v5306_v19  ;;  %v2337_v29 = vmul.f32 %v2125_v24, %v5090_v61  ;;  %v3861_v30 = vpop.f32.mrb[54].mxu1  ;;  %v3878_v15 = vpop.f32.mrb[68].mxu0 }
 0x4a0   : > { %4254 = vtanh.f32 %v2388_v32  ;;  %v2340_v36 = vmul.f32 %v3861_v30, %v5105_v50  ;;  %v2355_v33 = vadd.f32 %v3878_v15, %v2339_v45  ;;  %v2128_v21 = vpop.f32.mrb[55].mxu1  ;;  %v2286_v31 = vpop.f32.mrb[69].mxu0 }
 0x4a1   : > { %4256 = vtanh.f32 %v2386_v37  ;;  %v2338_v42 = vmul.f32 %v2128_v21, %v5099_v17  ;;  %v2353_v4 = vadd.f32 %v2337_v29, %v2286_v31  ;;  %v3879_v25 = vpop.f32.mrb[70].mxu0 }
 0x4a2   : > { %v5315_v14 = vadd.f32 %v5289_v52, %v2355_v33  ;;  %v2356_v46 = vadd.f32 %v3879_v25, %v2340_v36  ;;  %v2289_v48 = vpop.f32.mrb[71].mxu0 }
 0x4a3   : > { %v5318_v61 = vadd.f32 %v5289_v52, %v2353_v4  ;;  %v2354_v39 = vadd.f32 %v2338_v42, %v2289_v48 }
 0x4a4   : > { %v2391_v44 = vmul.f32 0.5, %v5315_v14  ;;  %v5322_v50 = vadd.f32 %v5289_v52, %v2356_v46 }
 0x4a5   : > { %v2389_v40 = vmul.f32 0.5, %v5318_v61  ;;  %v5326_v17 = vadd.f32 %v5289_v52, %v2354_v39  ;;  %v3864_v54 = vpop.f32.mrb[56].mxu1 }
 0x4a6   : > { %4258 = vtanh.f32 %v2391_v44  ;;  %v2392_v20 = vmul.f32 0.5, %v5322_v50  ;;  %v2343_v23 = vmul.f32 %v3864_v54, %v5120_v47  ;;  %v2141_v56 = vpop.f32.mrb[57].mxu1 }
 0x4a7   : > { %4260 = vtanh.f32 %v2389_v40  ;;  %v2390_v18 = vmul.f32 0.5, %v5326_v17  ;;  %v2341_v43 = vmul.f32 %v2141_v56, %v5114_v12  ;;  %v3865_v6 = vpop.f32.mrb[58].mxu1  ;;  %v3882_v28 = vpop.f32.mrb[72].mxu0 }
 0x4a8   : > { %v4251_v63 = vpop.eup %4250  ;;  %4262 = vtanh.f32 %v2392_v20  ;;  %v2344_v27 = vmul.f32 %v3865_v6, %v5129_v26  ;;  %v2359_v1 = vadd.f32 %v3882_v28, %v2343_v23  ;;  %v2144_v62 = vpop.f32.mrb[59].mxu1 }
 0x4a9   : > { %v2302_v11 = vpop.f32.mrb[73].mxu0  ;;  %v4253_v38 = vpop.eup %4252  ;;  %v2419_v35 = vmul.f32 0.5, %v4251_v63  ;;  %4264 = vtanh.f32 %v2390_v18  ;;  %v2342_v47 = vmul.f32 %v2144_v62, %v5123_v9 }
 0x4aa   : > { %v2357_v0 = vadd.f32 %v2341_v43, %v2302_v11  ;;  %v3883_v7 = vpop.f32.mrb[74].mxu0  ;;  %v4255_v58 = vpop.eup %4254  ;;  %v2417_v8 = vmul.f32 0.5, %v4253_v38  ;;  %v5335_v12 = vadd.f32 %v5289_v52, %v2359_v1 }
 0x4ab   : > { %v2360_v22 = vadd.f32 %v3883_v7, %v2344_v27  ;;  %v2305_v53 = vpop.f32.mrb[75].mxu0  ;;  %v4257_v16 = vpop.eup %4256  ;;  %v2435_v55 = vadd.f32 0.5, %v2419_v35  ;;  %v2420_v26 = vmul.f32 0.5, %v4255_v58 }
 0x4ac   : > { %v5338_v57 = vadd.f32 %v5289_v52, %v2357_v0  ;;  %v2358_v5 = vadd.f32 %v2342_v47, %v2305_v53  ;;  %v2433_v59 = vadd.f32 0.5, %v2417_v8  ;;  %v2418_v32 = vmul.f32 0.5, %v4257_v16 }
 0x4ad   : > { %v2395_v9 = vmul.f32 0.5, %v5335_v12  ;;  %v5342_v45 = vadd.f32 %v5289_v52, %v2360_v22  ;;  %v2436_v24 = vadd.f32 0.5, %v2420_v26  ;;  %v2451_v36 = vmul.f32 %v2435_v55, %v5295_v3 }
 0x4ae   : > { %v2393_v37 = vmul.f32 0.5, %v5338_v57  ;;  %v5346_v29 = vadd.f32 %v5289_v52, %v2358_v5  ;;  %v2434_v30 = vadd.f32 0.5, %v2418_v32  ;;  %v2449_v42 = vmul.f32 %v2433_v59, %v5298_v34 }
 0x4af   : > { %4266 = vtanh.f32 %v2395_v9  ;;  %v2396_v15 = vmul.f32 0.5, %v5342_v45  ;;  %v2452_v33 = vmul.f32 %v2436_v24, %v5302_v51 }
 0x4b0   : > { %4268 = vtanh.f32 %v2393_v37  ;;  %v2394_v21 = vmul.f32 0.5, %v5346_v29  ;;  %v4259_v31 = vpop.eup %4258  ;;  %v2450_v4 = vmul.f32 %v2434_v30, %v5306_v19  ;;  %v3868_v25 = vpop.f32.mrb[60].mxu1 }
 0x4b1   : > { %4270 = vtanh.f32 %v2396_v15  ;;  %v4261_v46 = vpop.eup %4260  ;;  %v2466_v48 = vpack.c.bf16 %v2452_v33, %v2451_v36  ;;  %v2423_v39 = vmul.f32 0.5, %v4259_v31  ;;  %v2347_v44 = vmul.f32 %v3868_v25, %v5144_v41  ;;  %v2157_v40 = vpop.f32.mrb[61].mxu1 }
 0x4b2   : > { %4272 = vtanh.f32 %v2394_v21  ;;  %v4263_v3 = vpop.eup %4262  ;;  %v2421_v54 = vmul.f32 0.5, %v4261_v46  ;;  %v2345_v51 = vmul.f32 %v2157_v40, %v5141_v10  ;;  %v3869_v20 = vpop.f32.mrb[62].mxu1  ;;  %v2465_v56 = vpack.c.bf16 %v2450_v4, %v2449_v42 }
 0x4b3   : > { %v3886_v23 = vpop.f32.mrb[76].mxu0  ;;  %v4265_v18 = vpop.eup %4264  ;;  %v2439_v34 = vadd.f32 0.5, %v2423_v39  ;;  %v2424_v43 = vmul.f32 0.5, %v4263_v3  ;;  %v2348_v19 = vmul.f32 %v3869_v20, %v5153_v2 }
 0x4b4   : > { %v2363_v6 = vadd.f32 %v3886_v23, %v2347_v44  ;;  %v2160_v28 = vpop.f32.mrb[63].mxu1  ;;  %v2318_v63 = vpop.f32.mrb[77].mxu0  ;;  %v2437_v27 = vadd.f32 0.5, %v2421_v54  ;;  %v2422_v1 = vmul.f32 0.5, %v4265_v18  ;;  %3904 = vmatprep.mubr.bf16.mxu1 %v2465_v56 }
 0x4b5   : > { %v2346_v41 = vmul.f32 %v2160_v28, %v5147_v13  ;;  %v2361_v62 = vadd.f32 %v2345_v51, %v2318_v63  ;;  %v3887_v11 = vpop.f32.mrb[78].mxu0  ;;  %v2440_v38 = vadd.f32 0.5, %v2424_v43  ;;  %3905 = vmatmul.mubr.bf16.vlgmr.msra.gmra.mrb[64].mxu1 %v2466_v48  ;;  %v2455_v58 = vmul.f32 %v2439_v34, %v5315_v14  ;;  %v4118_v28 = vld [vmem:[%s5710_s10 + $0x30] sm:$0xff]   ;;  %v4119_v63 = vld [vmem:[%s5710_s10 + $0x38] sm:$0xff]  }
 0x4b6   : > { %v2383_v10 = vadd.f32 %v5289_v52, %v2363_v6  ;;  %v2364_v35 = vadd.f32 %v3887_v11, %v2348_v19  ;;  %v2321_v47 = vpop.f32.mrb[79].mxu0  ;;  %v2438_v0 = vadd.f32 0.5, %v2422_v1  ;;  %v2453_v16 = vmul.f32 %v2437_v27, %v5318_v61  ;;  %3932 = vmatprep.subr.bf16.mxu0 %v4118_v28 }
 0x4b7   : > { %v2381_v7 = vadd.f32 %v5289_v52, %v2361_v62  ;;  %v2362_v2 = vadd.f32 %v2346_v41, %v2321_v47  ;;  %v2456_v8 = vmul.f32 %v2440_v38, %v5322_v50  ;;  %3933 = vmatpush3.bf16.msra.mxu0 %v4118_v28  ;;  %v2491_v27 = vsub.s32 3, %v4920_v49  ;;  %v4326_v28 = vld [vmem:[%s4531_s14 + $0x58] sm:$0xff] }
 0x4b8   : > { %v2399_v22 = vmul.f32 0.5, %v2383_v10  ;;  %v2384_v13 = vadd.f32 %v5289_v52, %v2364_v35  ;;  %v2454_v55 = vmul.f32 %v2438_v0, %v5326_v17  ;;  %3934 = vmatprep.subr.bf16.mxu0 %v4119_v63 }
 0x4b9   : > { %v4267_v53 = vpop.eup %4266  ;;  %v2397_v26 = vmul.f32 0.5, %v2381_v7  ;;  %v2382_v5 = vadd.f32 %v5289_v52, %v2362_v2  ;;  %v2468_v24 = vpack.c.bf16 %v2456_v8, %v2455_v58  ;;  %v2492_v1 = vrot.slane %v5286_v60, %v2491_v27  ;;  %v4327_v27 = vld [vmem:[%s4531_s14 + $0x60] sm:$0xff] }
 0x4ba   : > { %v4269_v59 = vpop.eup %4268  ;;  %v2427_v32 = vmul.f32 0.5, %v4267_v53  ;;  %4274 = vtanh.f32 %v2399_v22  ;;  %v2400_v9 = vmul.f32 0.5, %v2384_v13  ;;  %v2467_v30 = vpack.c.bf16 %v2454_v55, %v2453_v16 }
 0x4bb   : > { %v4271_v37 = vpop.eup %4270  ;;  %v2425_v14 = vmul.f32 0.5, %v4269_v59  ;;  %4276 = vtanh.f32 %v2397_v26  ;;  %v2398_v50 = vmul.f32 0.5, %v2382_v5  ;;  %3935 = vmatpush3.bf16.msra.mxu0 %v4119_v63 }
 0x4bc   : > { %v4273_v15 = vpop.eup %4272  ;;  %v2443_v36 = vadd.f32 0.5, %v2427_v32  ;;  %v2428_v33 = vmul.f32 0.5, %v4271_v37  ;;  %4278 = vtanh.f32 %v2400_v9  ;;  %3908 = vmatprep.mubr.bf16.mxu1 %v2467_v30 }
 0x4bd   : > { %v2441_v61 = vadd.f32 0.5, %v2425_v14  ;;  %v2426_v21 = vmul.f32 0.5, %v4273_v15  ;;  %4280 = vtanh.f32 %v2398_v50  ;;  %3909 = vmatmul.mubr.bf16.gmra.mrb[68].mxu1 %v2468_v24 }
 0x4be   : > { %v2444_v17 = vadd.f32 0.5, %v2428_v33  ;;  %v2459_v31 = vmul.f32 %v2443_v36, %v5335_v12 }
 0x4bf   : > { %v2442_v52 = vadd.f32 0.5, %v2426_v21  ;;  %v2457_v4 = vmul.f32 %v2441_v61, %v5338_v57 }
 0x4c0   : > { %v2460_v42 = vmul.f32 %v2444_v17, %v5342_v45 }
 0x4c1   : > { %v2458_v25 = vmul.f32 %v2442_v52, %v5346_v29 }
 0x4c2   : > { %v2470_v46 = vpack.c.bf16 %v2460_v42, %v2459_v31 }
 0x4c3   : > { %v2469_v48 = vpack.c.bf16 %v2458_v25, %v2457_v4 }
 0x4c4   : > { %v4275_v39 = vpop.eup %4274 }
 0x4c5   : > { %v4277_v44 = vpop.eup %4276  ;;  %v2431_v40 = vmul.f32 0.5, %v4275_v39  ;;  %3912 = vmatprep.mubr.bf16.mxu1 %v2469_v48  ;;  %v4120_v39 = vld [vmem:[%s5709_s9] sm:$0xff]  }
 0x4c6   : > { %v4279_v3 = vpop.eup %4278  ;;  %v2429_v54 = vmul.f32 0.5, %v4277_v44  ;;  %3913 = vmatmul.mubr.bf16.gmra.mrb[72].mxu1 %v2470_v46  ;;  %v4121_v44 = vld [vmem:[%s5709_s9 + $0x8] sm:$0xff]   ;;  %3952 = vmatprep.subr.bf16.mxu1 %v4120_v39 }
 0x4c7   : > { %v4281_v51 = vpop.eup %4280  ;;  %v2447_v20 = vadd.f32 0.5, %v2431_v40  ;;  %v2432_v23 = vmul.f32 0.5, %v4279_v3  ;;  %v4315_v40 = vld [vmem:[%s4531_s14] sm:$0xff]  ;;  %v4316_v3 = vld [vmem:[%s4531_s14 + $0x8] sm:$0xff]  ;;  %3953 = vmatpush3.bf16.msra.mxu1 %v4120_v39 }
 0x4c8   : > { %v2445_v56 = vadd.f32 0.5, %v2429_v54  ;;  %v2430_v12 = vmul.f32 0.5, %v4281_v51  ;;  %v3028_v54 = vpack.c.bf16 %v4316_v3, %v4315_v40  ;;  %3954 = vmatprep.subr.bf16.mxu1 %v4121_v44  ;;  %v4317_v51 = vld [vmem:[%s4531_s14 + $0x10] sm:$0xff] }
 0x4c9   : > { %v2448_v18 = vadd.f32 0.5, %v2432_v23  ;;  %v2463_v34 = vmul.f32 %v2447_v20, %v2383_v10  ;;  %v4318_v20 = vld [vmem:[%s4531_s14 + $0x18] sm:$0xff] }
 0x4ca   : > { %v2446_v45 = vadd.f32 0.5, %v2430_v12  ;;  %v2461_v43 = vmul.f32 %v2445_v56, %v2381_v7  ;;  %v3029_v23 = vpack.c.bf16 %v4318_v20, %v4317_v51  ;;  %v4319_v56 = vld [vmem:[%s4531_s14 + $0x20] sm:$0xff]  ;;  %v4320_v12 = vld [vmem:[%s4531_s14 + $0x28] sm:$0xff] }
 0x4cb   : > { %v2464_v57 = vmul.f32 %v2448_v18, %v2384_v13  ;;  %3955 = vmatpush3.bf16.msra.mxu1 %v4121_v44  ;;  %v3030_v18 = vpack.c.bf16 %v4320_v12, %v4319_v56 }
 0x4cc   : > { %v2462_v29 = vmul.f32 %v2446_v45, %v2382_v5  ;;  %v4321_v45 = vld [vmem:[%s4531_s14 + $0x30] sm:$0xff] }
 0x4cd   : > { %v2472_v19 = vpack.c.bf16 %v2464_v57, %v2463_v34  ;;  %v4322_v34 = vld [vmem:[%s4531_s14 + $0x38] sm:$0xff] }
 0x4ce   : > { %v2471_v6 = vpack.c.bf16 %v2462_v29, %v2461_v43  ;;  %v3031_v57 = vpack.c.bf16 %v4322_v34, %v4321_v45  ;;  %v4323_v43 = vld [vmem:[%s4531_s14 + $0x40] sm:$0xff]  ;;  %v4324_v29 = vld [vmem:[%s4531_s14 + $0x48] sm:$0xff] }
 0x4d0   : > { %3916 = vmatprep.mubr.bf16.mxu1 %v2471_v6  ;;  %v4325_v6 = vld [vmem:[%s4531_s14 + $0x50] sm:$0xff] }
 0x4d1   : > { %3917 = vmatmul.mubr.bf16.gmra.mrb[76].mxu1 %v2472_v19  ;;  %v3032_v19 = vpack.c.bf16 %v4324_v29, %v4323_v43  ;;  %v3033_v63 = vpack.c.bf16 %v4326_v28, %v4325_v6 }
 0x4d2   : > { %3956 = vmatprep.mubr.msk.bf16.mxu1 %vm432_vm0, %v3028_v54 }
 0x4d9   : > { %3957 = vmatmul.mubr.msk.bf16.vlgmr.msra.gmra.mrb[80].mxu1 %vm432_vm0, %v3029_v23 }
 0x4da   : > { %3960 = vmatprep.mubr.msk.bf16.mxu1 %vm432_vm0, %v3030_v18 }
 0x4e1   : > { %3961 = vmatmul.mubr.msk.bf16.gmra.mrb[84].mxu1 %vm432_vm0, %v3031_v57 }
 0x4e2   : > { %3964 = vmatprep.mubr.msk.bf16.mxu1 %vm432_vm0, %v3032_v19 }
 0x4e9   : > { %3965 = vmatmul.mubr.msk.bf16.gmra.mrb[88].mxu1 %vm432_vm0, %v3033_v63 }
 0x588   : > { %v3906_v41 = vpop.f32.mrb[64].mxu1 }
 0x589   : > { %v2575_v62 = vpop.f32.mrb[65].mxu1  ;;  %v2584_v38 = vadd.f32 %v3906_v41, %v2492_v1 }
 0x58a   : > { %v3907_v11 = vpop.f32.mrb[66].mxu1  ;;  %v2576_v47 = vadd.f32 %v2575_v62, %v2492_v1  ;;  %v4329_v62 = vld [vmem:[%s4531_s14 + $0x70] sm:$0xff] }
 0x58b   : > { %v2587_v10 = vadd.f32 %v3907_v11, %v2492_v1  ;;  %v2578_v35 = vpop.f32.mrb[67].mxu1  ;;  %v4330_v11 = vld [vmem:[%s4531_s14 + $0x78] sm:$0xff] }
 0x58c   : > { %v2579_v0 = vadd.f32 %v2578_v35, %v2492_v1 }
 0x58d   : > { %v2639_v7 = vpack.c.bf16 %v2587_v10, %v2584_v38  ;;  %v3035_v38 = vpack.c.bf16 %v4330_v11, %v4329_v62  ;;  %v2664_v10 = vsub.s32 5, %v4920_v49 }
 0x58e   : > { %v2638_v2 = vpack.c.bf16 %v2579_v0, %v2576_v47 }
 0x58f   : > { %v2665_v35 = vrot.slane %v5286_v60, %v2664_v10 }
 0x590   : > { %v3910_v58 = vpop.f32.mrb[68].mxu1  ;;  %3936 = vmatprep.mubr.bf16.mxu0 %v2638_v2 }
 0x591   : > { %v2591_v8 = vpop.f32.mrb[69].mxu1  ;;  %3937 = vmatmul.mubr.bf16.vlgmr.msra.gmra.mrb[80].mxu0 %v2639_v7  ;;  %v2600_v13 = vadd.f32 %v3910_v58, %v2492_v1 }
 0x592   : > { %v3911_v22 = vpop.f32.mrb[70].mxu1  ;;  %v2592_v55 = vadd.f32 %v2591_v8, %v2492_v1 }
 0x593   : > { %v2603_v53 = vadd.f32 %v3911_v22, %v2492_v1  ;;  %v2594_v16 = vpop.f32.mrb[71].mxu1 }
 0x594   : > { %v2595_v26 = vadd.f32 %v2594_v16, %v2492_v1 }
 0x595   : > { %v2641_v5 = vpack.c.bf16 %v2603_v53, %v2600_v13 }
 0x596   : > { %v2640_v59 = vpack.c.bf16 %v2595_v26, %v2592_v55 }
 0x598   : > { %3940 = vmatprep.mubr.bf16.mxu0 %v2640_v59 }
 0x599   : > { %v3914_v32 = vpop.f32.mrb[72].mxu1  ;;  %3941 = vmatmul.mubr.bf16.gmra.mrb[84].mxu0 %v2641_v5 }
 0x59a   : > { %v2607_v9 = vpop.f32.mrb[73].mxu1  ;;  %v2616_v37 = vadd.f32 %v3914_v32, %v2492_v1 }
 0x59b   : > { %v3915_v24 = vpop.f32.mrb[74].mxu1  ;;  %v2608_v30 = vadd.f32 %v2607_v9, %v2492_v1 }
 0x59c   : > { %v2619_v14 = vadd.f32 %v3915_v24, %v2492_v1  ;;  %v2610_v50 = vpop.f32.mrb[75].mxu1 }
 0x59d   : > { %v2611_v15 = vadd.f32 %v2610_v50, %v2492_v1 }
 0x59e   : > { %v2643_v36 = vpack.c.bf16 %v2619_v14, %v2616_v37 }
 0x59f   : > { %v2642_v33 = vpack.c.bf16 %v2611_v15, %v2608_v30 }
 0x5a1   : > { %3944 = vmatprep.mubr.bf16.mxu0 %v2642_v33 }
 0x5a2   : > { %3945 = vmatmul.mubr.bf16.gmra.mrb[88].mxu0 %v2643_v36 }
 0x5a4   : > { %v3918_v61 = vpop.f32.mrb[76].mxu1 }
 0x5a5   : > { %v2623_v21 = vpop.f32.mrb[77].mxu1  ;;  %v2632_v52 = vadd.f32 %v3918_v61, %v2492_v1 }
 0x5a6   : > { %v3919_v17 = vpop.f32.mrb[78].mxu1  ;;  %v2624_v4 = vadd.f32 %v2623_v21, %v2492_v1 }
 0x5a7   : > { %v2635_v31 = vadd.f32 %v3919_v17, %v2492_v1  ;;  %v2626_v42 = vpop.f32.mrb[79].mxu1 }
 0x5a8   : > { %v2627_v25 = vadd.f32 %v2626_v42, %v2492_v1  ;;  %v4328_v1 = vld [vmem:[%s4531_s14 + $0x68] sm:$0xff]  ;;  %s394_s14 = sand.u32 1, %s4385_s18  }
 0x5a9   : > { %v2645_v46 = vpack.c.bf16 %v2635_v31, %v2632_v52  ;;  %v3034_v41 = vpack.c.bf16 %v4328_v1, %v4327_v27  ;;  %s3301_s22 = sshll.u32 %s394_s14, 7  ;;  %s5659_s21 = scalar_lea.sflag [#allocation3], %s394_s14 }
 0x5aa   : > { %v2644_v48 = vpack.c.bf16 %v2627_v25, %v2624_v4  ;;  %s5559_s24 = scalar_lea.vmem [#allocation2], %s3301_s22  ;;  %s4337_s22 = scalar_lea.vmem %s4336_s15, 4096 }
 0x5ab   : > { %3968 = vmatprep.mubr.msk.bf16.mxu1 %vm432_vm0, %v3034_v41  ;;  %s3223_s25 = sshll.u32 %s5559_s24, 4  ;;  %s5654_s25 = int_to_ptr.vmem [resolvable:$true] %s3223_s25 }
 0x5ac   : > { %3948 = vmatprep.mubr.bf16.mxu0 %v2644_v48  ;;  %3969 = vmatmul.mubr.msk.bf16.gmra.mrb[92].mxu1 %vm432_vm0, %v3035_v38  ;;  %s4331_s13 = scalar_lea.vmem %s5654_s25, 2048  ;;  %p4338_p0 = scmp.lt.s32.totalorder %s5654_s25, %s4336_s15 }
 0x5ad   : > { %3949 = vmatmul.mubr.bf16.gmra.mrb[92].mxu0 %v2645_v46  ;;  %p4332_p11 = scmp.ne.s32.totalorder %s5654_s25, %s4331_s13  ;;  %p4339_p1 = scmp.lt.s32.totalorder %s4337_s22, %s4331_s13 }
 0x5af   : > { %p4333_p12 = pnand %p4332_p11, %p4497_p5  ;;  %p4340_p2 = por %p4339_p1, %p4338_p0 }
 0x5b1   : > { %p4334_p13 = pneg %p4333_p12 }
 0x5b3   : > { %p4341_p3 = pnand %p4340_p2, %p4334_p13 }
 0x664   : > { %v3938_v47 = vpop.f32.mrb[80].mxu0 }
 0x665   : > { %v2757_v0 = vadd.f32 %v3938_v47, %v2665_v35  ;;  %v2748_v7 = vpop.f32.mrb[81].mxu0 }
 0x666   : > { %v3939_v2 = vpop.f32.mrb[82].mxu0  ;;  %v2749_v22 = vadd.f32 %v2748_v7, %v2665_v35 }
 0x667   : > { %2815 = vadd.xlane.f32.xlu0 %v2757_v0  ;;  %v2751_v58 = vpop.f32.mrb[83].mxu0  ;;  %v2760_v53 = vadd.f32 %v3939_v2, %v2665_v35 }
 0x668   : > { %v2752_v8 = vadd.f32 %v2751_v58, %v2665_v35 }
 0x66a   : > { %2813 = vadd.xlane.f32.xlu1 %v2752_v8 }
 0x66b   : > { %2811 = vadd.xlane.f32.xlu0 %v2749_v22 }
 0x66c   : > { %v3942_v13 = vpop.f32.mrb[84].mxu0 }
 0x66d   : > { %v2773_v16 = vadd.f32 %v3942_v13, %v2665_v35  ;;  %v2764_v55 = vpop.f32.mrb[85].mxu0 }
 0x66e   : > { %v3943_v26 = vpop.f32.mrb[86].mxu0  ;;  %v2765_v59 = vadd.f32 %v2764_v55, %v2665_v35 }
 0x66f   : > { %v2767_v5 = vpop.f32.mrb[87].mxu0  ;;  %2823 = vadd.xlane.f32.xlu1 %v2773_v16  ;;  %2817 = vadd.xlane.f32.xlu0 %v2760_v53  ;;  %v2776_v32 = vadd.f32 %v3943_v26, %v2665_v35 }
 0x670   : > { %v5410_v24 = vadd.f32 %v2767_v5, %v2665_v35 }
 0x673   : > { %2819 = vadd.xlane.f32.xlu1 %v2765_v59  ;;  %2825 = vadd.xlane.f32.xlu0 %v2776_v32 }
 0x675   : > { %v3946_v9 = vpop.f32.mrb[88].mxu0 }
 0x676   : > { %v2789_v37 = vadd.f32 %v3946_v9, %v2665_v35  ;;  %v2780_v14 = vpop.f32.mrb[89].mxu0 }
 0x677   : > { %v3947_v50 = vpop.f32.mrb[90].mxu0  ;;  %2821 = vadd.xlane.f32.xlu0 %v5410_v24  ;;  %v5413_v15 = vadd.f32 %v2780_v14, %v2665_v35 }
 0x678   : > { %v2783_v30 = vpop.f32.mrb[91].mxu0  ;;  %2831 = vadd.xlane.f32.xlu1 %v2789_v37  ;;  %v5415_v36 = vadd.f32 %v3947_v50, %v2665_v35 }
 0x679   : > { %v5419_v33 = vadd.f32 %v2783_v30, %v2665_v35 }
 0x67b   : > { %2833 = vadd.xlane.f32.xlu0 %v5415_v36 }
 0x67c   : > { %2827 = vadd.xlane.f32.xlu1 %v5413_v15 }
 0x67f   : > { %2829 = vadd.xlane.f32.xlu0 %v5419_v33 }
 0x680   : > { %v3950_v61 = vpop.f32.mrb[92].mxu0 }
 0x681   : > { %v2796_v21 = vpop.f32.mrb[93].mxu0  ;;  %v5427_v4 = vadd.f32 %v3950_v61, %v2665_v35 }
 0x682   : > { %v5422_v17 = vadd.f32 %v2796_v21, %v2665_v35  ;;  %v3951_v52 = vpop.f32.mrb[94].mxu0 }
 0x683   : > { %v2799_v31 = vpop.f32.mrb[95].mxu0  ;;  %v5430_v25 = vadd.f32 %v3951_v52, %v2665_v35 }
 0x684   : > { %v5424_v42 = vadd.f32 %v2799_v31, %v2665_v35  ;;  %2835 = vadd.xlane.f32.xlu1 %v5422_v17 }
 0x686   : > { %2837 = vadd.xlane.f32.xlu0 %v5424_v42 }
 0x688   : > { %2839 = vadd.xlane.f32.xlu1 %v5427_v4 }
 0x68a   : > { %2841 = vadd.xlane.f32.xlu0 %v5430_v25 }
 0x6f4   : > { %v2816_v46 = vpop.xlane.xlu0 %2815 }
 0x6f5   : > { %v2846_v48 = vmul.f32 0.0078125, %v2816_v46 }
 0x6f7   : > { %v5434_v39 = vsub.f32 %v2757_v0, %v2846_v48  ;;  %v2814_v44 = vpop.xlane.xlu1 %2813 }
 0x6f8   : > { %v2812_v40 = vpop.xlane.xlu0 %2811  ;;  %v2845_v20 = vmul.f32 0.0078125, %v2814_v44 }
 0x6f9   : > { %v2844_v3 = vmul.f32 0.0078125, %v2812_v40  ;;  %v2878_v54 = vmul.f32 %v5434_v39, %v5434_v39 }
 0x6fa   : > { %v5446_v43 = vsub.f32 %v2752_v8, %v2845_v20 }
 0x6fb   : > { %v5438_v51 = vsub.f32 %v2749_v22, %v2844_v3  ;;  %2896 = vadd.xlane.f32.xlu1 %v2878_v54  ;;  %v3958_v3 = vpop.f32.mrb[80].mxu1 }
 0x6fc   : > { %v2824_v23 = vpop.xlane.xlu1 %2823  ;;  %v2818_v56 = vpop.xlane.xlu0 %2817  ;;  %v2877_v35 = vmul.f32 %v5446_v43, %v5446_v43 }
 0x6fd   : > { %v2850_v12 = vmul.f32 0.0078125, %v2824_v23  ;;  %v2847_v18 = vmul.f32 0.0078125, %v2818_v56  ;;  %v2876_v45 = vmul.f32 %v5438_v51, %v5438_v51 }
 0x6ff   : > { %v5442_v34 = vsub.f32 %v2773_v16, %v2850_v12  ;;  %v5444_v57 = vsub.f32 %v2760_v53, %v2847_v18  ;;  %2892 = vadd.xlane.f32.xlu1 %v2876_v45 }
 0x700   : > { %v2820_v29 = vpop.xlane.xlu1 %2819  ;;  %v2826_v19 = vpop.xlane.xlu0 %2825 }
 0x701   : > { %v2848_v6 = vmul.f32 0.0078125, %v2820_v29  ;;  %v2851_v28 = vmul.f32 0.0078125, %v2826_v19  ;;  %v2879_v63 = vmul.f32 %v5444_v57, %v5444_v57  ;;  %v2882_v27 = vmul.f32 %v5442_v34, %v5442_v34 }
 0x703   : > { %v5452_v1 = vsub.f32 %v2765_v59, %v2848_v6  ;;  %2898 = vadd.xlane.f32.xlu0 %v2879_v63  ;;  %2904 = vadd.xlane.f32.xlu1 %v2882_v27  ;;  %v5454_v41 = vsub.f32 %v2776_v32, %v2851_v28 }
 0x704   : > { %v2822_v11 = vpop.xlane.xlu0 %2821 }
 0x705   : > { %v2832_v62 = vpop.xlane.xlu1 %2831  ;;  %v2849_v10 = vmul.f32 0.0078125, %v2822_v11  ;;  %v2880_v47 = vmul.f32 %v5452_v1, %v5452_v1  ;;  %v2883_v58 = vmul.f32 %v5454_v41, %v5454_v41 }
 0x706   : > { %v2854_v38 = vmul.f32 0.0078125, %v2832_v62 }
 0x707   : > { %2894 = vadd.xlane.f32.xlu0 %v2877_v35  ;;  %2900 = vadd.xlane.f32.xlu1 %v2880_v47  ;;  %v5465_v8 = vsub.f32 %v5410_v24, %v2849_v10 }
 0x708   : > { %v5460_v0 = vsub.f32 %v2789_v37, %v2854_v38  ;;  %v2834_v2 = vpop.xlane.xlu0 %2833 }
 0x709   : > { %v2828_v7 = vpop.xlane.xlu1 %2827  ;;  %v2855_v13 = vmul.f32 0.0078125, %v2834_v2  ;;  %v2881_v59 = vmul.f32 %v5465_v8, %v5465_v8 }
 0x70a   : > { %v2852_v22 = vmul.f32 0.0078125, %v2828_v7  ;;  %v2886_v53 = vmul.f32 %v5460_v0, %v5460_v0 }
 0x70b   : > { %2906 = vadd.xlane.f32.xlu0 %v2883_v58  ;;  %v5473_v26 = vsub.f32 %v5415_v36, %v2855_v13  ;;  %v2990_v13 = vsub.s32 6, %v4920_v49 }
 0x70c   : > { %v5470_v16 = vsub.f32 %v5413_v15, %v2852_v22  ;;  %2912 = vadd.xlane.f32.xlu1 %v2886_v53  ;;  %v2830_v55 = vpop.xlane.xlu0 %2829  ;;  %v3042_v53 = vsub.s32 4, %v4920_v49 }
 0x70d   : > { %v2853_v5 = vmul.f32 0.0078125, %v2830_v55  ;;  %v2887_v14 = vmul.f32 %v5473_v26, %v5473_v26 }
 0x70e   : > { %v2884_v32 = vmul.f32 %v5470_v16, %v5470_v16 }
 0x70f   : > { %2902 = vadd.xlane.f32.xlu0 %v2881_v59  ;;  %v5480_v24 = vsub.f32 %v5419_v33, %v2853_v5 }
 0x710   : > { %2908 = vadd.xlane.f32.xlu1 %v2884_v32 }
 0x711   : > { %v2836_v9 = vpop.xlane.xlu1 %2835  ;;  %v2885_v33 = vmul.f32 %v5480_v24, %v5480_v24 }
 0x712   : > { %v2856_v37 = vmul.f32 0.0078125, %v2836_v9  ;;  %v3010_v9 = vsub.s32 7, %v4920_v49 }
 0x713   : > { %v2838_v50 = vpop.xlane.xlu0 %2837  ;;  %2914 = vadd.xlane.f32.xlu0 %v2887_v14 }
 0x714   : > { %v5485_v30 = vsub.f32 %v5422_v17, %v2856_v37  ;;  %v2857_v15 = vmul.f32 0.0078125, %v2838_v50  ;;  %v5540_v50 = vrot.slane %v5286_v60, %v2990_v13  ;;  %v5548_v49 = vrot.slane %v5286_v60, %v3010_v9 }
 0x715   : > { %v2840_v36 = vpop.xlane.xlu1 %2839 }
 0x716   : > { %v5488_v61 = vsub.f32 %v5424_v42, %v2857_v15  ;;  %v2858_v21 = vmul.f32 0.0078125, %v2840_v36  ;;  %v2888_v52 = vmul.f32 %v5485_v30, %v5485_v30  ;;  %v5543_v15 = vrot.slane %v5286_v60, %v3042_v53 }
 0x717   : > { %v2842_v31 = vpop.xlane.xlu0 %2841  ;;  %2910 = vadd.xlane.f32.xlu0 %v2885_v33 }
 0x718   : > { %v5495_v46 = vsub.f32 %v5427_v4, %v2858_v21  ;;  %v2859_v48 = vmul.f32 0.0078125, %v2842_v31  ;;  %2916 = vadd.xlane.f32.xlu1 %v2888_v52  ;;  %v2889_v44 = vmul.f32 %v5488_v61, %v5488_v61  ;;  %v5506_v4 = vpop.f32.mrb[81].mxu1 }
 0x719   : > { %v5508_v54 = vpop.f32.mrb[82].mxu1  ;;  %v3115_v13 = vadd.f32 %v5506_v4, %v5543_v15 }
 0x71a   : > { %v5498_v17 = vsub.f32 %v5430_v25, %v2859_v48  ;;  %v2890_v42 = vmul.f32 %v5495_v46, %v5495_v46  ;;  %v5510_v20 = vpop.f32.mrb[83].mxu1 }
 0x71b   : > { %2918 = vadd.xlane.f32.xlu0 %v2889_v44  ;;  %v5512_v25 = vpop.f32.mrb[84].mxu1 }
 0x71c   : > { %2920 = vadd.xlane.f32.xlu1 %v2890_v42  ;;  %v2891_v40 = vmul.f32 %v5498_v17, %v5498_v17  ;;  %v5514_v23 = vpop.f32.mrb[85].mxu1 }
 0x71d   : > { %v5516_v56 = vpop.f32.mrb[86].mxu1 }
 0x71e   : > { %v5518_v12 = vpop.f32.mrb[87].mxu1 }
 0x71f   : > { %2922 = vadd.xlane.f32.xlu0 %v2891_v40  ;;  %v5520_v18 = vpop.f32.mrb[88].mxu1 }
 0x720   : > { %v5522_v45 = vpop.f32.mrb[89].mxu1 }
 0x721   : > { %v5524_v29 = vpop.f32.mrb[90].mxu1 }
 0x722   : > { %v5526_v19 = vpop.f32.mrb[91].mxu1 }
 0x723   : > { %v5528_v6 = vpop.f32.mrb[92].mxu1 }
 0x724   : > { %v5530_v28 = vpop.f32.mrb[93].mxu1 }
 0x725   : > { %v5532_v63 = vpop.f32.mrb[94].mxu1 }
 0x726   : > { %v5534_v27 = vpop.f32.mrb[95].mxu1 }
 0x788   : > { %v2897_v62 = vpop.xlane.xlu1 %2896 }
 0x789   : > { %v2926_v11 = vmul.f32 0.0078125, %v2897_v62  ;;  %v3123_v62 = vadd.f32 %v3958_v3, %v5543_v15 }
 0x78b   : > { %v2942_v38 = vadd.f32 1e-05, %v2926_v11 }
 0x78c   : > { %v2893_v10 = vpop.xlane.xlu1 %2892 }
 0x78d   : > { %4282 = vrsqrt.f32 %v2942_v38  ;;  %v2924_v35 = vmul.f32 0.0078125, %v2893_v10 }
 0x78f   : > { %v2940_v47 = vadd.f32 1e-05, %v2924_v35 }
 0x790   : > { %v2899_v7 = vpop.xlane.xlu0 %2898  ;;  %v2905_v2 = vpop.xlane.xlu1 %2904 }
 0x791   : > { %4284 = vrsqrt.f32 %v2940_v47  ;;  %v2927_v58 = vmul.f32 0.0078125, %v2899_v7  ;;  %v2930_v22 = vmul.f32 0.0078125, %v2905_v2 }
 0x793   : > { %v2943_v55 = vadd.f32 1e-05, %v2927_v58  ;;  %v2946_v5 = vadd.f32 1e-05, %v2930_v22 }
 0x794   : > { %v2895_v59 = vpop.xlane.xlu0 %2894  ;;  %v2901_v32 = vpop.xlane.xlu1 %2900 }
 0x795   : > { %4286 = vrsqrt.f32 %v2943_v55  ;;  %v2925_v37 = vmul.f32 0.0078125, %v2895_v59  ;;  %v2928_v14 = vmul.f32 0.0078125, %v2901_v32 }
 0x796   : > { %4288 = vrsqrt.f32 %v2946_v5 }
 0x797   : > { %v4283_v36 = vpop.eup %4282  ;;  %v2941_v21 = vadd.f32 1e-05, %v2925_v37  ;;  %v2944_v52 = vadd.f32 1e-05, %v2928_v14 }
 0x798   : > { %v2907_v33 = vpop.xlane.xlu0 %2906  ;;  %v2974_v48 = vmul.f32 %v4283_v36, %v5434_v39  ;;  %v3126_v36 = vadd.f32 %v5508_v54, %v5543_v15 }
 0x799   : > { %v2913_v31 = vpop.xlane.xlu1 %2912  ;;  %4290 = vrsqrt.f32 %v2941_v21  ;;  %v2931_v42 = vmul.f32 0.0078125, %v2907_v33 }
 0x79a   : > { %v2934_v44 = vmul.f32 0.0078125, %v2913_v31  ;;  %4292 = vrsqrt.f32 %v2944_v52  ;;  %v2994_v40 = vmul.f32 %v5540_v50, %v2974_v48  ;;  %v3139_v31 = vadd.f32 %v5512_v25, %v5543_v15 }
 0x79b   : > { %v4285_v11 = vpop.eup %4284  ;;  %v2947_v38 = vadd.f32 1e-05, %v2931_v42  ;;  %v3118_v25 = vadd.f32 %v5510_v20, %v5543_v15 }
 0x79c   : > { %v2950_v10 = vadd.f32 1e-05, %v2934_v44  ;;  %v3014_v35 = vadd.f32 %v5548_v49, %v2994_v40  ;;  %v2903_v47 = vpop.xlane.xlu0 %2902  ;;  %v2972_v60 = vmul.f32 %v4285_v11, %v5438_v51 }
 0x79d   : > { %v2909_v39 = vpop.xlane.xlu1 %2908  ;;  %4294 = vrsqrt.f32 %v2947_v38  ;;  %v2929_v7 = vmul.f32 0.0078125, %v2903_v47 }
 0x79e   : > { %v2932_v2 = vmul.f32 0.0078125, %v2909_v39  ;;  %4296 = vrsqrt.f32 %v2950_v10  ;;  %v3179_v58 = vadd.f32 %v3123_v62, %v3014_v35  ;;  %v2992_v22 = vmul.f32 %v5540_v50, %v2972_v60 }
 0x79f   : > { %v4287_v3 = vpop.eup %4286  ;;  %v2945_v53 = vadd.f32 1e-05, %v2929_v7  ;;  %v3131_v60 = vadd.f32 %v5514_v23, %v5543_v15 }
 0x7a0   : > { %v2948_v55 = vadd.f32 1e-05, %v2932_v2  ;;  %v4289_v5 = vpop.eup %4288  ;;  %3195 = vst [vmem:[%s5559_s24 + $0x10] sm:$0xff] %v3179_v58  ;;  %v3012_v51 = vadd.f32 %v5548_v49, %v2992_v22  ;;  %v2915_v59 = vpop.xlane.xlu0 %2914  ;;  %v2975_v32 = vmul.f32 %v4287_v3, %v5444_v57 }
 0x7a1   : > { %4298 = vrsqrt.f32 %v2945_v53  ;;  %v2935_v9 = vmul.f32 0.0078125, %v2915_v59  ;;  %v2978_v37 = vmul.f32 %v4289_v5, %v5442_v34 }
 0x7a2   : > { %4300 = vrsqrt.f32 %v2948_v55  ;;  %v3177_v4 = vadd.f32 %v3115_v13, %v3012_v51  ;;  %v2995_v14 = vmul.f32 %v5540_v50, %v2975_v32 }
 0x7a3   : > { %v4291_v21 = vpop.eup %4290  ;;  %v2951_v52 = vadd.f32 1e-05, %v2935_v9  ;;  %v2998_v33 = vmul.f32 %v5540_v50, %v2978_v37 }
 0x7a4   : > { %v4293_v48 = vpop.eup %4292  ;;  %3193 = vst [vmem:[%s5559_s24] sm:$0xff] %v3177_v4  ;;  %v3015_v57 = vadd.f32 %v5548_v49, %v2995_v14  ;;  %v2973_v34 = vmul.f32 %v4291_v21, %v5446_v43  ;;  %v2911_v44 = vpop.xlane.xlu0 %2910 }
 0x7a5   : > { %v2917_v42 = vpop.xlane.xlu1 %2916  ;;  %4302 = vrsqrt.f32 %v2951_v52  ;;  %v3018_v54 = vadd.f32 %v5548_v49, %v2998_v33  ;;  %v2933_v62 = vmul.f32 0.0078125, %v2911_v44  ;;  %v2976_v10 = vmul.f32 %v4293_v48, %v5452_v1 }
 0x7a6   : > { %v2936_v40 = vmul.f32 0.0078125, %v2917_v42  ;;  %v3180_v11 = vadd.f32 %v3126_v36, %v3015_v57  ;;  %v2993_v38 = vmul.f32 %v5540_v50, %v2973_v34  ;;  %v3142_v1 = vadd.f32 %v5516_v56, %v5543_v15 }
 0x7a7   : > { %v4295_v35 = vpop.eup %4294  ;;  %v3183_v39 = vadd.f32 %v3139_v31, %v3018_v54  ;;  %v2949_v43 = vadd.f32 1e-05, %v2933_v62  ;;  %v2996_v22 = vmul.f32 %v5540_v50, %v2976_v10  ;;  %v3155_v56 = vadd.f32 %v5520_v18, %v5543_v15 }
 0x7a8   : > { %v2952_v47 = vadd.f32 1e-05, %v2936_v40  ;;  %v4297_v7 = vpop.eup %4296  ;;  %3196 = vst [vmem:[%s5559_s24 + $0x18] sm:$0xff] %v3180_v11  ;;  %v3013_v2 = vadd.f32 %v5548_v49, %v2993_v38  ;;  %v2919_v13 = vpop.xlane.xlu0 %2918  ;;  %v2979_v20 = vmul.f32 %v4295_v35, %v5454_v41 }
 0x7a9   : > { %v2921_v58 = vpop.xlane.xlu1 %2920  ;;  %3199 = vst [vmem:[%s5559_s24 + $0x30] sm:$0xff] %v3183_v39  ;;  %v2937_v53 = vmul.f32 0.0078125, %v2919_v13  ;;  %v2982_v23 = vmul.f32 %v4297_v7, %v5460_v0  ;;  %v3016_v5 = vadd.f32 %v5548_v49, %v2996_v22  ;;  %v3171_v13 = vadd.f32 %v5528_v6, %v5543_v15 }
 0x7aa   : > { %4304 = vrsqrt.f32 %v2952_v47  ;;  %v2938_v3 = vmul.f32 0.0078125, %v2921_v58  ;;  %v3178_v55 = vadd.f32 %v3118_v25, %v3013_v2  ;;  %v2999_v51 = vmul.f32 %v5540_v50, %v2979_v20 }
 0x7ab   : > { %4306 = vrsqrt.f32 %v2949_v43  ;;  %v4299_v59 = vpop.eup %4298  ;;  %v2953_v41 = vadd.f32 1e-05, %v2937_v53  ;;  %v3002_v9 = vmul.f32 %v5540_v50, %v2982_v23  ;;  %v3181_v4 = vadd.f32 %v3131_v60, %v3016_v5 }
 0x7ac   : > { %v2954_v32 = vadd.f32 1e-05, %v2938_v3  ;;  %v4301_v37 = vpop.eup %4300  ;;  %3194 = vst [vmem:[%s5559_s24 + $0x8] sm:$0xff] %v3178_v55  ;;  %v3019_v0 = vadd.f32 %v5548_v49, %v2999_v51  ;;  %v2977_v14 = vmul.f32 %v4299_v59, %v5465_v8  ;;  %v2923_v36 = vpop.xlane.xlu0 %2922  ;;  %v3147_v8 = vadd.f32 %v5522_v45, %v5543_v15 }
 0x7ad   : > { %v3022_v21 = vadd.f32 %v5548_v49, %v3002_v9  ;;  %v2939_v52 = vmul.f32 0.0078125, %v2923_v36  ;;  %v2980_v33 = vmul.f32 %v4301_v37, %v5470_v16  ;;  %3197 = vst [vmem:[%s5559_s24 + $0x20] sm:$0xff] %v3181_v4  ;;  %v3134_v16 = vadd.f32 %v5518_v12, %v5543_v15 }
 0x7ae   : > { %4308 = vrsqrt.f32 %v2954_v32  ;;  %v3184_v31 = vadd.f32 %v3142_v1, %v3019_v0  ;;  %v2997_v18 = vmul.f32 %v5540_v50, %v2977_v14  ;;  %v3158_v45 = vadd.f32 %v5524_v29, %v5543_v15 }
 0x7af   : > { %4310 = vrsqrt.f32 %v2953_v41  ;;  %v4303_v48 = vpop.eup %4302  ;;  %v3187_v57 = vadd.f32 %v3155_v56, %v3022_v21  ;;  %v2955_v42 = vadd.f32 1e-05, %v2939_v52  ;;  %v3000_v34 = vmul.f32 %v5540_v50, %v2980_v33 }
 0x7b0   : > { %3200 = vst [vmem:[%s5559_s24 + $0x38] sm:$0xff] %v3184_v31  ;;  %v3017_v44 = vadd.f32 %v5548_v49, %v2997_v18  ;;  %v2983_v40 = vmul.f32 %v4303_v48, %v5473_v26  ;;  %v3163_v43 = vadd.f32 %v5530_v28, %v5543_v15  ;;  %v3166_v53 = vadd.f32 %v5534_v27, %v5543_v15 }
 0x7b1   : > { %3203 = vst [vmem:[%s5559_s24 + $0x50] sm:$0xff] %v3187_v57  ;;  %4312 = vrsqrt.f32 %v2955_v42  ;;  %v3020_v54 = vadd.f32 %v5548_v49, %v3000_v34  ;;  %v3174_v51 = vadd.f32 %v5532_v63, %v5543_v15 }
 0x7b2   : > { %v3182_v62 = vadd.f32 %v3134_v16, %v3017_v44  ;;  %v3003_v11 = vmul.f32 %v5540_v50, %v2983_v40 }
 0x7b3   : > { %v3185_v25 = vadd.f32 %v3147_v8, %v3020_v54 }
 0x7b4   : > { %v4305_v38 = vpop.eup %4304  ;;  %3198 = vst [vmem:[%s5559_s24 + $0x28] sm:$0xff] %v3182_v62  ;;  %v3023_v35 = vadd.f32 %v5548_v49, %v3003_v11 }
 0x7b5   : > { %v4307_v10 = vpop.eup %4306  ;;  %v2984_v12 = vmul.f32 %v4305_v38, %v5485_v30  ;;  %3201 = vst [vmem:[%s5559_s24 + $0x40] sm:$0xff] %v3185_v25 }
 0x7b6   : > { %v2981_v26 = vmul.f32 %v4307_v10, %v5480_v24  ;;  %v3188_v47 = vadd.f32 %v3158_v45, %v3023_v35  ;;  %v3150_v24 = vadd.f32 %v5526_v19, %v5543_v15 }
 0x7b7   : > { %v3004_v39 = vmul.f32 %v5540_v50, %v2984_v12 }
 0x7b8   : > { %v4309_v60 = vpop.eup %4308  ;;  %v3001_v29 = vmul.f32 %v5540_v50, %v2981_v26  ;;  %3204 = vst [vmem:[%s5559_s24 + $0x58] sm:$0xff] %v3188_v47 }
 0x7b9   : > { %v4311_v7 = vpop.eup %4310  ;;  %v2986_v2 = vmul.f32 %v4309_v60, %v5495_v46  ;;  %v3024_v30 = vadd.f32 %v5548_v49, %v3004_v39 }
 0x7ba   : > { %v3021_v58 = vadd.f32 %v5548_v49, %v3001_v29  ;;  %v2985_v22 = vmul.f32 %v4311_v7, %v5488_v61 }
 0x7bb   : > { %v3006_v28 = vmul.f32 %v5540_v50, %v2986_v2  ;;  %v3189_v20 = vadd.f32 %v3163_v43, %v3024_v30  ;;  %v4313_v1 = vpop.eup %4312 }
 0x7bc   : > { %v3186_v46 = vadd.f32 %v3150_v24, %v3021_v58  ;;  %v3005_v3 = vmul.f32 %v5540_v50, %v2985_v22  ;;  %v2987_v61 = vmul.f32 %v4313_v1, %v5498_v17 }
 0x7bd   : > { %v3026_v19 = vadd.f32 %v5548_v49, %v3006_v28  ;;  %3205 = vst [vmem:[%s5559_s24 + $0x60] sm:$0xff] %v3189_v20 }
 0x7be   : > { %3202 = vst [vmem:[%s5559_s24 + $0x48] sm:$0xff] %v3186_v46  ;;  %v3025_v6 = vadd.f32 %v5548_v49, %v3005_v3  ;;  %v3007_v55 = vmul.f32 %v5540_v50, %v2987_v61 }
 0x7bf   : > { %v3191_v23 = vadd.f32 %v3171_v13, %v3026_v19 }
 0x7c0   : > { %v3190_v5 = vadd.f32 %v3166_v53, %v3025_v6  ;;  %v3027_v27 = vadd.f32 %v5548_v49, %v3007_v55 }
 0x7c1   : > { %3207 = vst [vmem:[%s5559_s24 + $0x70] sm:$0xff] %v3191_v23 }
 0x7c2   : > { %3206 = vst [vmem:[%s5559_s24 + $0x68] sm:$0xff] %v3190_v5  ;;  %v3192_v17 = vadd.f32 %v3174_v51, %v3027_v27 }
 0x7c4   : > { %3208 = vst [vmem:[%s5559_s24 + $0x78] sm:$0xff] %v3192_v17 }
 0x7c5   : > { %4344 = shalt.err (!%p4341_p3)
}
 0x7c6   : > { %s4345_s14 = scalar_lea.hbm %s5652_s12, 2048  ;;  %s4349_s29 = scalar_lea.hbm %s5711_s11, 4096 }
 0x7c7   : > { %p4346_p4 = scmp.ne.s32.totalorder %s5652_s12, %s4345_s14  ;;  %p4350_p9 = scmp.lt.u32.totalorder %s5652_s12, %s5711_s11 }
 0x7c8   : > { %p4351_p10 = scmp.lt.u32.totalorder %s4349_s29, %s4345_s14  ;;  %p4353_p12 = scmp.lt.u32.totalorder %s4345_s14, %s5652_s12 }
 0x7c9   : > { %p4347_p7 = pnand %p4346_p4, %p4497_p5 }
 0x7ca   : > { %p4352_p11 = por %p4351_p10, %p4350_p9 }
 0x7cb   : > { %p4348_p8 = pneg %p4347_p7 }
 0x7cc   : > { %p4354_p13 = por %p4353_p12, %p4352_p11 }
 0x7ce   : > { %p4355_p0 = pnand %p4354_p13, %p4348_p8 }
 0x7d0   : > { %4358 = shalt.err (!%p4355_p0)
}
 0x7d1   : > { %s4397_s13 = smov 128   ;;  %s4398_s15 = smov 8  }
 0x7d2   : > { %4056 = dma.vmem_to_hbm [thread:$0]  (%p4497_p5), %s5654_s25, 2048, %s5652_s12, %s5659_s21, %s4397_s13, %s4397_s13, %s4398_s15  }
 0x7d3 PF: > { %p4062_p1 = scmp.ge.s32.totalorder %s4393_s20, 2  ;;  %s3238_s22 = sand.u32 1, %s4381_s17  }
 0x7d4   : > { %s3239_s14 = scalar_lea.sflag [#allocation3], %s3238_s22 }
 0x7d5   : > { %p4059_p2 = pnand %p4062_p1, %p4501_p6 }
 0x7d7   : > { %4376 = dma.done.wait (!%p4059_p2), %s3239_s14, 2048  }
 0x7d8   : > { %4378 = vsyncadd (!%p4059_p2), %s3239_s14, 4294965248  ;;  %p21_p3 = scmp.ge.s32.totalorder %s4484_s23, 4   ;;  %s5716_s17 = smov %s4385_s18 }
 0x7d9   : > { %s5717_s18 = smov %s4389_s19  ;;  %s5718_s19 = smov %s4495_s26 }
 0x7da   : > { %s5719_s20 = smov %s4484_s23  ;;  %23 = sbr.rel (!%p21_p3) target bundleno = 5 (0x5), region = 102 }
 0x7e1   :  { %3244 = vsyncpa [#allocation3], 1 }
 0x7e2   :  { %3246 = vsyncpa [#allocation3 + $0x1], 1 }

// kernel: tpu_custom_call.1
= control target key start
LH: loop header
LB: loop body
LE: loop exit
PB: predicated region body
PF: predicated region fallthrough
CT: control target
= control target key end

     0   :  { %s5700_s0 = inlined_call_operand.vmem [shape: f32[256,32], index: 0, kind: input, shape index: {}]   ;;  %s5701_s1 = inlined_call_operand.vmem [shape: f32[256,64], index: 1, kind: input, shape index: {}]   ;;  %s5702_s2 = inlined_call_operand.vmem [shape: f32[8,128], index: 2, kind: input, shape index: {}]   ;;  %s5703_s3 = inlined_call_operand.vmem [shape: f32[32,8], index: 3, kind: input, shape index: {}]   ;;  %s5704_s4 = inlined_call_operand.vmem [shape: bf16[8,32], index: 4, kind: input, shape index: {}]   ;;  %s5705_s5 = inlined_call_operand.vmem [shape: f32[128,8], index: 5, kind: input, shape index: {}]   ;;  %s5706_s6 = inlined_call_operand.vmem [shape: bf16[8,128], index: 6, kind: input, shape index: {}]   ;;  %s5707_s7 = inlined_call_operand.vmem [shape: bf16[96,128], index: 7, kind: input, shape index: {}]   ;;  %s5708_s8 = inlined_call_operand.vmem [shape: bf16[128,128], index: 8, kind: input, shape index: {}]   ;;  %s5709_s9 = inlined_call_operand.vmem [shape: bf16[32,128], index: 9, kind: input, shape index: {}]   ;;  %s5710_s10 = inlined_call_operand.vmem [shape: bf16[128,128], index: 10, kind: input, shape index: {}]   ;;  %s5711_s11 = inlined_call_operand.hbm [shape: f32[256,128], index: 11, kind: output, shape index: {}]  }
   0x1   :  { %5712 = sst [smem:[#allocation5_spill]] %s5700_s0 }
   0x2   :  { %16 = vsyncpa [#allocation3], 0 }
   0x3   :  { %18 = vsyncpa [#allocation3 + $0x1], 0  ;;  %s4459_s17 = smov 0   ;;  %s4461_s18 = smov 0  }
   0x4   :  { %s4463_s19 = smov 0   ;;  %s4465_s20 = smov 0  }
   0x5 LB: > { %s4480_s21 = sadd.s32 4294967295, %s4393_s20   ;;  %s3297_s22 = sadd.s32 4294967294, %s4393_s20   ;;  %s4393_s20 = sphi %s4465_s20, %s5719_s20   ;;  %s4389_s19 = sphi %s4463_s19, %s5718_s19   ;;  %s4385_s18 = sphi %s4461_s18, %s5717_s18   ;;  %s4381_s17 = sphi %s4459_s17, %s5716_s17  }
   0x6   : > { %s4484_s23 = sadd.s32 1, %s4393_s20   ;;  %s272_s24 = sadd.s32 1, %s4389_s19 }
   0x7   : > { %s269_s25 = ssub.s32 %s4393_s20, %s4484_s23  ;;  %p282_p0 = scmp.ne.s32.totalorder %s4389_s19, %s4385_s18 }
   0x8   : > { %p270_p1 = scmp.eq.s32.totalorder %s269_s25, 0  ;;  %p283_p2 = scmp.eq.s32.totalorder %s4480_s21, 1 }
   0x9   : > { %p288_p3 = scmp.ne.s32.totalorder %s4385_s18, %s4381_s17  ;;  %p289_p4 = scmp.eq.s32.totalorder %s3297_s22, 1 }
   0xa   : > { %s4495_s26 = scalar_select %p270_p1, %s4389_s19, %s272_s24  }
   0xb   : > { %p4497_p5 = por %p283_p2, %p282_p0  ;;  %p4501_p6 = por %p289_p4, %p288_p3 }
   0xc   : > { %p3300_p7 = scmp.ge.s32.totalorder %s4393_s20, 1  ;;  %p352_p8 = scmp.lt.s32.totalorder %s4393_s20, 3 }
   0xe   : > { %p353_p9 = pnand %p3300_p7, %p352_p8 }
   0xf   : > { %v428_v0 = vld [vmem:[%s5703_s3] sm:$0xff] (!%p353_p9)  ;;  %v429_v1 = vld [vmem:[%s5703_s3 + $0x8] sm:$0xff] (!%p353_p9)  ;;  %v430_v2 = vld [vmem:[%s5703_s3 + $0x10] sm:$0xff] (!%p353_p9)  ;;  %s3302_s16 = sshll.u32 (!%p353_p9), %s4480_s21, 4  ;;  %vm432_vm0 = vcmask (!%p353_p9), 261120   ;;  %s5715_s0 = sld [smem:[#allocation5_spill]] (!%p353_p9) }
  0x10   : > { %356 = sbr.rel (%p353_p9) target bundleno = 2003 (0x7d3), region = 64  ;;  %v3972_v3 = vpack.c.bf16 (!%p353_p9), %v429_v1, %v428_v0  ;;  %v431_v4 = vld [vmem:[%s5703_s3 + $0x18] sm:$0xff] (!%p353_p9)  ;;  %p398_p10 = scmp.lt.s32.totalorder (!%p353_p9), %s3302_s16, 31  ;;  %v907_v6 = vld [vmem:[%s5704_s4] sm:$0xf] (!%p353_p9)  ;;  %vm933_vm1 = vcmask (!%p353_p9), 1043456  }
  0x11   : > { %v3976_v5 = vpack.c.bf16 (!%p353_p9), %v431_v4, %v430_v2  ;;  %v935_v15 = vsel (!%p353_p9), %vm933_vm1, %v907_v6, 0  ;;  %vm908_vm2 = vcmask (!%p353_p9), 64512   ;;  %vm1539_vm3 = vcmask (!%p353_p9), 785408  }
  0x12   : > { %3973 = vmatprep.subr.bf16.mxu0 (!%p353_p9), %v3972_v3  ;;  %3981 = vmatprep.subr.bf16.mxu1 (!%p353_p9), %v3972_v3 }
  0x13   : > { %3975 = vmatpush3.bf16.msra.mxu0 (!%p353_p9), %v3972_v3  ;;  %3983 = vmatpush3.bf16.msra.mxu1 (!%p353_p9), %v3972_v3 }
  0x14   : > { %3977 = vmatprep.subr.bf16.mxu0 (!%p353_p9), %v3976_v5  ;;  %3985 = vmatprep.subr.bf16.mxu1 (!%p353_p9), %v3976_v5 }
  0x17   : > { %s5721_s16 = smov (!%p398_p10, %s3302_s16), 31  ;;  %3979 = vmatpush3.bf16.msra.mxu0 %v3976_v5  ;;  %3987 = vmatpush3.bf16.msra.mxu1 %v3976_v5 }
  0x18   : > { %s3303_s25 = sshll.u32 %s5721_s16, 3  ;;  %4052 = vmatprep.subr.msk.bf16.mxu0 %vm933_vm1, %v907_v6  ;;  %4053 = vmatprep.subr.msk.bf16.mxu1 %vm933_vm1, %v907_v6  ;;  %s4395_s16 = smov 32  }
  0x19   : > { %s4531_s14 = scalar_lea.vmem %s5715_s0, %s3303_s25  ;;  %s4669_s24 = scalar_lea.vmem %s5701_s1, %s3303_s25 }
  0x1a   : > { %v4534_v7 = vld [vmem:[%s4531_s14] sm:$0xff]  ;;  %v4537_v8 = vld [vmem:[%s4531_s14 + $0x8] sm:$0xff]  ;;  %v4540_v9 = vld [vmem:[%s4531_s14 + $0x10] sm:$0xff]  ;;  %s4396_s0 = smov [#allocation2]  }
  0x1b   : > { %v626_v10 = vmul.f32 %v4534_v7, %v4534_v7  ;;  %v627_v11 = vmul.f32 %v4537_v8, %v4537_v8  ;;  %v4547_v12 = vld [vmem:[%s4531_s14 + $0x18] sm:$0xff]  ;;  %v628_v13 = vmul.f32 %v4540_v9, %v4540_v9  ;;  %3620 = vmatprep.mubr.msk.f32.mxu0 %vm432_vm0, %v4534_v7  ;;  %v4554_v14 = vld [vmem:[%s4531_s14 + $0x20] sm:$0xff]  ;;  %v4565_v17 = vld [vmem:[%s4531_s14 + $0x28] sm:$0xff]  ;;  %s4335_s15 = sshll.u32 %s4396_s0, 4  ;;  %s4336_s15 = int_to_ptr.vmem [resolvable:$false] %s4335_s15 }
  0x1c   : > { %3621 = vmatmul.mubr.msk.f32.vlgmr.msra.gmra.mrb[0].mxu0 %vm432_vm0, %v4537_v8  ;;  %v629_v16 = vmul.f32 %v4547_v12, %v4547_v12  ;;  %v630_v18 = vmul.f32 %v4554_v14, %v4554_v14  ;;  %v4573_v19 = vld [vmem:[%s4531_s14 + $0x30] sm:$0xff]  ;;  %v4577_v20 = vld [vmem:[%s4531_s14 + $0x38] sm:$0xff]  ;;  %v631_v21 = vmul.f32 %v4565_v17, %v4565_v17  ;;  %v4585_v22 = vld [vmem:[%s4531_s14 + $0x40] sm:$0xff] }
  0x1d   : > { %3652 = vmatprep.mubr.msk.f32.mxu1 %vm432_vm0, %v626_v10  ;;  %3623 = vmatprep.mubr.msk.f32.mxu0 %vm432_vm0, %v4540_v9  ;;  %v632_v23 = vmul.f32 %v4573_v19, %v4573_v19  ;;  %v4593_v24 = vld [vmem:[%s4531_s14 + $0x48] sm:$0xff]  ;;  %v633_v25 = vmul.f32 %v4577_v20, %v4577_v20  ;;  %v4601_v26 = vld [vmem:[%s4531_s14 + $0x50] sm:$0xff]  ;;  %v634_v27 = vmul.f32 %v4585_v22, %v4585_v22  ;;  %v4617_v29 = vld [vmem:[%s4531_s14 + $0x58] sm:$0xff] }
  0x1e   : > { %3653 = vmatmul.mubr.msk.f32.vlgmr.msra.gmra.mrb[0].mxu1 %vm432_vm0, %v627_v11  ;;  %3677 = vmatpush3.bf16.msra.mxu0 %v935_v15  ;;  %v635_v28 = vmul.f32 %v4593_v24, %v4593_v24  ;;  %v636_v30 = vmul.f32 %v4601_v26, %v4601_v26  ;;  %v4622_v31 = vld [vmem:[%s4531_s14 + $0x60] sm:$0xff]  ;;  %v637_v32 = vmul.f32 %v4617_v29, %v4617_v29  ;;  %v4633_v33 = vld [vmem:[%s4531_s14 + $0x68] sm:$0xff]  ;;  %v4638_v35 = vld [vmem:[%s4531_s14 + $0x70] sm:$0xff] }
  0x1f   : > { %3655 = vmatprep.mubr.msk.f32.mxu1 %vm432_vm0, %v628_v13  ;;  %3695 = vmatpush3.bf16.msra.mxu1 %v935_v15  ;;  %v638_v34 = vmul.f32 %v4622_v31, %v4622_v31  ;;  %v639_v36 = vmul.f32 %v4633_v33, %v4633_v33  ;;  %v4649_v37 = vld [vmem:[%s4531_s14 + $0x78] sm:$0xff]  ;;  %v640_v38 = vmul.f32 %v4638_v35, %v4638_v35  ;;  %v1335_v40 = vld [vmem:[%s4669_s24] sm:$0xff]  ;;  %v4673_v41 = vld [vmem:[%s4669_s24 + $0x8] sm:$0xff] }
  0x20   : > { %3624 = vmatmul.mubr.msk.f32.gmra.mrb[2].mxu0 %vm432_vm0, %v4547_v12  ;;  %v641_v39 = vmul.f32 %v4649_v37, %v4649_v37  ;;  %v4676_v42 = vld [vmem:[%s4669_s24 + $0x10] sm:$0xff]  ;;  %v1351_v43 = vmul.f32 0.5, %v1335_v40  ;;  %v1352_v44 = vmul.f32 0.5, %v4673_v41  ;;  %v4680_v45 = vld [vmem:[%s4669_s24 + $0x18] sm:$0xff]  ;;  %v4684_v47 = vld [vmem:[%s4669_s24 + $0x20] sm:$0xff] }
  0x21   : > { %3626 = vmatprep.mubr.msk.f32.mxu0 %vm432_vm0, %v4554_v14  ;;  %v1353_v46 = vmul.f32 0.5, %v4676_v42  ;;  %v4687_v48 = vld [vmem:[%s4669_s24 + $0x28] sm:$0xff]  ;;  %v1354_v49 = vmul.f32 0.5, %v4680_v45  ;;  %v4691_v50 = vld [vmem:[%s4669_s24 + $0x30] sm:$0xff]  ;;  %v1355_v51 = vmul.f32 0.5, %v4684_v47  ;;  %v4695_v52 = vld [vmem:[%s4669_s24 + $0x38] sm:$0xff] }
  0x22   : > { %3656 = vmatmul.mubr.msk.f32.gmra.mrb[2].mxu1 %vm432_vm0, %v629_v16  ;;  %4122 = vtanh.f32 %v1351_v43  ;;  %v1356_v53 = vmul.f32 0.5, %v4687_v48  ;;  %v4699_v54 = vld [vmem:[%s4669_s24 + $0x50] sm:$0xff]  ;;  %v1357_v55 = vmul.f32 0.5, %v4691_v50  ;;  %v4703_v56 = vld [vmem:[%s4669_s24 + $0x58] sm:$0xff]  ;;  %v1358_v57 = vmul.f32 0.5, %v4695_v52  ;;  %v4707_v58 = vld [vmem:[%s4669_s24 + $0x40] sm:$0xff] }
  0x23   : > { %3658 = vmatprep.mubr.msk.f32.mxu1 %vm432_vm0, %v630_v18  ;;  %4124 = vtanh.f32 %v1352_v44  ;;  %v1361_v59 = vmul.f32 0.5, %v4699_v54  ;;  %v4711_v60 = vld [vmem:[%s4669_s24 + $0x48] sm:$0xff]  ;;  %v1362_v61 = vmul.f32 0.5, %v4703_v56  ;;  %v4715_v62 = vld [vmem:[%s4669_s24 + $0x70] sm:$0xff]  ;;  %v1359_v63 = vmul.f32 0.5, %v4707_v58  ;;  %v4719_v0 = vld [vmem:[%s4669_s24 + $0x78] sm:$0xff] }
  0x24   : > { %3627 = vmatmul.mubr.msk.f32.gmra.mrb[4].mxu0 %vm432_vm0, %v4565_v17  ;;  %4126 = vtanh.f32 %v1353_v46  ;;  %v1360_v1 = vmul.f32 0.5, %v4711_v60  ;;  %v4723_v2 = vld [vmem:[%s4669_s24 + $0x60] sm:$0xff]  ;;  %v1365_v3 = vmul.f32 0.5, %v4715_v62  ;;  %v4727_v4 = vld [vmem:[%s4669_s24 + $0x68] sm:$0xff]  ;;  %v1366_v5 = vmul.f32 0.5, %v4719_v0 }
  0x25   : > { %3629 = vmatprep.mubr.msk.f32.mxu0 %vm432_vm0, %v4573_v19  ;;  %4128 = vtanh.f32 %v1354_v49  ;;  %v1363_v10 = vmul.f32 0.5, %v4723_v2  ;;  %v1364_v15 = vmul.f32 0.5, %v4727_v4 }
  0x26   : > { %3659 = vmatmul.mubr.msk.f32.gmra.mrb[4].mxu1 %vm432_vm0, %v631_v21  ;;  %4130 = vtanh.f32 %v1355_v51 }
  0x27   : > { %3661 = vmatprep.mubr.msk.f32.mxu1 %vm432_vm0, %v632_v23  ;;  %4132 = vtanh.f32 %v1356_v53 }
  0x28   : > { %3630 = vmatmul.mubr.msk.f32.gmra.mrb[6].mxu0 %vm432_vm0, %v4577_v20  ;;  %4134 = vtanh.f32 %v1357_v55 }
  0x29   : > { %3632 = vmatprep.mubr.msk.f32.mxu0 %vm432_vm0, %v4585_v22  ;;  %4136 = vtanh.f32 %v1358_v57 }
  0x2a   : > { %3662 = vmatmul.mubr.msk.f32.gmra.mrb[6].mxu1 %vm432_vm0, %v633_v25  ;;  %4138 = vtanh.f32 %v1361_v59 }
  0x2b   : > { %3664 = vmatprep.mubr.msk.f32.mxu1 %vm432_vm0, %v634_v27  ;;  %4140 = vtanh.f32 %v1362_v61 }
  0x2c   : > { %3633 = vmatmul.mubr.msk.f32.gmra.mrb[8].mxu0 %vm432_vm0, %v4593_v24  ;;  %v4123_v6 = vpop.eup %4122  ;;  %4142 = vtanh.f32 %v1359_v63 }
  0x2d   : > { %3635 = vmatprep.mubr.msk.f32.mxu0 %vm432_vm0, %v4601_v26  ;;  %v4125_v11 = vpop.eup %4124  ;;  %v1383_v13 = vmul.f32 0.5, %v4123_v6  ;;  %4144 = vtanh.f32 %v1360_v1 }
  0x2e   : > { %3665 = vmatmul.mubr.msk.f32.gmra.mrb[8].mxu1 %vm432_vm0, %v635_v28  ;;  %v4127_v16 = vpop.eup %4126  ;;  %v1384_v18 = vmul.f32 0.5, %v4125_v11  ;;  %4146 = vtanh.f32 %v1365_v3 }
  0x2f   : > { %3667 = vmatprep.mubr.msk.f32.mxu1 %vm432_vm0, %v636_v30  ;;  %v4129_v21 = vpop.eup %4128  ;;  %v1399_v23 = vadd.f32 0.5, %v1383_v13  ;;  %v1385_v25 = vmul.f32 0.5, %v4127_v16  ;;  %4148 = vtanh.f32 %v1366_v5 }
  0x30   : > { %3636 = vmatmul.mubr.msk.f32.gmra.mrb[10].mxu0 %vm432_vm0, %v4617_v29  ;;  %v4131_v27 = vpop.eup %4130  ;;  %v1400_v28 = vadd.f32 0.5, %v1384_v18  ;;  %v1386_v30 = vmul.f32 0.5, %v4129_v21  ;;  %4150 = vtanh.f32 %v1363_v10 }
  0x31   : > { %3638 = vmatprep.mubr.msk.f32.mxu0 %vm432_vm0, %v4622_v31  ;;  %4152 = vtanh.f32 %v1364_v15 }
  0x32   : > { %3668 = vmatmul.mubr.msk.f32.gmra.mrb[10].mxu1 %vm432_vm0, %v637_v32  ;;  %v4133_v32 = vpop.eup %4132  ;;  %v1416_v43 = vmul.f32 %v1400_v28, %v4673_v41  ;;  %v1402_v44 = vadd.f32 0.5, %v1386_v30 }
  0x33   : > { %3670 = vmatprep.mubr.msk.f32.mxu1 %vm432_vm0, %v638_v34  ;;  %v1415_v34 = vmul.f32 %v1399_v23, %v1335_v40  ;;  %v1388_v46 = vmul.f32 0.5, %v4133_v32 }
  0x34   : > { %3639 = vmatmul.mubr.msk.f32.gmra.mrb[12].mxu0 %vm432_vm0, %v4633_v33  ;;  %v1418_v61 = vmul.f32 %v1402_v44, %v4680_v45 }
  0x35   : > { %3641 = vmatprep.mubr.msk.f32.mxu0 %vm432_vm0, %v4638_v35  ;;  %v1431_v59 = vpack.c.bf16 %v1416_v43, %v1415_v34  ;;  %v1404_v63 = vadd.f32 0.5, %v1388_v46 }
  0x36   : > { %3671 = vmatmul.mubr.msk.f32.gmra.mrb[12].mxu1 %vm432_vm0, %v639_v36  ;;  %v1401_v36 = vadd.f32 0.5, %v1385_v25 }
  0x37   : > { %3673 = vmatprep.mubr.msk.f32.mxu1 %vm432_vm0, %v640_v38  ;;  %v1387_v38 = vmul.f32 0.5, %v4131_v27  ;;  %1447 = vrot.lane.b32.xlu0 %v1431_v59, %s4395_s16 }
  0x38   : > { %3642 = vmatmul.mubr.msk.f32.gmra.mrb[14].mxu0 %vm432_vm0, %v4649_v37  ;;  %v1417_v51 = vmul.f32 %v1401_v36, %v4676_v42  ;;  %v1420_v42 = vmul.f32 %v1404_v63, %v4687_v48 }
  0x39   : > { %v1403_v53 = vadd.f32 0.5, %v1387_v38 }
  0x3a   : > { %3674 = vmatmul.mubr.msk.f32.gmra.mrb[14].mxu1 %vm432_vm0, %v641_v39  ;;  %v4135_v39 = vpop.eup %4134  ;;  %v1432_v41 = vpack.c.bf16 %v1418_v61, %v1417_v51 }
  0x3b   : > { %v4137_v49 = vpop.eup %4136  ;;  %v1389_v55 = vmul.f32 0.5, %v4135_v39  ;;  %v1419_v3 = vmul.f32 %v1403_v53, %v4684_v47 }
  0x3c   : > { %v4139_v57 = vpop.eup %4138  ;;  %v1390_v1 = vmul.f32 0.5, %v4137_v49  ;;  %1449 = vrot.lane.b32.xlu0 %v1432_v41, %s4395_s16 }
  0x3d   : > { %v4141_v40 = vpop.eup %4140  ;;  %v1405_v5 = vadd.f32 0.5, %v1389_v55  ;;  %v1393_v6 = vmul.f32 0.5, %v4139_v57  ;;  %v1433_v23 = vpack.c.bf16 %v1420_v42, %v1419_v3 }
  0x3e   : > { %v4143_v10 = vpop.eup %4142  ;;  %v1406_v11 = vadd.f32 0.5, %v1390_v1  ;;  %v1394_v13 = vmul.f32 0.5, %v4141_v40 }
  0x3f   : > { %v4145_v15 = vpop.eup %4144  ;;  %v1421_v16 = vmul.f32 %v1405_v5, %v4691_v50  ;;  %v1409_v45 = vadd.f32 0.5, %v1393_v6  ;;  %v1391_v18 = vmul.f32 0.5, %v4143_v10  ;;  %1451 = vrot.lane.b32.xlu1 %v1433_v23, %s4395_s16 }
  0x40   : > { %v4147_v21 = vpop.eup %4146  ;;  %v1422_v47 = vmul.f32 %v1406_v11, %v4695_v52  ;;  %v1410_v25 = vadd.f32 0.5, %v1394_v13  ;;  %v1392_v27 = vmul.f32 0.5, %v4145_v15 }
  0x41   : > { %v4149_v28 = vpop.eup %4148  ;;  %v1425_v30 = vmul.f32 %v1409_v45, %v4699_v54  ;;  %v1407_v32 = vadd.f32 0.5, %v1391_v18  ;;  %v1397_v34 = vmul.f32 0.5, %v4147_v21 }
  0x42   : > { %v4151_v36 = vpop.eup %4150  ;;  %v1434_v48 = vpack.c.bf16 %v1422_v47, %v1421_v16  ;;  %v1426_v50 = vmul.f32 %v1410_v25, %v4703_v56  ;;  %v1408_v38 = vadd.f32 0.5, %v1392_v27  ;;  %v1398_v39 = vmul.f32 0.5, %v4149_v28 }
  0x43   : > { %v4153_v43 = vpop.eup %4152  ;;  %v1423_v52 = vmul.f32 %v1407_v32, %v4707_v58  ;;  %v1413_v44 = vadd.f32 0.5, %v1397_v34  ;;  %v1395_v46 = vmul.f32 0.5, %v4151_v36 }
  0x44   : > { %v1424_v49 = vmul.f32 %v1408_v38, %v4711_v60  ;;  %v1414_v54 = vadd.f32 0.5, %v1398_v39  ;;  %v1396_v51 = vmul.f32 0.5, %v4153_v43  ;;  %v1436_v53 = vpack.c.bf16 %v1426_v50, %v1425_v30  ;;  %1453 = vrot.lane.b32.xlu1 %v1434_v48, %s4395_s16 }
  0x45   : > { %v1411_v55 = vadd.f32 0.5, %v1395_v46  ;;  %v1429_v59 = vmul.f32 %v1413_v44, %v4715_v62 }
  0x46   : > { %v1435_v57 = vpack.c.bf16 %v1424_v49, %v1423_v52  ;;  %v1430_v56 = vmul.f32 %v1414_v54, %v4719_v0  ;;  %v1412_v61 = vadd.f32 0.5, %v1396_v51 }
  0x47   : > { %v1427_v63 = vmul.f32 %v1411_v55, %v4723_v2 }
  0x48   : > { %1455 = vrot.lane.b32.xlu0 %v1435_v57, %s4395_s16  ;;  %v1428_v58 = vmul.f32 %v1412_v61, %v4727_v4  ;;  %1457 = vrot.lane.b32.xlu1 %v1436_v53, %s4395_s16  ;;  %v1438_v60 = vpack.c.bf16 %v1430_v56, %v1429_v59 }
  0x4a   : > { %v1437_v1 = vpack.c.bf16 %v1428_v58, %v1427_v63 }
  0x4c   : > { %1459 = vrot.lane.b32.xlu0 %v1437_v1, %s4395_s16  ;;  %1461 = vrot.lane.b32.xlu1 %v1438_v60, %s4395_s16  ;;  %s3415_s16 = sshll.u32 %s4480_s21, 11 }
  0x4d   : > { %s5652_s12 = scalar_lea.hbm %s5711_s11, %s3415_s16 }
  0xef   : > { %v3622_v40 = vpop.f32.mrb[0].mxu0 }
  0xf0   : > { %v836_v62 = vmul.f32 %v3622_v40, %v3622_v40  ;;  %v547_v5 = vpop.f32.mrb[1].mxu0  ;;  %v1035_v51 = vsub.f32 0.0, %v3622_v40 }
  0xf1   : > { %v3654_v3 = vpop.f32.mrb[0].mxu1  ;;  %v835_v6 = vmul.f32 %v547_v5, %v547_v5  ;;  %v1034_v56 = vsub.f32 0.0, %v547_v5 }
  0xf2   : > { %v756_v0 = vpop.f32.mrb[1].mxu1  ;;  %v852_v10 = vsub.f32 %v3654_v3, %v836_v62 }
  0xf3   : > { %v851_v2 = vsub.f32 %v756_v0, %v835_v6  ;;  %v4755_v41 = vpop.f32.mrb[2].mxu0 }
  0xf4   : > { %v868_v4 = vadd.f32 1e-05, %v852_v10  ;;  %v838_v11 = vmul.f32 %v4755_v41, %v4755_v41  ;;  %v4759_v13 = vpop.f32.mrb[3].mxu0  ;;  %v1037_v5 = vsub.f32 0.0, %v4755_v41 }
  0xf5   : > { %v3657_v42 = vpop.f32.mrb[2].mxu1  ;;  %v867_v16 = vadd.f32 1e-05, %v851_v2  ;;  %v837_v45 = vmul.f32 %v4759_v13, %v4759_v13 }
  0xf6   : > { %v766_v15 = vpop.f32.mrb[3].mxu1  ;;  %4154 = vrsqrt.f32 %v868_v4  ;;  %v854_v18 = vsub.f32 %v3657_v42, %v838_v11 }
  0xf7   : > { %4156 = vrsqrt.f32 %v867_v16  ;;  %v853_v21 = vsub.f32 %v766_v15, %v837_v45  ;;  %v4763_v23 = vpop.f32.mrb[4].mxu0  ;;  %v1036_v15 = vsub.f32 0.0, %v4759_v13 }
  0xf8   : > { %v870_v25 = vadd.f32 1e-05, %v854_v18  ;;  %v840_v27 = vmul.f32 %v4763_v23, %v4763_v23  ;;  %v4767_v28 = vpop.f32.mrb[5].mxu0 }
  0xf9   : > { %v3660_v47 = vpop.f32.mrb[4].mxu1  ;;  %v869_v32 = vadd.f32 1e-05, %v853_v21  ;;  %v839_v34 = vmul.f32 %v4767_v28, %v4767_v28 }
  0xfa   : > { %v776_v30 = vpop.f32.mrb[5].mxu1  ;;  %4158 = vrsqrt.f32 %v870_v25  ;;  %v856_v36 = vsub.f32 %v3660_v47, %v840_v27 }
  0xfb   : > { %4160 = vrsqrt.f32 %v869_v32  ;;  %v855_v48 = vsub.f32 %v776_v30, %v839_v34  ;;  %v4771_v50 = vpop.f32.mrb[6].mxu0 }
  0xfc   : > { %v872_v39 = vadd.f32 1e-05, %v856_v36  ;;  %v842_v43 = vmul.f32 %v4771_v50, %v4771_v50  ;;  %v4775_v52 = vpop.f32.mrb[7].mxu0  ;;  %v1039_v36 = vsub.f32 0.0, %v4763_v23 }
  0xfd   : > { %v3663_v38 = vpop.f32.mrb[6].mxu1  ;;  %v871_v46 = vadd.f32 1e-05, %v855_v48  ;;  %v841_v49 = vmul.f32 %v4775_v52, %v4775_v52 }
  0xfe   : > { %v786_v44 = vpop.f32.mrb[7].mxu1  ;;  %4162 = vrsqrt.f32 %v872_v39  ;;  %v858_v54 = vsub.f32 %v3663_v38, %v842_v43 }
  0xff   : > { %4164 = vrsqrt.f32 %v871_v46  ;;  %v857_v53 = vsub.f32 %v786_v44, %v841_v49  ;;  %v4779_v55 = vpop.f32.mrb[8].mxu0  ;;  %v1038_v46 = vsub.f32 0.0, %v4767_v28 }
 0x100   : > { %v4155_v59 = vpop.eup %4154  ;;  %v874_v61 = vadd.f32 1e-05, %v858_v54  ;;  %v844_v63 = vmul.f32 %v4779_v55, %v4779_v55  ;;  %v4783_v58 = vpop.f32.mrb[9].mxu0 }
 0x101   : > { %v3666_v57 = vpop.f32.mrb[8].mxu1  ;;  %v4157_v1 = vpop.eup %4156  ;;  %v873_v3 = vadd.f32 1e-05, %v857_v53  ;;  %v843_v62 = vmul.f32 %v4783_v58, %v4783_v58  ;;  %v1051_v40 = vmul.f32 %v4155_v59, %v1035_v51 }
 0x102   : > { %v796_v60 = vpop.f32.mrb[9].mxu1  ;;  %4166 = vrsqrt.f32 %v874_v61  ;;  %v860_v0 = vsub.f32 %v3666_v57, %v844_v63  ;;  %v899_v6 = vpack.c.bf16 %v4155_v59, %v4157_v1  ;;  %v1050_v10 = vmul.f32 %v4157_v1, %v1034_v56 }
 0x103   : > { %4168 = vrsqrt.f32 %v873_v3  ;;  %v859_v2 = vsub.f32 %v796_v60, %v843_v62  ;;  %v4788_v42 = vpop.f32.mrb[10].mxu0  ;;  %v1041_v60 = vsub.f32 0.0, %v4771_v50 }
 0x104   : > { %v4159_v11 = vpop.eup %4158  ;;  %v876_v16 = vadd.f32 1e-05, %v860_v0  ;;  %v846_v45 = vmul.f32 %v4788_v42, %v4788_v42  ;;  %v4793_v18 = vpop.f32.mrb[11].mxu0  ;;  %3678 = vmatprep.mubr.msk.bf16.mxu0 %vm908_vm2, %v899_v6  ;;  %v1066_v47 = vpack.c.bf16 %v1051_v40, %v1050_v10  ;;  %v1040_v0 = vsub.f32 0.0, %v4775_v52 }
 0x105   : > { %v3669_v4 = vpop.f32.mrb[10].mxu1  ;;  %v4161_v25 = vpop.eup %4160  ;;  %v1053_v41 = vmul.f32 %v4159_v11, %v1037_v5  ;;  %v875_v27 = vadd.f32 1e-05, %v859_v2  ;;  %v845_v30 = vmul.f32 %v4793_v18, %v4793_v18 }
 0x106   : > { %v806_v21 = vpop.f32.mrb[11].mxu1  ;;  %v900_v32 = vpack.c.bf16 %v4159_v11, %v4161_v25  ;;  %v1052_v34 = vmul.f32 %v4161_v25, %v1036_v15  ;;  %4170 = vrsqrt.f32 %v876_v16  ;;  %v862_v13 = vsub.f32 %v3669_v4, %v846_v45  ;;  %3696 = vmatprep.mubr.msk.bf16.mxu1 %vm908_vm2, %v1066_v47 }
 0x107   : > { %4172 = vrsqrt.f32 %v875_v27  ;;  %v861_v48 = vsub.f32 %v806_v21, %v845_v30  ;;  %v4800_v38 = vpop.f32.mrb[12].mxu0  ;;  %v1043_v25 = vsub.f32 0.0, %v4779_v55  ;;  %v1042_v27 = vsub.f32 0.0, %v4783_v58 }
 0x108   : > { %v4163_v43 = vpop.eup %4162  ;;  %v1067_v44 = vpack.c.bf16 %v1053_v41, %v1052_v34  ;;  %v878_v49 = vadd.f32 1e-05, %v862_v13  ;;  %v848_v54 = vmul.f32 %v4800_v38, %v4800_v38  ;;  %v4805_v51 = vpop.f32.mrb[13].mxu0  ;;  %3679 = vmatmul.mubr.msk.bf16.vlgmr.msra.gmra.mrb[16].mxu0 %vm908_vm2, %v900_v32 }
 0x109   : > { %v3672_v39 = vpop.f32.mrb[12].mxu1  ;;  %v4165_v57 = vpop.eup %4164  ;;  %v877_v23 = vadd.f32 1e-05, %v861_v48  ;;  %v847_v59 = vmul.f32 %v4805_v51, %v4805_v51  ;;  %v1055_v56 = vmul.f32 %v4163_v43, %v1039_v36 }
 0x10a   : > { %v816_v53 = vpop.f32.mrb[13].mxu1  ;;  %4174 = vrsqrt.f32 %v878_v49  ;;  %v864_v61 = vsub.f32 %v3672_v39, %v848_v54  ;;  %3697 = vmatmul.mubr.msk.bf16.vlgmr.msra.gmra.mrb[16].mxu1 %vm908_vm2, %v1067_v44  ;;  %v1054_v28 = vmul.f32 %v4165_v57, %v1038_v46  ;;  %v901_v63 = vpack.c.bf16 %v4163_v43, %v4165_v57 }
 0x10b   : > { %4176 = vrsqrt.f32 %v877_v23  ;;  %v863_v1 = vsub.f32 %v816_v53, %v847_v59  ;;  %v3643_v3 = vpop.f32.mrb[14].mxu0  ;;  %v1045_v43 = vsub.f32 0.0, %v4788_v42  ;;  %v1044_v44 = vsub.f32 0.0, %v4793_v18 }
 0x10c   : > { %v4167_v40 = vpop.eup %4166  ;;  %v880_v6 = vadd.f32 1e-05, %v864_v61  ;;  %v850_v10 = vmul.f32 %v3643_v3, %v3643_v3  ;;  %v617_v5 = vpop.f32.mrb[15].mxu0  ;;  %v1068_v4 = vpack.c.bf16 %v1055_v56, %v1054_v28  ;;  %3682 = vmatprep.mubr.msk.bf16.mxu0 %vm908_vm2, %v901_v63  ;;  %v1047_v57 = vsub.f32 0.0, %v4800_v38 }
 0x10d   : > { %v3675_v62 = vpop.f32.mrb[14].mxu1  ;;  %v4169_v11 = vpop.eup %4168  ;;  %v879_v15 = vadd.f32 1e-05, %v863_v1  ;;  %v849_v16 = vmul.f32 %v617_v5, %v617_v5  ;;  %v1057_v45 = vmul.f32 %v4167_v40, %v1041_v60  ;;  %v1046_v59 = vsub.f32 0.0, %v4805_v51 }
 0x10e   : > { %v826_v2 = vpop.f32.mrb[15].mxu1  ;;  %4178 = vrsqrt.f32 %v880_v6  ;;  %v866_v50 = vsub.f32 %v3675_v62, %v850_v10  ;;  %3700 = vmatprep.mubr.msk.bf16.mxu1 %vm908_vm2, %v1068_v4  ;;  %v902_v21 = vpack.c.bf16 %v4167_v40, %v4169_v11  ;;  %v1056_v47 = vmul.f32 %v4169_v11, %v1040_v0  ;;  %v4099_v10 = vld [vmem:[%s5707_s7 + $0x8] sm:$0xff]   ;;  %v4102_v4 = vld [vmem:[%s5707_s7 + $0x20] sm:$0xff]  }
 0x10f   : > { %4180 = vrsqrt.f32 %v879_v15  ;;  %v865_v52 = vsub.f32 %v826_v2, %v849_v16  ;;  %v1049_v63 = vsub.f32 0.0, %v3643_v3  ;;  %v1048_v1 = vsub.f32 0.0, %v617_v5  ;;  %v4098_v3 = vld [vmem:[%s5707_s7] sm:$0xff]   ;;  %v4100_v5 = vld [vmem:[%s5707_s7 + $0x10] sm:$0xff]   ;;  %v4101_v2 = vld [vmem:[%s5707_s7 + $0x18] sm:$0xff]  }
 0x110   : > { %v4171_v41 = vpop.eup %4170  ;;  %v882_v30 = vadd.f32 1e-05, %v866_v50  ;;  %3683 = vmatmul.mubr.msk.bf16.gmra.mrb[20].mxu0 %vm908_vm2, %v902_v21  ;;  %v1069_v32 = vpack.c.bf16 %v1057_v45, %v1056_v47  ;;  %3712 = vmatprep.subr.bf16.mxu0 %v4098_v3  ;;  %v4103_v11 = vld [vmem:[%s5707_s7 + $0x28] sm:$0xff]   ;;  %v1653_v15 = vld [vmem:[%s5705_s5] sm:$0xff]  ;;  %v1655_v45 = vld [vmem:[%s5705_s5 + $0x10] sm:$0xff] }
 0x111   : > { %v4173_v34 = vpop.eup %4172  ;;  %v881_v13 = vadd.f32 1e-05, %v865_v52  ;;  %v1059_v36 = vmul.f32 %v4171_v41, %v1043_v25  ;;  %3713 = vmatpush3.bf16.msra.mxu0 %v4098_v3  ;;  %v1654_v16 = vld [vmem:[%s5705_s5 + $0x8] sm:$0xff]  ;;  %v1656_v21 = vld [vmem:[%s5705_s5 + $0x18] sm:$0xff]  ;;  %v1657_v25 = vld [vmem:[%s5705_s5 + $0x20] sm:$0xff] }
 0x112   : > { %4182 = vrsqrt.f32 %v882_v30  ;;  %3701 = vmatmul.mubr.msk.bf16.gmra.mrb[20].mxu1 %vm908_vm2, %v1069_v32  ;;  %v1058_v48 = vmul.f32 %v4173_v34, %v1042_v27  ;;  %v903_v39 = vpack.c.bf16 %v4171_v41, %v4173_v34  ;;  %3714 = vmatprep.subr.bf16.mxu0 %v4099_v10  ;;  %v4858_v50 = vpack.c.bf16 %v1654_v16, %v1653_v15  ;;  %v1658_v52 = vld [vmem:[%s5705_s5 + $0x28] sm:$0xff]  ;;  %v1659_v27 = vld [vmem:[%s5705_s5 + $0x30] sm:$0xff]  ;;  %v1660_v30 = vld [vmem:[%s5705_s5 + $0x38] sm:$0xff] }
 0x113   : > { %4184 = vrsqrt.f32 %v881_v13  ;;  %v4863_v47 = vpack.c.bf16 %v1656_v21, %v1655_v45  ;;  %v4875_v41 = vpack.c.bf16 %v1658_v52, %v1657_v25  ;;  %v4885_v32 = vpack.c.bf16 %v1660_v30, %v1659_v27  ;;  %v1661_v34 = vld [vmem:[%s5705_s5 + $0x40] sm:$0xff]  ;;  %v1662_v13 = vld [vmem:[%s5705_s5 + $0x48] sm:$0xff] }
 0x114   : > { %v4175_v55 = vpop.eup %4174  ;;  %v1070_v46 = vpack.c.bf16 %v1059_v36, %v1058_v48  ;;  %3686 = vmatprep.mubr.msk.bf16.mxu0 %vm908_vm2, %v903_v39  ;;  %3989 = vmatprep.subr.bf16.mxu1 %v4858_v50  ;;  %v4895_v36 = vpack.c.bf16 %v1662_v13, %v1661_v34  ;;  %v1663_v48 = vld [vmem:[%s5705_s5 + $0x50] sm:$0xff]  ;;  %v1664_v39 = vld [vmem:[%s5705_s5 + $0x58] sm:$0xff] }
 0x115   : > { %v4177_v58 = vpop.eup %4176  ;;  %v1061_v49 = vmul.f32 %v4175_v55, %v1045_v43  ;;  %3715 = vmatpush3.bf16.msra.mxu0 %v4099_v10  ;;  %3991 = vmatpush3.bf16.msra.mxu1 %v4858_v50  ;;  %v4905_v43 = vpack.c.bf16 %v1664_v39, %v1663_v48 }
 0x116   : > { %3704 = vmatprep.mubr.msk.bf16.mxu1 %vm908_vm2, %v1070_v46  ;;  %v904_v54 = vpack.c.bf16 %v4175_v55, %v4177_v58  ;;  %v1060_v53 = vmul.f32 %v4177_v58, %v1044_v44  ;;  %3716 = vmatprep.subr.bf16.mxu0 %v4100_v5  ;;  %v1665_v55 = vld [vmem:[%s5705_s5 + $0x60] sm:$0xff]  ;;  %v1666_v44 = vld [vmem:[%s5705_s5 + $0x68] sm:$0xff]  ;;  %v1227_v58 = vlaneseq }
 0x117   : > { %3993 = vmatprep.subr.bf16.mxu1 %v4863_v47  ;;  %v4915_v46 = vpack.c.bf16 %v1666_v44, %v1665_v55 }
 0x118   : > { %v4179_v23 = vpop.eup %4178  ;;  %3687 = vmatmul.mubr.msk.bf16.gmra.mrb[24].mxu0 %vm908_vm2, %v904_v54  ;;  %v1071_v42 = vpack.c.bf16 %v1061_v49, %v1060_v53  ;;  %v4920_v49 = vshrl.u32 %v1227_v58, 7  ;;  %v4926_v53 = vld [vmem:[%s5702_s2] sm:$0xff] }
 0x119   : > { %v4181_v56 = vpop.eup %4180  ;;  %v1063_v61 = vmul.f32 %v4179_v23, %v1047_v57  ;;  %3717 = vmatpush3.bf16.msra.mxu0 %v4100_v5  ;;  %3995 = vmatpush3.bf16.msra.mxu1 %v4863_v47 }
 0x11a   : > { %3705 = vmatmul.mubr.msk.bf16.gmra.mrb[24].mxu1 %vm908_vm2, %v1071_v42  ;;  %v1062_v18 = vmul.f32 %v4181_v56, %v1046_v59  ;;  %v905_v28 = vpack.c.bf16 %v4179_v23, %v4181_v56  ;;  %3718 = vmatprep.subr.bf16.mxu0 %v4101_v2  ;;  %v1229_v54 = vsub.s32 0, %v4920_v49 }
 0x11b   : > { %3997 = vmatprep.subr.bf16.mxu1 %v4875_v41 }
 0x11c   : > { %v4183_v60 = vpop.eup %4182  ;;  %v1072_v62 = vpack.c.bf16 %v1063_v61, %v1062_v18  ;;  %3690 = vmatprep.mubr.msk.bf16.mxu0 %vm908_vm2, %v905_v28  ;;  %v4930_v42 = vrot.slane %v4926_v53, %v1229_v54 }
 0x11d   : > { %v4185_v40 = vpop.eup %4184  ;;  %v1065_v38 = vmul.f32 %v4183_v60, %v1049_v63  ;;  %3719 = vmatpush3.bf16.msra.mxu0 %v4101_v2  ;;  %3999 = vmatpush3.bf16.msra.mxu1 %v4875_v41 }
 0x11e   : > { %3708 = vmatprep.mubr.msk.bf16.mxu1 %vm908_vm2, %v1072_v62  ;;  %v906_v51 = vpack.c.bf16 %v4183_v60, %v4185_v40  ;;  %v1064_v0 = vmul.f32 %v4185_v40, %v1048_v1  ;;  %3720 = vmatprep.subr.bf16.mxu0 %v4102_v4 }
 0x11f   : > { %4001 = vmatprep.subr.bf16.mxu1 %v4885_v32 }
 0x120   : > { %3691 = vmatmul.mubr.msk.bf16.gmra.mrb[28].mxu0 %vm908_vm2, %v906_v51  ;;  %v1073_v6 = vpack.c.bf16 %v1065_v38, %v1064_v0 }
 0x121   : > { %3721 = vmatpush3.bf16.msra.mxu0 %v4102_v4  ;;  %4003 = vmatpush3.bf16.msra.mxu1 %v4885_v32 }
 0x122   : > { %3709 = vmatmul.mubr.msk.bf16.gmra.mrb[28].mxu1 %vm908_vm2, %v1073_v6  ;;  %3722 = vmatprep.subr.bf16.mxu0 %v4103_v11 }
 0x123   : > { %4005 = vmatprep.subr.bf16.mxu1 %v4895_v36 }
 0x125   : > { %3723 = vmatpush3.bf16.msra.mxu0 %v4103_v11  ;;  %4007 = vmatpush3.bf16.msra.mxu1 %v4895_v36 }
 0x126   : > { %4021 = vmatprep.subr.bf16.mxu0 %v4858_v50  ;;  %4009 = vmatprep.subr.bf16.mxu1 %v4905_v43 }
 0x129   : > { %4011 = vmatpush3.bf16.msra.mxu1 %v4905_v43 }
 0x12a   : > { %4013 = vmatprep.subr.bf16.mxu1 %v4915_v46 }
 0x12d   : > { %4015 = vmatpush3.bf16.msra.mxu1 %v4915_v46 }
 0x1db   : > { %v3680_v57 = vpop.f32.mrb[16].mxu0 }
 0x1dc   : > { %v1197_v23 = vmul.f32 %v3680_v57, %v4540_v9  ;;  %v971_v59 = vpop.f32.mrb[17].mxu0 }
 0x1dd   : > { %v1195_v56 = vmul.f32 %v971_v59, %v4534_v7  ;;  %v3681_v61 = vpop.f32.mrb[18].mxu0  ;;  %v3698_v18 = vpop.f32.mrb[16].mxu1 }
 0x1de   : > { %v1198_v28 = vmul.f32 %v3681_v61, %v4547_v12  ;;  %v1213_v63 = vadd.f32 %v3698_v18, %v1197_v23  ;;  %v974_v60 = vpop.f32.mrb[19].mxu0  ;;  %v1132_v1 = vpop.f32.mrb[17].mxu1 }
 0x1df   : > { %v1196_v62 = vmul.f32 %v974_v60, %v4537_v8  ;;  %v1211_v40 = vadd.f32 %v1195_v56, %v1132_v1  ;;  %v3699_v38 = vpop.f32.mrb[18].mxu1 }
 0x1e0   : > { %v4936_v51 = vadd.f32 %v4930_v42, %v1213_v63  ;;  %v1214_v9 = vadd.f32 %v3699_v38, %v1198_v28  ;;  %v1135_v0 = vpop.f32.mrb[19].mxu1 }
 0x1e1   : > { %v4939_v6 = vadd.f32 %v4930_v42, %v1211_v40  ;;  %v1212_v7 = vadd.f32 %v1196_v62, %v1135_v0 }
 0x1e2   : > { %v1249_v3 = vmul.f32 0.5, %v4936_v51  ;;  %v4943_v12 = vadd.f32 %v4930_v42, %v1214_v9 }
 0x1e3   : > { %v1247_v10 = vmul.f32 0.5, %v4939_v6  ;;  %v4947_v8 = vadd.f32 %v4930_v42, %v1212_v7  ;;  %v3684_v5 = vpop.f32.mrb[20].mxu0 }
 0x1e4   : > { %4186 = vtanh.f32 %v1249_v3  ;;  %v1250_v2 = vmul.f32 0.5, %v4943_v12  ;;  %v1201_v4 = vmul.f32 %v3684_v5, %v4573_v19  ;;  %v987_v11 = vpop.f32.mrb[21].mxu0 }
 0x1e5   : > { %4188 = vtanh.f32 %v1247_v10  ;;  %v1248_v15 = vmul.f32 0.5, %v4947_v8  ;;  %v1199_v16 = vmul.f32 %v987_v11, %v4554_v14  ;;  %v3685_v45 = vpop.f32.mrb[22].mxu0  ;;  %v3702_v21 = vpop.f32.mrb[20].mxu1 }
 0x1e6   : > { %4190 = vtanh.f32 %v1250_v2  ;;  %v1202_v25 = vmul.f32 %v3685_v45, %v4577_v20  ;;  %v1217_v52 = vadd.f32 %v3702_v21, %v1201_v4  ;;  %v990_v27 = vpop.f32.mrb[23].mxu0  ;;  %v1148_v30 = vpop.f32.mrb[21].mxu1 }
 0x1e7   : > { %4192 = vtanh.f32 %v1248_v15  ;;  %v1200_v34 = vmul.f32 %v990_v27, %v4565_v17  ;;  %v1215_v13 = vadd.f32 %v1199_v16, %v1148_v30  ;;  %v3703_v48 = vpop.f32.mrb[22].mxu1 }
 0x1e8   : > { %v4956_v19 = vadd.f32 %v4930_v42, %v1217_v52  ;;  %v1218_v39 = vadd.f32 %v3703_v48, %v1202_v25  ;;  %v1151_v55 = vpop.f32.mrb[23].mxu1 }
 0x1e9   : > { %v4959_v14 = vadd.f32 %v4930_v42, %v1215_v13  ;;  %v1216_v44 = vadd.f32 %v1200_v34, %v1151_v55 }
 0x1ea   : > { %v1253_v58 = vmul.f32 0.5, %v4956_v19  ;;  %v4963_v20 = vadd.f32 %v4930_v42, %v1218_v39  ;;  %v1448_v39 = vpop.permute.xlu0 %1447 }
 0x1eb   : > { %v1251_v54 = vmul.f32 0.5, %v4959_v14  ;;  %v4967_v17 = vadd.f32 %v4930_v42, %v1216_v44  ;;  %v3688_v57 = vpop.f32.mrb[24].mxu0 }
 0x1ec   : > { %4194 = vtanh.f32 %v1253_v58  ;;  %v1254_v23 = vmul.f32 0.5, %v4963_v20  ;;  %v1205_v59 = vmul.f32 %v3688_v57, %v4601_v26  ;;  %v1003_v56 = vpop.f32.mrb[25].mxu0 }
 0x1ed   : > { %4196 = vtanh.f32 %v1251_v54  ;;  %v1252_v61 = vmul.f32 0.5, %v4967_v17  ;;  %v1203_v18 = vmul.f32 %v1003_v56, %v4585_v22  ;;  %v3689_v28 = vpop.f32.mrb[26].mxu0  ;;  %v3706_v63 = vpop.f32.mrb[24].mxu1 }
 0x1ee   : > { %v4187_v60 = vpop.eup %4186  ;;  %4198 = vtanh.f32 %v1254_v23  ;;  %v1206_v1 = vmul.f32 %v3689_v28, %v4617_v29  ;;  %v1221_v62 = vadd.f32 %v3706_v63, %v1205_v59  ;;  %v1006_v40 = vpop.f32.mrb[27].mxu0 }
 0x1ef   : > { %v1164_v38 = vpop.f32.mrb[25].mxu1  ;;  %v4189_v9 = vpop.eup %4188  ;;  %v1281_v0 = vmul.f32 0.5, %v4187_v60  ;;  %4200 = vtanh.f32 %v1252_v61  ;;  %v1204_v26 = vmul.f32 %v1006_v40, %v4593_v24 }
 0x1f0   : > { %v1219_v7 = vadd.f32 %v1203_v18, %v1164_v38  ;;  %v3707_v3 = vpop.f32.mrb[26].mxu1  ;;  %v4191_v10 = vpop.eup %4190  ;;  %v1279_v5 = vmul.f32 0.5, %v4189_v9  ;;  %v4976_v22 = vadd.f32 %v4930_v42, %v1221_v62 }
 0x1f1   : > { %v1222_v2 = vadd.f32 %v3707_v3, %v1206_v1  ;;  %v1167_v4 = vpop.f32.mrb[27].mxu1  ;;  %v4193_v11 = vpop.eup %4192  ;;  %v1297_v29 = vadd.f32 0.5, %v1281_v0  ;;  %v1282_v15 = vmul.f32 0.5, %v4191_v10 }
 0x1f2   : > { %v4979_v16 = vadd.f32 %v4930_v42, %v1219_v7  ;;  %v1220_v45 = vadd.f32 %v1204_v26, %v1167_v4  ;;  %v1295_v21 = vadd.f32 0.5, %v1279_v5  ;;  %v1280_v25 = vmul.f32 0.5, %v4193_v11  ;;  %v1450_v5 = vpop.permute.xlu0 %1449 }
 0x1f3   : > { %v1257_v24 = vmul.f32 0.5, %v4976_v22  ;;  %v4983_v52 = vadd.f32 %v4930_v42, %v1222_v2  ;;  %v1313_v27 = vmul.f32 %v1297_v29, %v4936_v51  ;;  %v1298_v30 = vadd.f32 0.5, %v1282_v15  ;;  %v3692_v48 = vpop.f32.mrb[28].mxu0 }
 0x1f4   : > { %v1255_v34 = vmul.f32 0.5, %v4979_v16  ;;  %v4988_v13 = vadd.f32 %v4930_v42, %v1220_v45  ;;  %v1311_v55 = vmul.f32 %v1295_v21, %v4939_v6  ;;  %v1296_v44 = vadd.f32 0.5, %v1280_v25  ;;  %v1019_v54 = vpop.f32.mrb[29].mxu0  ;;  %v1452_v25 = vpop.permute.xlu1 %1451 }
 0x1f5   : > { %4202 = vtanh.f32 %v1257_v24  ;;  %v1258_v58 = vmul.f32 0.5, %v4983_v52  ;;  %v1314_v57 = vmul.f32 %v1298_v30, %v4943_v12  ;;  %v1209_v23 = vmul.f32 %v3692_v48, %v4638_v35  ;;  %v3693_v59 = vpop.f32.mrb[30].mxu0  ;;  %v3710_v56 = vpop.f32.mrb[28].mxu1 }
 0x1f6   : > { %4204 = vtanh.f32 %v1255_v34  ;;  %v1256_v51 = vmul.f32 0.5, %v4988_v13  ;;  %v4195_v61 = vpop.eup %4194  ;;  %v1312_v18 = vmul.f32 %v1296_v44, %v4947_v8  ;;  %v1207_v6 = vmul.f32 %v1019_v54, %v4622_v31  ;;  %v1022_v63 = vpop.f32.mrb[31].mxu0 }
 0x1f7   : > { %4206 = vtanh.f32 %v1258_v58  ;;  %v1210_v28 = vmul.f32 %v3693_v59, %v4649_v37  ;;  %v1180_v60 = vpop.f32.mrb[29].mxu1  ;;  %v4197_v1 = vpop.eup %4196  ;;  %v1285_v62 = vmul.f32 0.5, %v4195_v61  ;;  %v1225_v12 = vadd.f32 %v3710_v56, %v1209_v23 }
 0x1f8   : > { %4208 = vtanh.f32 %v1256_v51  ;;  %v1208_v40 = vmul.f32 %v1022_v63, %v4633_v33  ;;  %v3711_v38 = vpop.f32.mrb[30].mxu1  ;;  %v4199_v35 = vpop.eup %4198  ;;  %v1283_v9 = vmul.f32 0.5, %v4197_v1  ;;  %v1327_v0 = vpack.c.bf16 %v1312_v18, %v1311_v55 }
 0x1f9   : > { %v1223_v26 = vadd.f32 %v1207_v6, %v1180_v60  ;;  %v1226_v7 = vadd.f32 %v3711_v38, %v1210_v28  ;;  %v1183_v8 = vpop.f32.mrb[31].mxu1  ;;  %v4201_v3 = vpop.eup %4200  ;;  %v1301_v10 = vadd.f32 0.5, %v1285_v62  ;;  %v1286_v31 = vmul.f32 0.5, %v4199_v35 }
 0x1fa   : > { %v5000_v37 = vadd.f32 %v4930_v42, %v1225_v12  ;;  %v1328_v2 = vpack.c.bf16 %v1314_v57, %v1313_v27  ;;  %v1299_v4 = vadd.f32 0.5, %v1283_v9  ;;  %v1284_v11 = vmul.f32 0.5, %v4201_v3  ;;  %v1454_v28 = vpop.permute.xlu1 %1453  ;;  %v1456_v9 = vpop.permute.xlu0 %1455 }
 0x1fb   : > { %v1465_v29 = vsel %vm432_vm0, %v1327_v0, %v1448_v39  ;;  %v5004_v33 = vadd.f32 %v4930_v42, %v1223_v26  ;;  %v1302_v15 = vadd.f32 0.5, %v1286_v31  ;;  %v5008_v21 = vadd.f32 %v4930_v42, %v1226_v7 }
 0x1fc   : > { %v1261_v45 = vmul.f32 0.5, %v5000_v37  ;;  %3724 = vmatprep.mubr.msk.bf16.mxu0 %vm1539_vm3, %v1465_v29  ;;  %v1317_v24 = vmul.f32 %v1301_v10, %v4956_v19  ;;  %v1300_v30 = vadd.f32 0.5, %v1284_v11  ;;  %v1468_v34 = vsel %vm432_vm0, %v1328_v2, %v1450_v5 }
 0x1fd   : > { %v1259_v27 = vmul.f32 0.5, %v5004_v33  ;;  %v1318_v48 = vmul.f32 %v1302_v15, %v4963_v20  ;;  %v1262_v39 = vmul.f32 0.5, %v5008_v21  ;;  %v1224_v55 = vadd.f32 %v1208_v40, %v1183_v8  ;;  %3725 = vmatmul.mubr.msk.bf16.vlgmr.msra.gmra.mrb[32].mxu0 %vm1539_vm3, %v1468_v34 }
 0x1fe   : > { %4210 = vtanh.f32 %v1261_v45  ;;  %v1315_v58 = vmul.f32 %v1299_v4, %v4959_v14  ;;  %v1316_v54 = vmul.f32 %v1300_v30, %v4967_v17  ;;  %4023 = vmatpush3.bf16.msra.mxu0 %v4858_v50 }
 0x1ff   : > { %v4203_v44 = vpop.eup %4202  ;;  %4212 = vtanh.f32 %v1259_v27  ;;  %v1244_v51 = vadd.f32 %v4930_v42, %v1224_v55  ;;  %v1330_v20 = vpack.c.bf16 %v1318_v48, %v1317_v24  ;;  %4025 = vmatprep.subr.bf16.mxu0 %v4863_v47  ;;  %v1501_v27 = vsub.s32 1, %v4920_v49 }
 0x200   : > { %v4205_v19 = vpop.eup %4204  ;;  %v1289_v57 = vmul.f32 0.5, %v4203_v44  ;;  %4214 = vtanh.f32 %v1262_v39  ;;  %v1329_v56 = vpack.c.bf16 %v1316_v54, %v1315_v58 }
 0x201   : > { %v4207_v23 = vpop.eup %4206  ;;  %v1287_v59 = vmul.f32 0.5, %v4205_v19  ;;  %v1260_v14 = vmul.f32 0.5, %v1244_v51  ;;  %v1474_v1 = vsel %vm432_vm0, %v1330_v20, %v1454_v28  ;;  %v5065_v34 = vrot.slane %v4926_v53, %v1501_v27 }
 0x202   : > { %v4209_v61 = vpop.eup %4208  ;;  %v1305_v18 = vadd.f32 0.5, %v1289_v57  ;;  %v1290_v6 = vmul.f32 0.5, %v4207_v23  ;;  %v1471_v50 = vsel %vm432_vm0, %v1329_v56, %v1452_v25  ;;  %4027 = vmatpush3.bf16.msra.mxu0 %v4863_v47  ;;  %v1460_v25 = vpop.permute.xlu0 %1459 }
 0x203   : > { %v1303_v17 = vadd.f32 0.5, %v1287_v59  ;;  %v1288_v63 = vmul.f32 0.5, %v4209_v61  ;;  %4216 = vtanh.f32 %v1260_v14  ;;  %3728 = vmatprep.mubr.msk.bf16.mxu0 %vm1539_vm3, %v1471_v50  ;;  %4029 = vmatprep.subr.bf16.mxu0 %v4875_v41 }
 0x204   : > { %v1306_v60 = vadd.f32 0.5, %v1290_v6  ;;  %v1321_v62 = vmul.f32 %v1305_v18, %v4976_v22  ;;  %v1458_v22 = vpop.permute.xlu1 %1457 }
 0x205   : > { %v1304_v42 = vadd.f32 0.5, %v1288_v63  ;;  %3729 = vmatmul.mubr.msk.bf16.gmra.mrb[36].mxu0 %vm1539_vm3, %v1474_v1  ;;  %v1319_v40 = vmul.f32 %v1303_v17, %v4979_v16 }
 0x206   : > { %v1322_v12 = vmul.f32 %v1306_v60, %v4983_v52  ;;  %4031 = vmatpush3.bf16.msra.mxu0 %v4875_v41 }
 0x207   : > { %v1320_v38 = vmul.f32 %v1304_v42, %v4988_v13  ;;  %4033 = vmatprep.subr.bf16.mxu0 %v4885_v32 }
 0x208   : > { %v4211_v47 = vpop.eup %4210  ;;  %v1332_v35 = vpack.c.bf16 %v1322_v12, %v1321_v62  ;;  %v1462_v24 = vpop.permute.xlu1 %1461 }
 0x209   : > { %v4213_v0 = vpop.eup %4212  ;;  %v1293_v26 = vmul.f32 0.5, %v4211_v47  ;;  %v1331_v7 = vpack.c.bf16 %v1320_v38, %v1319_v40 }
 0x20a   : > { %v4215_v8 = vpop.eup %4214  ;;  %v1291_v52 = vmul.f32 0.5, %v4213_v0  ;;  %4035 = vmatpush3.bf16.msra.mxu0 %v4885_v32  ;;  %v1480_v16 = vsel %vm432_vm0, %v1332_v35, %v1458_v22 }
 0x20b   : > { %v1309_v3 = vadd.f32 0.5, %v1293_v26  ;;  %v1294_v10 = vmul.f32 0.5, %v4215_v8  ;;  %v1477_v31 = vsel %vm432_vm0, %v1331_v7, %v1456_v9  ;;  %4037 = vmatprep.subr.bf16.mxu0 %v4895_v36 }
 0x20c   : > { %3732 = vmatprep.mubr.msk.bf16.mxu0 %vm1539_vm3, %v1477_v31  ;;  %v1307_v2 = vadd.f32 0.5, %v1291_v52 }
 0x20d   : > { %v1310_v41 = vadd.f32 0.5, %v1294_v10  ;;  %v4217_v13 = vpop.eup %4216  ;;  %3733 = vmatmul.mubr.msk.bf16.gmra.mrb[40].mxu0 %vm1539_vm3, %v1480_v16  ;;  %v1325_v5 = vmul.f32 %v1309_v3, %v5000_v37 }
 0x20e   : > { %v1292_v11 = vmul.f32 0.5, %v4217_v13  ;;  %4039 = vmatpush3.bf16.msra.mxu0 %v4895_v36  ;;  %v1323_v15 = vmul.f32 %v1307_v2, %v5004_v33  ;;  %v1667_v33 = vld [vmem:[%s5705_s5 + $0x70] sm:$0xff] }
 0x20f   : > { %v1326_v4 = vmul.f32 %v1310_v41, %v5008_v21  ;;  %4041 = vmatprep.subr.bf16.mxu0 %v4905_v43 }
 0x210   : > { %v1308_v32 = vadd.f32 0.5, %v1292_v11 }
 0x211   : > { %v1334_v29 = vpack.c.bf16 %v1326_v4, %v1325_v5 }
 0x212   : > { %v1324_v45 = vmul.f32 %v1308_v32, %v1244_v51  ;;  %4043 = vmatpush3.bf16.msra.mxu0 %v4905_v43  ;;  %v1668_v43 = vld [vmem:[%s5705_s5 + $0x78] sm:$0xff] }
 0x213   : > { %4045 = vmatprep.subr.bf16.mxu0 %v4915_v46  ;;  %v1486_v36 = vsel %vm432_vm0, %v1334_v29, %v1462_v24  ;;  %v4016_v21 = vpack.c.bf16 %v1668_v43, %v1667_v33  ;;  %v5167_v29 = vld [vmem:[%s5708_s8] sm:$0xff]  }
 0x214   : > { %v1333_v37 = vpack.c.bf16 %v1324_v45, %v1323_v15 }
 0x215   : > { %4017 = vmatprep.subr.bf16.mxu1 %v4016_v21 }
 0x216   : > { %v1483_v30 = vsel %vm432_vm0, %v1333_v37, %v1460_v25  ;;  %4047 = vmatpush3.bf16.msra.mxu0 %v4915_v46  ;;  %4019 = vmatpush3.bf16.msra.mxu1 %v4016_v21  ;;  %v2047_v46 = vld [vmem:[%s5706_s6] sm:$0xf] }
 0x217   : > { %3736 = vmatprep.mubr.msk.bf16.mxu0 %vm1539_vm3, %v1483_v30  ;;  %4049 = vmatprep.subr.bf16.mxu0 %v4016_v21  ;;  %v2073_v53 = vsel %vm933_vm1, %v2047_v46, 0 }
 0x218   : > { %3737 = vmatmul.mubr.msk.bf16.gmra.mrb[44].mxu0 %vm1539_vm3, %v1486_v36  ;;  %4054 = vmatprep.subr.msk.bf16.mxu1 %vm933_vm1, %v2047_v46 }
 0x21a   : > { %4051 = vmatpush3.bf16.msra.mxu0 %v4016_v21 }
 0x21b   : > { %4055 = vmatprep.subr.msk.bf16.mxu0 %vm933_vm1, %v2047_v46 }
 0x2d0   : > { %v3726_v48 = vpop.f32.mrb[32].mxu0 }
 0x2d1   : > { %v1590_v39 = vpop.f32.mrb[33].mxu0  ;;  %v5071_v58 = vadd.f32 %v3726_v48, %v5065_v34 }
 0x2d2   : > { %v5068_v55 = vadd.f32 %v1590_v39, %v5065_v34  ;;  %v3727_v44 = vpop.f32.mrb[34].mxu0 }
 0x2d3   : > { %v1593_v54 = vpop.f32.mrb[35].mxu0  ;;  %v5081_v51 = vadd.f32 %v3727_v44, %v5065_v34  ;;  %v1816_v23 = vmul.f32 %v5071_v58, %v5071_v58 }
 0x2d4   : > { %v5074_v19 = vadd.f32 %v1593_v54, %v5065_v34  ;;  %3772 = vmatprep.mubr.f32.mxu1 %v5068_v55  ;;  %v1814_v57 = vmul.f32 %v5068_v55, %v5068_v55 }
 0x2d5   : > { %v1817_v6 = vmul.f32 %v5081_v51, %v5081_v51 }
 0x2d6   : > { %v1815_v20 = vmul.f32 %v5074_v19, %v5074_v19  ;;  %3773 = vmatmul.mubr.f32.vlgmr.msra.gmra.mrb[32].mxu1 %v5074_v19  ;;  %3828 = vmatprep.mubr.f32.mxu0 %v1814_v57 }
 0x2d7   : > { %3775 = vmatprep.mubr.f32.mxu1 %v5071_v58  ;;  %3853 = vmatpush3.bf16.msra.mxu1 %v2073_v53 }
 0x2d8   : > { %v3730_v59 = vpop.f32.mrb[36].mxu0  ;;  %3829 = vmatmul.mubr.f32.vlgmr.msra.gmra.mrb[48].mxu0 %v1815_v20  ;;  %3888 = vmatprep.subr.bf16.mxu1 %v5167_v29 }
 0x2d9   : > { %v1606_v56 = vpop.f32.mrb[37].mxu0  ;;  %3831 = vmatprep.mubr.f32.mxu0 %v1816_v23  ;;  %3871 = vmatpush3.bf16.msra.mxu0 %v2073_v53  ;;  %v5096_v14 = vadd.f32 %v3730_v59, %v5065_v34 }
 0x2da   : > { %v5090_v61 = vadd.f32 %v1606_v56, %v5065_v34  ;;  %v3731_v18 = vpop.f32.mrb[38].mxu0  ;;  %3776 = vmatmul.mubr.f32.gmra.mrb[34].mxu1 %v5081_v51 }
 0x2db   : > { %v1609_v28 = vpop.f32.mrb[39].mxu0  ;;  %v5105_v50 = vadd.f32 %v3731_v18, %v5065_v34  ;;  %v1820_v42 = vmul.f32 %v5096_v14, %v5096_v14 }
 0x2dc   : > { %v5099_v17 = vadd.f32 %v1609_v28, %v5065_v34  ;;  %3778 = vmatprep.mubr.f32.mxu1 %v5090_v61  ;;  %3832 = vmatmul.mubr.f32.gmra.mrb[50].mxu0 %v1817_v6  ;;  %v1818_v63 = vmul.f32 %v5090_v61, %v5090_v61 }
 0x2dd   : > { %v1821_v38 = vmul.f32 %v5105_v50, %v5105_v50 }
 0x2de   : > { %3779 = vmatmul.mubr.f32.gmra.mrb[36].mxu1 %v5099_v17  ;;  %3834 = vmatprep.mubr.f32.mxu0 %v1818_v63  ;;  %v1819_v60 = vmul.f32 %v5099_v17, %v5099_v17 }
 0x2df   : > { %3781 = vmatprep.mubr.f32.mxu1 %v5096_v14 }
 0x2e0   : > { %v3734_v1 = vpop.f32.mrb[40].mxu0  ;;  %3835 = vmatmul.mubr.f32.gmra.mrb[52].mxu0 %v1819_v60 }
 0x2e1   : > { %v1622_v62 = vpop.f32.mrb[41].mxu0  ;;  %3837 = vmatprep.mubr.f32.mxu0 %v1820_v42  ;;  %v5120_v47 = vadd.f32 %v3734_v1, %v5065_v34 }
 0x2e2   : > { %v5114_v12 = vadd.f32 %v1622_v62, %v5065_v34  ;;  %v3735_v40 = vpop.f32.mrb[42].mxu0  ;;  %3782 = vmatmul.mubr.f32.gmra.mrb[38].mxu1 %v5105_v50 }
 0x2e3   : > { %v1625_v35 = vpop.f32.mrb[43].mxu0  ;;  %v5129_v26 = vadd.f32 %v3735_v40, %v5065_v34  ;;  %v1824_v8 = vmul.f32 %v5120_v47, %v5120_v47 }
 0x2e4   : > { %v5123_v9 = vadd.f32 %v1625_v35, %v5065_v34  ;;  %3784 = vmatprep.mubr.f32.mxu1 %v5114_v12  ;;  %3838 = vmatmul.mubr.f32.gmra.mrb[54].mxu0 %v1821_v38  ;;  %v1822_v0 = vmul.f32 %v5114_v12, %v5114_v12 }
 0x2e5   : > { %v1825_v22 = vmul.f32 %v5129_v26, %v5129_v26 }
 0x2e6   : > { %3785 = vmatmul.mubr.f32.gmra.mrb[40].mxu1 %v5123_v9  ;;  %3840 = vmatprep.mubr.f32.mxu0 %v1822_v0  ;;  %v1823_v7 = vmul.f32 %v5123_v9, %v5123_v9 }
 0x2e7   : > { %3787 = vmatprep.mubr.f32.mxu1 %v5120_v47 }
 0x2e8   : > { %3841 = vmatmul.mubr.f32.gmra.mrb[56].mxu0 %v1823_v7 }
 0x2e9   : > { %3843 = vmatprep.mubr.f32.mxu0 %v1824_v8 }
 0x2ea   : > { %3788 = vmatmul.mubr.f32.gmra.mrb[42].mxu1 %v5129_v26 }
 0x2eb   : > { %v3738_v3 = vpop.f32.mrb[44].mxu0 }
 0x2ec   : > { %v1638_v52 = vpop.f32.mrb[45].mxu0  ;;  %3844 = vmatmul.mubr.f32.gmra.mrb[58].mxu0 %v1825_v22  ;;  %v5144_v41 = vadd.f32 %v3738_v3, %v5065_v34 }
 0x2ed   : > { %v5141_v10 = vadd.f32 %v1638_v52, %v5065_v34  ;;  %v3739_v31 = vpop.f32.mrb[46].mxu0 }
 0x2ee   : > { %v1641_v16 = vpop.f32.mrb[47].mxu0  ;;  %v5153_v2 = vadd.f32 %v3739_v31, %v5065_v34  ;;  %v1828_v11 = vmul.f32 %v5144_v41, %v5144_v41 }
 0x2ef   : > { %v5147_v13 = vadd.f32 %v1641_v16, %v5065_v34  ;;  %3790 = vmatprep.mubr.f32.mxu1 %v5141_v10  ;;  %v1826_v5 = vmul.f32 %v5141_v10, %v5141_v10 }
 0x2f0   : > { %v1829_v32 = vmul.f32 %v5153_v2, %v5153_v2 }
 0x2f1   : > { %3791 = vmatmul.mubr.f32.gmra.mrb[44].mxu1 %v5147_v13  ;;  %3846 = vmatprep.mubr.f32.mxu0 %v1826_v5  ;;  %v1827_v4 = vmul.f32 %v5147_v13, %v5147_v13 }
 0x2f2   : > { %3793 = vmatprep.mubr.f32.mxu1 %v5144_v41 }
 0x2f3   : > { %3847 = vmatmul.mubr.f32.gmra.mrb[60].mxu0 %v1827_v4 }
 0x2f4   : > { %3849 = vmatprep.mubr.f32.mxu0 %v1828_v11 }
 0x2f5   : > { %3794 = vmatmul.mubr.f32.gmra.mrb[46].mxu1 %v5153_v2 }
 0x2f7   : > { %3850 = vmatmul.mubr.f32.gmra.mrb[62].mxu0 %v1829_v32 }
 0x3a9   : > { %v3774_v15 = vpop.f32.mrb[32].mxu1 }
 0x3aa   : > { %v1976_v45 = vmul.f32 %v3774_v15, %v3774_v15  ;;  %v1735_v25 = vpop.f32.mrb[33].mxu1  ;;  %v2173_v22 = vsub.f32 0.0, %v3774_v15 }
 0x3ab   : > { %v1975_v24 = vmul.f32 %v1735_v25, %v1735_v25  ;;  %v3830_v37 = vpop.f32.mrb[48].mxu0  ;;  %v2172_v16 = vsub.f32 0.0, %v1735_v25 }
 0x3ac   : > { %v1992_v30 = vsub.f32 %v3830_v37, %v1976_v45  ;;  %v1896_v36 = vpop.f32.mrb[49].mxu0 }
 0x3ad   : > { %v1991_v33 = vsub.f32 %v1896_v36, %v1975_v24  ;;  %v5170_v43 = vpop.f32.mrb[34].mxu1 }
 0x3ae   : > { %v2008_v21 = vadd.f32 1e-05, %v1992_v30  ;;  %v1978_v46 = vmul.f32 %v5170_v43, %v5170_v43  ;;  %v5174_v27 = vpop.f32.mrb[35].mxu1  ;;  %v2175_v25 = vsub.f32 0.0, %v5170_v43 }
 0x3af   : > { %v2007_v34 = vadd.f32 1e-05, %v1991_v33  ;;  %v1977_v48 = vmul.f32 %v5174_v27, %v5174_v27  ;;  %v3833_v39 = vpop.f32.mrb[50].mxu0 }
 0x3b0   : > { %4218 = vrsqrt.f32 %v2008_v21  ;;  %v1994_v44 = vsub.f32 %v3833_v39, %v1978_v46  ;;  %v1906_v54 = vpop.f32.mrb[51].mxu0  ;;  %v2174_v39 = vsub.f32 0.0, %v5174_v27 }
 0x3b1   : > { %4220 = vrsqrt.f32 %v2007_v34  ;;  %v1993_v57 = vsub.f32 %v1906_v54, %v1977_v48  ;;  %v5178_v53 = vpop.f32.mrb[36].mxu1 }
 0x3b2   : > { %v2010_v20 = vadd.f32 1e-05, %v1994_v44  ;;  %v1980_v23 = vmul.f32 %v5178_v53, %v5178_v53  ;;  %v5182_v59 = vpop.f32.mrb[37].mxu1 }
 0x3b3   : > { %v2009_v56 = vadd.f32 1e-05, %v1993_v57  ;;  %v1979_v18 = vmul.f32 %v5182_v59, %v5182_v59  ;;  %v3836_v6 = vpop.f32.mrb[52].mxu0 }
 0x3b4   : > { %4222 = vrsqrt.f32 %v2010_v20  ;;  %v1996_v28 = vsub.f32 %v3836_v6, %v1980_v23  ;;  %v1916_v63 = vpop.f32.mrb[53].mxu0 }
 0x3b5   : > { %4224 = vrsqrt.f32 %v2009_v56  ;;  %v1995_v60 = vsub.f32 %v1916_v63, %v1979_v18  ;;  %v5186_v42 = vpop.f32.mrb[38].mxu1 }
 0x3b6   : > { %v2012_v1 = vadd.f32 1e-05, %v1996_v28  ;;  %v1982_v62 = vmul.f32 %v5186_v42, %v5186_v42  ;;  %v5190_v40 = vpop.f32.mrb[39].mxu1 }
 0x3b7   : > { %v2011_v38 = vadd.f32 1e-05, %v1995_v60  ;;  %v1981_v35 = vmul.f32 %v5190_v40, %v5190_v40  ;;  %v3839_v0 = vpop.f32.mrb[54].mxu0 }
 0x3b8   : > { %4226 = vrsqrt.f32 %v2012_v1  ;;  %v1998_v7 = vsub.f32 %v3839_v0, %v1982_v62  ;;  %v1926_v8 = vpop.f32.mrb[55].mxu0  ;;  %v2177_v1 = vsub.f32 0.0, %v5178_v53  ;;  %v2176_v0 = vsub.f32 0.0, %v5182_v59 }
 0x3b9   : > { %4228 = vrsqrt.f32 %v2011_v38  ;;  %v1997_v3 = vsub.f32 %v1926_v8, %v1981_v35  ;;  %v5194_v52 = vpop.f32.mrb[40].mxu1 }
 0x3ba   : > { %v4219_v31 = vpop.eup %4218  ;;  %v2014_v5 = vadd.f32 1e-05, %v1998_v7  ;;  %v1984_v4 = vmul.f32 %v5194_v52, %v5194_v52  ;;  %v5198_v11 = vpop.f32.mrb[41].mxu1 }
 0x3bb   : > { %v4221_v32 = vpop.eup %4220  ;;  %v2013_v45 = vadd.f32 1e-05, %v1997_v3  ;;  %v1983_v24 = vmul.f32 %v5198_v11, %v5198_v11  ;;  %v3842_v37 = vpop.f32.mrb[56].mxu0  ;;  %v2189_v30 = vmul.f32 %v4219_v31, %v2173_v22 }
 0x3bc   : > { %4230 = vrsqrt.f32 %v2014_v5  ;;  %v2000_v15 = vsub.f32 %v3842_v37, %v1984_v4  ;;  %v1936_v36 = vpop.f32.mrb[57].mxu0  ;;  %v2039_v33 = vpack.c.bf16 %v4219_v31, %v4221_v32  ;;  %v2188_v21 = vmul.f32 %v4221_v32, %v2172_v16 }
 0x3bd   : > { %4232 = vrsqrt.f32 %v2013_v45  ;;  %v1999_v46 = vsub.f32 %v1936_v36, %v1983_v24  ;;  %v5203_v34 = vpop.f32.mrb[42].mxu1  ;;  %v2179_v5 = vsub.f32 0.0, %v5186_v42  ;;  %v2178_v45 = vsub.f32 0.0, %v5190_v40 }
 0x3be   : > { %v4223_v48 = vpop.eup %4222  ;;  %v2016_v44 = vadd.f32 1e-05, %v2000_v15  ;;  %v1986_v54 = vmul.f32 %v5203_v34, %v5203_v34  ;;  %v5208_v57 = vpop.f32.mrb[43].mxu1  ;;  %3854 = vmatprep.mubr.msk.bf16.mxu1 %vm908_vm2, %v2039_v33  ;;  %v2204_v20 = vpack.c.bf16 %v2189_v30, %v2188_v21 }
 0x3bf   : > { %v4225_v23 = vpop.eup %4224  ;;  %v2191_v56 = vmul.f32 %v4223_v48, %v2175_v25  ;;  %v2015_v18 = vadd.f32 1e-05, %v1999_v46  ;;  %v1985_v43 = vmul.f32 %v5208_v57, %v5208_v57  ;;  %v3845_v6 = vpop.f32.mrb[58].mxu0 }
 0x3c0   : > { %v2040_v28 = vpack.c.bf16 %v4223_v48, %v4225_v23  ;;  %v2190_v63 = vmul.f32 %v4225_v23, %v2174_v39  ;;  %4234 = vrsqrt.f32 %v2016_v44  ;;  %v2002_v27 = vsub.f32 %v3845_v6, %v1986_v54  ;;  %v1946_v60 = vpop.f32.mrb[59].mxu0  ;;  %3872 = vmatprep.mubr.msk.bf16.mxu0 %vm908_vm2, %v2204_v20 }
 0x3c1   : > { %4236 = vrsqrt.f32 %v2015_v18  ;;  %v2001_v62 = vsub.f32 %v1946_v60, %v1985_v43  ;;  %v2181_v48 = vsub.f32 0.0, %v5194_v52  ;;  %v2180_v20 = vsub.f32 0.0, %v5198_v11 }
 0x3c2   : > { %v4227_v38 = vpop.eup %4226  ;;  %v2205_v35 = vpack.c.bf16 %v2191_v56, %v2190_v63  ;;  %v2018_v7 = vadd.f32 1e-05, %v2002_v27  ;;  %3855 = vmatmul.mubr.msk.bf16.vlgmr.msra.gmra.mrb[48].mxu1 %vm908_vm2, %v2040_v28 }
 0x3c3   : > { %v4229_v8 = vpop.eup %4228  ;;  %v2017_v22 = vadd.f32 1e-05, %v2001_v62  ;;  %v2193_v3 = vmul.f32 %v4227_v38, %v2177_v1  ;;  %3889 = vmatpush3.bf16.msra.mxu1 %v5167_v29  ;;  %v2183_v62 = vsub.f32 0.0, %v5203_v34 }
 0x3c4   : > { %4238 = vrsqrt.f32 %v2018_v7  ;;  %v5218_v31 = vpop.f32.mrb[44].mxu1  ;;  %3873 = vmatmul.mubr.msk.bf16.vlgmr.msra.gmra.mrb[64].mxu0 %vm908_vm2, %v2205_v35  ;;  %v2041_v53 = vpack.c.bf16 %v4227_v38, %v4229_v8  ;;  %v2192_v16 = vmul.f32 %v4229_v8, %v2176_v0  ;;  %v2182_v35 = vsub.f32 0.0, %v5208_v57 }
 0x3c5   : > { %4240 = vrsqrt.f32 %v2017_v22  ;;  %v1988_v59 = vmul.f32 %v5218_v31, %v5218_v31  ;;  %v1795_v4 = vpop.f32.mrb[45].mxu1  ;;  %v2185_v34 = vsub.f32 0.0, %v5218_v31 }
 0x3c6   : > { %v4231_v32 = vpop.eup %4230  ;;  %v1987_v24 = vmul.f32 %v1795_v4, %v1795_v4  ;;  %v3848_v37 = vpop.f32.mrb[60].mxu0  ;;  %3858 = vmatprep.mubr.msk.bf16.mxu1 %vm908_vm2, %v2041_v53  ;;  %v2206_v29 = vpack.c.bf16 %v2193_v3, %v2192_v16 }
 0x3c7   : > { %v4233_v30 = vpop.eup %4232  ;;  %v2004_v15 = vsub.f32 %v3848_v37, %v1988_v59  ;;  %v1956_v36 = vpop.f32.mrb[61].mxu0  ;;  %v2195_v33 = vmul.f32 %v4231_v32, %v2179_v5  ;;  %v2184_v5 = vsub.f32 0.0, %v1795_v4  ;;  %v4105_v4 = vld [vmem:[%s5708_s8 + $0x8] sm:$0xff]  }
 0x3c8   : > { %v2003_v21 = vsub.f32 %v1956_v36, %v1987_v24  ;;  %v3795_v25 = vpop.f32.mrb[46].mxu1  ;;  %3876 = vmatprep.mubr.msk.bf16.mxu0 %vm908_vm2, %v2206_v29  ;;  %v2042_v42 = vpack.c.bf16 %v4231_v32, %v4233_v30  ;;  %v2194_v46 = vmul.f32 %v4233_v30, %v2178_v45  ;;  %3890 = vmatprep.subr.bf16.mxu1 %v4105_v4 }
 0x3c9   : > { %v2020_v39 = vadd.f32 1e-05, %v2004_v15  ;;  %v1990_v44 = vmul.f32 %v3795_v25, %v3795_v25  ;;  %v1805_v40 = vpop.f32.mrb[47].mxu1  ;;  %v2187_v37 = vsub.f32 0.0, %v3795_v25  ;;  %3891 = vmatpush3.bf16.msra.mxu1 %v4105_v4  ;;  %v4106_v25 = vld [vmem:[%s5708_s8 + $0x10] sm:$0xff]  }
 0x3ca   : > { %v4235_v54 = vpop.eup %4234  ;;  %v2019_v23 = vadd.f32 1e-05, %v2003_v21  ;;  %v1989_v56 = vmul.f32 %v1805_v40, %v1805_v40  ;;  %v3851_v18 = vpop.f32.mrb[62].mxu0  ;;  %3859 = vmatmul.mubr.msk.bf16.gmra.mrb[52].mxu1 %vm908_vm2, %v2042_v42  ;;  %v2207_v43 = vpack.c.bf16 %v2195_v33, %v2194_v46  ;;  %v2186_v30 = vsub.f32 0.0, %v1805_v40  ;;  %3892 = vmatprep.subr.bf16.mxu1 %v4106_v25  ;;  %v4107_v46 = vld [vmem:[%s5708_s8 + $0x18] sm:$0xff]  }
 0x3cb   : > { %v4237_v6 = vpop.eup %4236  ;;  %4242 = vrsqrt.f32 %v2020_v39  ;;  %v2006_v28 = vsub.f32 %v3851_v18, %v1990_v44  ;;  %v1966_v63 = vpop.f32.mrb[63].mxu0  ;;  %v2197_v27 = vmul.f32 %v4235_v54, %v2181_v48  ;;  %v4108_v48 = vld [vmem:[%s5708_s8 + $0x20] sm:$0xff]   ;;  %v4109_v39 = vld [vmem:[%s5708_s8 + $0x28] sm:$0xff]   ;;  %v4110_v44 = vld [vmem:[%s5708_s8 + $0x30] sm:$0xff]  }
 0x3cc   : > { %4244 = vrsqrt.f32 %v2019_v23  ;;  %v2005_v60 = vsub.f32 %v1966_v63, %v1989_v56  ;;  %3877 = vmatmul.mubr.msk.bf16.gmra.mrb[68].mxu0 %vm908_vm2, %v2207_v43  ;;  %v2043_v52 = vpack.c.bf16 %v4235_v54, %v4237_v6  ;;  %v2196_v1 = vmul.f32 %v4237_v6, %v2180_v20  ;;  %v4111_v40 = vld [vmem:[%s5708_s8 + $0x38] sm:$0xff]   ;;  %v4112_v54 = vld [vmem:[%s5710_s10] sm:$0xff]   ;;  %v4113_v20 = vld [vmem:[%s5710_s10 + $0x8] sm:$0xff]  }
 0x3cd   : > { %v2022_v11 = vadd.f32 1e-05, %v2006_v28  ;;  %3893 = vmatpush3.bf16.msra.mxu1 %v4106_v25  ;;  %3920 = vmatprep.subr.bf16.mxu0 %v4112_v54  ;;  %v4114_v23 = vld [vmem:[%s5710_s10 + $0x10] sm:$0xff]   ;;  %v4115_v56 = vld [vmem:[%s5710_s10 + $0x18] sm:$0xff]   ;;  %v4116_v18 = vld [vmem:[%s5710_s10 + $0x20] sm:$0xff]   ;;  %v2367_v6 = vsub.s32 2, %v4920_v49 }
 0x3ce   : > { %v4239_v38 = vpop.eup %4238  ;;  %v2021_v0 = vadd.f32 1e-05, %v2005_v60  ;;  %3862 = vmatprep.mubr.msk.bf16.mxu1 %vm908_vm2, %v2043_v52  ;;  %v2208_v7 = vpack.c.bf16 %v2197_v27, %v2196_v1  ;;  %3894 = vmatprep.subr.bf16.mxu1 %v4107_v46  ;;  %v4117_v43 = vld [vmem:[%s5710_s10 + $0x28] sm:$0xff]   ;;  %v5286_v60 = vld [vmem:[%s5702_s2] sm:$0xff] }
 0x3cf   : > { %v4241_v8 = vpop.eup %4240  ;;  %4246 = vrsqrt.f32 %v2022_v11  ;;  %v2199_v22 = vmul.f32 %v4239_v38, %v2183_v62  ;;  %3921 = vmatpush3.bf16.msra.mxu0 %v4112_v54  ;;  %v5289_v52 = vrot.slane %v5286_v60, %v2367_v6 }
 0x3d0   : > { %4248 = vrsqrt.f32 %v2021_v0  ;;  %3880 = vmatprep.mubr.msk.bf16.mxu0 %vm908_vm2, %v2208_v7  ;;  %v2044_v3 = vpack.c.bf16 %v4239_v38, %v4241_v8  ;;  %v2198_v53 = vmul.f32 %v4241_v8, %v2182_v35  ;;  %3922 = vmatprep.subr.bf16.mxu0 %v4113_v20 }
 0x3d1   : > { %3895 = vmatpush3.bf16.msra.mxu1 %v4107_v46 }
 0x3d2   : > { %3863 = vmatmul.mubr.msk.bf16.gmra.mrb[56].mxu1 %vm908_vm2, %v2044_v3  ;;  %v2209_v16 = vpack.c.bf16 %v2199_v22, %v2198_v53  ;;  %3896 = vmatprep.subr.bf16.mxu1 %v4108_v48 }
 0x3d3   : > { %3923 = vmatpush3.bf16.msra.mxu0 %v4113_v20 }
 0x3d4   : > { %3881 = vmatmul.mubr.msk.bf16.gmra.mrb[72].mxu0 %vm908_vm2, %v2209_v16  ;;  %3924 = vmatprep.subr.bf16.mxu0 %v4114_v23 }
 0x3d5   : > { %v4243_v57 = vpop.eup %4242  ;;  %3897 = vmatpush3.bf16.msra.mxu1 %v4108_v48 }
 0x3d6   : > { %v4245_v59 = vpop.eup %4244  ;;  %v2201_v32 = vmul.f32 %v4243_v57, %v2185_v34  ;;  %3898 = vmatprep.subr.bf16.mxu1 %v4109_v39 }
 0x3d7   : > { %v2045_v45 = vpack.c.bf16 %v4243_v57, %v4245_v59  ;;  %v2200_v24 = vmul.f32 %v4245_v59, %v2184_v5  ;;  %3925 = vmatpush3.bf16.msra.mxu0 %v4114_v23 }
 0x3d8   : > { %3926 = vmatprep.subr.bf16.mxu0 %v4115_v56 }
 0x3d9   : > { %v4247_v29 = vpop.eup %4246  ;;  %3866 = vmatprep.mubr.msk.bf16.mxu1 %vm908_vm2, %v2045_v45  ;;  %v2210_v15 = vpack.c.bf16 %v2201_v32, %v2200_v24  ;;  %3899 = vmatpush3.bf16.msra.mxu1 %v4109_v39 }
 0x3da   : > { %v4249_v36 = vpop.eup %4248  ;;  %v2203_v33 = vmul.f32 %v4247_v29, %v2187_v37  ;;  %3900 = vmatprep.subr.bf16.mxu1 %v4110_v44 }
 0x3db   : > { %3884 = vmatprep.mubr.msk.bf16.mxu0 %vm908_vm2, %v2210_v15  ;;  %v2046_v21 = vpack.c.bf16 %v4247_v29, %v4249_v36  ;;  %v2202_v31 = vmul.f32 %v4249_v36, %v2186_v30  ;;  %3927 = vmatpush3.bf16.msra.mxu0 %v4115_v56 }
 0x3dc   : > { %3928 = vmatprep.subr.bf16.mxu0 %v4116_v18 }
 0x3dd   : > { %3867 = vmatmul.mubr.msk.bf16.gmra.mrb[60].mxu1 %vm908_vm2, %v2046_v21  ;;  %v2211_v42 = vpack.c.bf16 %v2203_v33, %v2202_v31 }
 0x3de   : > { %3901 = vmatpush3.bf16.msra.mxu1 %v4110_v44 }
 0x3df   : > { %3885 = vmatmul.mubr.msk.bf16.gmra.mrb[76].mxu0 %vm908_vm2, %v2211_v42  ;;  %3902 = vmatprep.subr.bf16.mxu1 %v4111_v40 }
 0x3e0   : > { %3929 = vmatpush3.bf16.msra.mxu0 %v4116_v18 }
 0x3e1   : > { %3930 = vmatprep.subr.bf16.mxu0 %v4117_v43 }
 0x3e2   : > { %3903 = vmatpush3.bf16.msra.mxu1 %v4111_v40 }
 0x3e4   : > { %3931 = vmatpush3.bf16.msra.mxu0 %v4117_v43 }
 0x495   : > { %v3856_v28 = vpop.f32.mrb[48].mxu1 }
 0x496   : > { %v2335_v63 = vmul.f32 %v3856_v28, %v5071_v58  ;;  %v2109_v27 = vpop.f32.mrb[49].mxu1 }
 0x497   : > { %v2333_v1 = vmul.f32 %v2109_v27, %v5068_v55  ;;  %v3857_v62 = vpop.f32.mrb[50].mxu1  ;;  %v3874_v11 = vpop.f32.mrb[64].mxu0 }
 0x498   : > { %v2336_v38 = vmul.f32 %v3857_v62, %v5081_v51  ;;  %v2351_v35 = vadd.f32 %v3874_v11, %v2335_v63  ;;  %v2112_v0 = vpop.f32.mrb[51].mxu1  ;;  %v2270_v7 = vpop.f32.mrb[65].mxu0 }
 0x499   : > { %v2334_v58 = vmul.f32 %v2112_v0, %v5074_v19  ;;  %v2349_v8 = vadd.f32 %v2333_v1, %v2270_v7  ;;  %v3875_v22 = vpop.f32.mrb[66].mxu0 }
 0x49a   : > { %v5295_v3 = vadd.f32 %v5289_v52, %v2351_v35  ;;  %v2352_v53 = vadd.f32 %v3875_v22, %v2336_v38  ;;  %v2273_v16 = vpop.f32.mrb[67].mxu0 }
 0x49b   : > { %v5298_v34 = vadd.f32 %v5289_v52, %v2349_v8  ;;  %v2350_v55 = vadd.f32 %v2334_v58, %v2273_v16 }
 0x49c   : > { %v2387_v57 = vmul.f32 0.5, %v5295_v3  ;;  %v5302_v51 = vadd.f32 %v5289_v52, %v2352_v53 }
 0x49d   : > { %v2385_v5 = vmul.f32 0.5, %v5298_v34  ;;  %v5306_v19 = vadd.f32 %v5289_v52, %v2350_v55  ;;  %v3860_v59 = vpop.f32.mrb[52].mxu1 }
 0x49e   : > { %4250 = vtanh.f32 %v2387_v57  ;;  %v2388_v32 = vmul.f32 0.5, %v5302_v51  ;;  %v2339_v45 = vmul.f32 %v3860_v59, %v5096_v14  ;;  %v2125_v24 = vpop.f32.mrb[53].mxu1 }
 0x49f   : > { %4252 = vtanh.f32 %v2385_v5  ;;  %v2386_v37 = vmul.f32 0.5, %v5306_v19  ;;  %v2337_v29 = vmul.f32 %v2125_v24, %v5090_v61  ;;  %v3861_v30 = vpop.f32.mrb[54].mxu1  ;;  %v3878_v15 = vpop.f32.mrb[68].mxu0 }
 0x4a0   : > { %4254 = vtanh.f32 %v2388_v32  ;;  %v2340_v36 = vmul.f32 %v3861_v30, %v5105_v50  ;;  %v2355_v33 = vadd.f32 %v3878_v15, %v2339_v45  ;;  %v2128_v21 = vpop.f32.mrb[55].mxu1  ;;  %v2286_v31 = vpop.f32.mrb[69].mxu0 }
 0x4a1   : > { %4256 = vtanh.f32 %v2386_v37  ;;  %v2338_v42 = vmul.f32 %v2128_v21, %v5099_v17  ;;  %v2353_v4 = vadd.f32 %v2337_v29, %v2286_v31  ;;  %v3879_v25 = vpop.f32.mrb[70].mxu0 }
 0x4a2   : > { %v5315_v14 = vadd.f32 %v5289_v52, %v2355_v33  ;;  %v2356_v46 = vadd.f32 %v3879_v25, %v2340_v36  ;;  %v2289_v48 = vpop.f32.mrb[71].mxu0 }
 0x4a3   : > { %v5318_v61 = vadd.f32 %v5289_v52, %v2353_v4  ;;  %v2354_v39 = vadd.f32 %v2338_v42, %v2289_v48 }
 0x4a4   : > { %v2391_v44 = vmul.f32 0.5, %v5315_v14  ;;  %v5322_v50 = vadd.f32 %v5289_v52, %v2356_v46 }
 0x4a5   : > { %v2389_v40 = vmul.f32 0.5, %v5318_v61  ;;  %v5326_v17 = vadd.f32 %v5289_v52, %v2354_v39  ;;  %v3864_v54 = vpop.f32.mrb[56].mxu1 }
 0x4a6   : > { %4258 = vtanh.f32 %v2391_v44  ;;  %v2392_v20 = vmul.f32 0.5, %v5322_v50  ;;  %v2343_v23 = vmul.f32 %v3864_v54, %v5120_v47  ;;  %v2141_v56 = vpop.f32.mrb[57].mxu1 }
 0x4a7   : > { %4260 = vtanh.f32 %v2389_v40  ;;  %v2390_v18 = vmul.f32 0.5, %v5326_v17  ;;  %v2341_v43 = vmul.f32 %v2141_v56, %v5114_v12  ;;  %v3865_v6 = vpop.f32.mrb[58].mxu1  ;;  %v3882_v28 = vpop.f32.mrb[72].mxu0 }
 0x4a8   : > { %v4251_v63 = vpop.eup %4250  ;;  %4262 = vtanh.f32 %v2392_v20  ;;  %v2344_v27 = vmul.f32 %v3865_v6, %v5129_v26  ;;  %v2359_v1 = vadd.f32 %v3882_v28, %v2343_v23  ;;  %v2144_v62 = vpop.f32.mrb[59].mxu1 }
 0x4a9   : > { %v2302_v11 = vpop.f32.mrb[73].mxu0  ;;  %v4253_v38 = vpop.eup %4252  ;;  %v2419_v35 = vmul.f32 0.5, %v4251_v63  ;;  %4264 = vtanh.f32 %v2390_v18  ;;  %v2342_v47 = vmul.f32 %v2144_v62, %v5123_v9 }
 0x4aa   : > { %v2357_v0 = vadd.f32 %v2341_v43, %v2302_v11  ;;  %v3883_v7 = vpop.f32.mrb[74].mxu0  ;;  %v4255_v58 = vpop.eup %4254  ;;  %v2417_v8 = vmul.f32 0.5, %v4253_v38  ;;  %v5335_v12 = vadd.f32 %v5289_v52, %v2359_v1 }
 0x4ab   : > { %v2360_v22 = vadd.f32 %v3883_v7, %v2344_v27  ;;  %v2305_v53 = vpop.f32.mrb[75].mxu0  ;;  %v4257_v16 = vpop.eup %4256  ;;  %v2435_v55 = vadd.f32 0.5, %v2419_v35  ;;  %v2420_v26 = vmul.f32 0.5, %v4255_v58 }
 0x4ac   : > { %v5338_v57 = vadd.f32 %v5289_v52, %v2357_v0  ;;  %v2358_v5 = vadd.f32 %v2342_v47, %v2305_v53  ;;  %v2433_v59 = vadd.f32 0.5, %v2417_v8  ;;  %v2418_v32 = vmul.f32 0.5, %v4257_v16 }
 0x4ad   : > { %v2395_v9 = vmul.f32 0.5, %v5335_v12  ;;  %v5342_v45 = vadd.f32 %v5289_v52, %v2360_v22  ;;  %v2436_v24 = vadd.f32 0.5, %v2420_v26  ;;  %v2451_v36 = vmul.f32 %v2435_v55, %v5295_v3 }
 0x4ae   : > { %v2393_v37 = vmul.f32 0.5, %v5338_v57  ;;  %v5346_v29 = vadd.f32 %v5289_v52, %v2358_v5  ;;  %v2434_v30 = vadd.f32 0.5, %v2418_v32  ;;  %v2449_v42 = vmul.f32 %v2433_v59, %v5298_v34 }
 0x4af   : > { %4266 = vtanh.f32 %v2395_v9  ;;  %v2396_v15 = vmul.f32 0.5, %v5342_v45  ;;  %v2452_v33 = vmul.f32 %v2436_v24, %v5302_v51 }
 0x4b0   : > { %4268 = vtanh.f32 %v2393_v37  ;;  %v2394_v21 = vmul.f32 0.5, %v5346_v29  ;;  %v4259_v31 = vpop.eup %4258  ;;  %v2450_v4 = vmul.f32 %v2434_v30, %v5306_v19  ;;  %v3868_v25 = vpop.f32.mrb[60].mxu1 }
 0x4b1   : > { %4270 = vtanh.f32 %v2396_v15  ;;  %v4261_v46 = vpop.eup %4260  ;;  %v2466_v48 = vpack.c.bf16 %v2452_v33, %v2451_v36  ;;  %v2423_v39 = vmul.f32 0.5, %v4259_v31  ;;  %v2347_v44 = vmul.f32 %v3868_v25, %v5144_v41  ;;  %v2157_v40 = vpop.f32.mrb[61].mxu1 }
 0x4b2   : > { %4272 = vtanh.f32 %v2394_v21  ;;  %v4263_v3 = vpop.eup %4262  ;;  %v2421_v54 = vmul.f32 0.5, %v4261_v46  ;;  %v2345_v51 = vmul.f32 %v2157_v40, %v5141_v10  ;;  %v3869_v20 = vpop.f32.mrb[62].mxu1  ;;  %v2465_v56 = vpack.c.bf16 %v2450_v4, %v2449_v42 }
 0x4b3   : > { %v3886_v23 = vpop.f32.mrb[76].mxu0  ;;  %v4265_v18 = vpop.eup %4264  ;;  %v2439_v34 = vadd.f32 0.5, %v2423_v39  ;;  %v2424_v43 = vmul.f32 0.5, %v4263_v3  ;;  %v2348_v19 = vmul.f32 %v3869_v20, %v5153_v2 }
 0x4b4   : > { %v2363_v6 = vadd.f32 %v3886_v23, %v2347_v44  ;;  %v2160_v28 = vpop.f32.mrb[63].mxu1  ;;  %v2318_v63 = vpop.f32.mrb[77].mxu0  ;;  %v2437_v27 = vadd.f32 0.5, %v2421_v54  ;;  %v2422_v1 = vmul.f32 0.5, %v4265_v18  ;;  %3904 = vmatprep.mubr.bf16.mxu1 %v2465_v56 }
 0x4b5   : > { %v2346_v41 = vmul.f32 %v2160_v28, %v5147_v13  ;;  %v2361_v62 = vadd.f32 %v2345_v51, %v2318_v63  ;;  %v3887_v11 = vpop.f32.mrb[78].mxu0  ;;  %v2440_v38 = vadd.f32 0.5, %v2424_v43  ;;  %3905 = vmatmul.mubr.bf16.vlgmr.msra.gmra.mrb[64].mxu1 %v2466_v48  ;;  %v2455_v58 = vmul.f32 %v2439_v34, %v5315_v14  ;;  %v4118_v28 = vld [vmem:[%s5710_s10 + $0x30] sm:$0xff]   ;;  %v4119_v63 = vld [vmem:[%s5710_s10 + $0x38] sm:$0xff]  }
 0x4b6   : > { %v2383_v10 = vadd.f32 %v5289_v52, %v2363_v6  ;;  %v2364_v35 = vadd.f32 %v3887_v11, %v2348_v19  ;;  %v2321_v47 = vpop.f32.mrb[79].mxu0  ;;  %v2438_v0 = vadd.f32 0.5, %v2422_v1  ;;  %v2453_v16 = vmul.f32 %v2437_v27, %v5318_v61  ;;  %3932 = vmatprep.subr.bf16.mxu0 %v4118_v28 }
 0x4b7   : > { %v2381_v7 = vadd.f32 %v5289_v52, %v2361_v62  ;;  %v2362_v2 = vadd.f32 %v2346_v41, %v2321_v47  ;;  %v2456_v8 = vmul.f32 %v2440_v38, %v5322_v50  ;;  %3933 = vmatpush3.bf16.msra.mxu0 %v4118_v28  ;;  %v2491_v27 = vsub.s32 3, %v4920_v49  ;;  %v4326_v28 = vld [vmem:[%s4531_s14 + $0x58] sm:$0xff] }
 0x4b8   : > { %v2399_v22 = vmul.f32 0.5, %v2383_v10  ;;  %v2384_v13 = vadd.f32 %v5289_v52, %v2364_v35  ;;  %v2454_v55 = vmul.f32 %v2438_v0, %v5326_v17  ;;  %3934 = vmatprep.subr.bf16.mxu0 %v4119_v63 }
 0x4b9   : > { %v4267_v53 = vpop.eup %4266  ;;  %v2397_v26 = vmul.f32 0.5, %v2381_v7  ;;  %v2382_v5 = vadd.f32 %v5289_v52, %v2362_v2  ;;  %v2468_v24 = vpack.c.bf16 %v2456_v8, %v2455_v58  ;;  %v2492_v1 = vrot.slane %v5286_v60, %v2491_v27  ;;  %v4327_v27 = vld [vmem:[%s4531_s14 + $0x60] sm:$0xff] }
 0x4ba   : > { %v4269_v59 = vpop.eup %4268  ;;  %v2427_v32 = vmul.f32 0.5, %v4267_v53  ;;  %4274 = vtanh.f32 %v2399_v22  ;;  %v2400_v9 = vmul.f32 0.5, %v2384_v13  ;;  %v2467_v30 = vpack.c.bf16 %v2454_v55, %v2453_v16 }
 0x4bb   : > { %v4271_v37 = vpop.eup %4270  ;;  %v2425_v14 = vmul.f32 0.5, %v4269_v59  ;;  %4276 = vtanh.f32 %v2397_v26  ;;  %v2398_v50 = vmul.f32 0.5, %v2382_v5  ;;  %3935 = vmatpush3.bf16.msra.mxu0 %v4119_v63 }
 0x4bc   : > { %v4273_v15 = vpop.eup %4272  ;;  %v2443_v36 = vadd.f32 0.5, %v2427_v32  ;;  %v2428_v33 = vmul.f32 0.5, %v4271_v37  ;;  %4278 = vtanh.f32 %v2400_v9  ;;  %3908 = vmatprep.mubr.bf16.mxu1 %v2467_v30 }
 0x4bd   : > { %v2441_v61 = vadd.f32 0.5, %v2425_v14  ;;  %v2426_v21 = vmul.f32 0.5, %v4273_v15  ;;  %4280 = vtanh.f32 %v2398_v50  ;;  %3909 = vmatmul.mubr.bf16.gmra.mrb[68].mxu1 %v2468_v24 }
 0x4be   : > { %v2444_v17 = vadd.f32 0.5, %v2428_v33  ;;  %v2459_v31 = vmul.f32 %v2443_v36, %v5335_v12 }
 0x4bf   : > { %v2442_v52 = vadd.f32 0.5, %v2426_v21  ;;  %v2457_v4 = vmul.f32 %v2441_v61, %v5338_v57 }
 0x4c0   : > { %v2460_v42 = vmul.f32 %v2444_v17, %v5342_v45 }
 0x4c1   : > { %v2458_v25 = vmul.f32 %v2442_v52, %v5346_v29 }
 0x4c2   : > { %v2470_v46 = vpack.c.bf16 %v2460_v42, %v2459_v31 }
 0x4c3   : > { %v2469_v48 = vpack.c.bf16 %v2458_v25, %v2457_v4 }
 0x4c4   : > { %v4275_v39 = vpop.eup %4274 }
 0x4c5   : > { %v4277_v44 = vpop.eup %4276  ;;  %v2431_v40 = vmul.f32 0.5, %v4275_v39  ;;  %3912 = vmatprep.mubr.bf16.mxu1 %v2469_v48  ;;  %v4120_v39 = vld [vmem:[%s5709_s9] sm:$0xff]  }
 0x4c6   : > { %v4279_v3 = vpop.eup %4278  ;;  %v2429_v54 = vmul.f32 0.5, %v4277_v44  ;;  %3913 = vmatmul.mubr.bf16.gmra.mrb[72].mxu1 %v2470_v46  ;;  %v4121_v44 = vld [vmem:[%s5709_s9 + $0x8] sm:$0xff]   ;;  %3952 = vmatprep.subr.bf16.mxu1 %v4120_v39 }
 0x4c7   : > { %v4281_v51 = vpop.eup %4280  ;;  %v2447_v20 = vadd.f32 0.5, %v2431_v40  ;;  %v2432_v23 = vmul.f32 0.5, %v4279_v3  ;;  %v4315_v40 = vld [vmem:[%s4531_s14] sm:$0xff]  ;;  %v4316_v3 = vld [vmem:[%s4531_s14 + $0x8] sm:$0xff]  ;;  %3953 = vmatpush3.bf16.msra.mxu1 %v4120_v39 }
 0x4c8   : > { %v2445_v56 = vadd.f32 0.5, %v2429_v54  ;;  %v2430_v12 = vmul.f32 0.5, %v4281_v51  ;;  %v3028_v54 = vpack.c.bf16 %v4316_v3, %v4315_v40  ;;  %3954 = vmatprep.subr.bf16.mxu1 %v4121_v44  ;;  %v4317_v51 = vld [vmem:[%s4531_s14 + $0x10] sm:$0xff] }
 0x4c9   : > { %v2448_v18 = vadd.f32 0.5, %v2432_v23  ;;  %v2463_v34 = vmul.f32 %v2447_v20, %v2383_v10  ;;  %v4318_v20 = vld [vmem:[%s4531_s14 + $0x18] sm:$0xff] }
 0x4ca   : > { %v2446_v45 = vadd.f32 0.5, %v2430_v12  ;;  %v2461_v43 = vmul.f32 %v2445_v56, %v2381_v7  ;;  %v3029_v23 = vpack.c.bf16 %v4318_v20, %v4317_v51  ;;  %v4319_v56 = vld [vmem:[%s4531_s14 + $0x20] sm:$0xff]  ;;  %v4320_v12 = vld [vmem:[%s4531_s14 + $0x28] sm:$0xff] }
 0x4cb   : > { %v2464_v57 = vmul.f32 %v2448_v18, %v2384_v13  ;;  %3955 = vmatpush3.bf16.msra.mxu1 %v4121_v44  ;;  %v3030_v18 = vpack.c.bf16 %v4320_v12, %v4319_v56 }
 0x4cc   : > { %v2462_v29 = vmul.f32 %v2446_v45, %v2382_v5  ;;  %v4321_v45 = vld [vmem:[%s4531_s14 + $0x30] sm:$0xff] }
 0x4cd   : > { %v2472_v19 = vpack.c.bf16 %v2464_v57, %v2463_v34  ;;  %v4322_v34 = vld [vmem:[%s4531_s14 + $0x38] sm:$0xff] }
 0x4ce   : > { %v2471_v6 = vpack.c.bf16 %v2462_v29, %v2461_v43  ;;  %v3031_v57 = vpack.c.bf16 %v4322_v34, %v4321_v45  ;;  %v4323_v43 = vld [vmem:[%s4531_s14 + $0x40] sm:$0xff]  ;;  %v4324_v29 = vld [vmem:[%s4531_s14 + $0x48] sm:$0xff] }
 0x4d0   : > { %3916 = vmatprep.mubr.bf16.mxu1 %v2471_v6  ;;  %v4325_v6 = vld [vmem:[%s4531_s14 + $0x50] sm:$0xff] }
 0x4d1   : > { %3917 = vmatmul.mubr.bf16.gmra.mrb[76].mxu1 %v2472_v19  ;;  %v3032_v19 = vpack.c.bf16 %v4324_v29, %v4323_v43  ;;  %v3033_v63 = vpack.c.bf16 %v4326_v28, %v4325_v6 }
 0x4d2   : > { %3956 = vmatprep.mubr.msk.bf16.mxu1 %vm432_vm0, %v3028_v54 }
 0x4d9   : > { %3957 = vmatmul.mubr.msk.bf16.vlgmr.msra.gmra.mrb[80].mxu1 %vm432_vm0, %v3029_v23 }
 0x4da   : > { %3960 = vmatprep.mubr.msk.bf16.mxu1 %vm432_vm0, %v3030_v18 }
 0x4e1   : > { %3961 = vmatmul.mubr.msk.bf16.gmra.mrb[84].mxu1 %vm432_vm0, %v3031_v57 }
 0x4e2   : > { %3964 = vmatprep.mubr.msk.bf16.mxu1 %vm432_vm0, %v3032_v19 }
 0x4e9   : > { %3965 = vmatmul.mubr.msk.bf16.gmra.mrb[88].mxu1 %vm432_vm0, %v3033_v63 }
 0x588   : > { %v3906_v41 = vpop.f32.mrb[64].mxu1 }
 0x589   : > { %v2575_v62 = vpop.f32.mrb[65].mxu1  ;;  %v2584_v38 = vadd.f32 %v3906_v41, %v2492_v1 }
 0x58a   : > { %v3907_v11 = vpop.f32.mrb[66].mxu1  ;;  %v2576_v47 = vadd.f32 %v2575_v62, %v2492_v1  ;;  %v4329_v62 = vld [vmem:[%s4531_s14 + $0x70] sm:$0xff] }
 0x58b   : > { %v2587_v10 = vadd.f32 %v3907_v11, %v2492_v1  ;;  %v2578_v35 = vpop.f32.mrb[67].mxu1  ;;  %v4330_v11 = vld [vmem:[%s4531_s14 + $0x78] sm:$0xff] }
 0x58c   : > { %v2579_v0 = vadd.f32 %v2578_v35, %v2492_v1 }
 0x58d   : > { %v2639_v7 = vpack.c.bf16 %v2587_v10, %v2584_v38  ;;  %v3035_v38 = vpack.c.bf16 %v4330_v11, %v4329_v62  ;;  %v2664_v10 = vsub.s32 5, %v4920_v49 }
 0x58e   : > { %v2638_v2 = vpack.c.bf16 %v2579_v0, %v2576_v47 }
 0x58f   : > { %v2665_v35 = vrot.slane %v5286_v60, %v2664_v10 }
 0x590   : > { %v3910_v58 = vpop.f32.mrb[68].mxu1  ;;  %3936 = vmatprep.mubr.bf16.mxu0 %v2638_v2 }
 0x591   : > { %v2591_v8 = vpop.f32.mrb[69].mxu1  ;;  %3937 = vmatmul.mubr.bf16.vlgmr.msra.gmra.mrb[80].mxu0 %v2639_v7  ;;  %v2600_v13 = vadd.f32 %v3910_v58, %v2492_v1 }
 0x592   : > { %v3911_v22 = vpop.f32.mrb[70].mxu1  ;;  %v2592_v55 = vadd.f32 %v2591_v8, %v2492_v1 }
 0x593   : > { %v2603_v53 = vadd.f32 %v3911_v22, %v2492_v1  ;;  %v2594_v16 = vpop.f32.mrb[71].mxu1 }
 0x594   : > { %v2595_v26 = vadd.f32 %v2594_v16, %v2492_v1 }
 0x595   : > { %v2641_v5 = vpack.c.bf16 %v2603_v53, %v2600_v13 }
 0x596   : > { %v2640_v59 = vpack.c.bf16 %v2595_v26, %v2592_v55 }
 0x598   : > { %3940 = vmatprep.mubr.bf16.mxu0 %v2640_v59 }
 0x599   : > { %v3914_v32 = vpop.f32.mrb[72].mxu1  ;;  %3941 = vmatmul.mubr.bf16.gmra.mrb[84].mxu0 %v2641_v5 }
 0x59a   : > { %v2607_v9 = vpop.f32.mrb[73].mxu1  ;;  %v2616_v37 = vadd.f32 %v3914_v32, %v2492_v1 }
 0x59b   : > { %v3915_v24 = vpop.f32.mrb[74].mxu1  ;;  %v2608_v30 = vadd.f32 %v2607_v9, %v2492_v1 }
 0x59c   : > { %v2619_v14 = vadd.f32 %v3915_v24, %v2492_v1  ;;  %v2610_v50 = vpop.f32.mrb[75].mxu1 }
 0x59d   : > { %v2611_v15 = vadd.f32 %v2610_v50, %v2492_v1 }
 0x59e   : > { %v2643_v36 = vpack.c.bf16 %v2619_v14, %v2616_v37 }
 0x59f   : > { %v2642_v33 = vpack.c.bf16 %v2611_v15, %v2608_v30 }
 0x5a1   : > { %3944 = vmatprep.mubr.bf16.mxu0 %v2642_v33 }
 0x5a2   : > { %3945 = vmatmul.mubr.bf16.gmra.mrb[88].mxu0 %v2643_v36 }
 0x5a4   : > { %v3918_v61 = vpop.f32.mrb[76].mxu1 }
 0x5a5   : > { %v2623_v21 = vpop.f32.mrb[77].mxu1  ;;  %v2632_v52 = vadd.f32 %v3918_v61, %v2492_v1 }
 0x5a6   : > { %v3919_v17 = vpop.f32.mrb[78].mxu1  ;;  %v2624_v4 = vadd.f32 %v2623_v21, %v2492_v1 }
 0x5a7   : > { %v2635_v31 = vadd.f32 %v3919_v17, %v2492_v1  ;;  %v2626_v42 = vpop.f32.mrb[79].mxu1 }
 0x5a8   : > { %v2627_v25 = vadd.f32 %v2626_v42, %v2492_v1  ;;  %v4328_v1 = vld [vmem:[%s4531_s14 + $0x68] sm:$0xff]  ;;  %s394_s14 = sand.u32 1, %s4385_s18  }
 0x5a9   : > { %v2645_v46 = vpack.c.bf16 %v2635_v31, %v2632_v52  ;;  %v3034_v41 = vpack.c.bf16 %v4328_v1, %v4327_v27  ;;  %s3301_s22 = sshll.u32 %s394_s14, 7  ;;  %s5659_s21 = scalar_lea.sflag [#allocation3], %s394_s14 }
 0x5aa   : > { %v2644_v48 = vpack.c.bf16 %v2627_v25, %v2624_v4  ;;  %s5559_s24 = scalar_lea.vmem [#allocation2], %s3301_s22  ;;  %s4337_s22 = scalar_lea.vmem %s4336_s15, 4096 }
 0x5ab   : > { %3968 = vmatprep.mubr.msk.bf16.mxu1 %vm432_vm0, %v3034_v41  ;;  %s3223_s25 = sshll.u32 %s5559_s24, 4  ;;  %s5654_s25 = int_to_ptr.vmem [resolvable:$true] %s3223_s25 }
 0x5ac   : > { %3948 = vmatprep.mubr.bf16.mxu0 %v2644_v48  ;;  %3969 = vmatmul.mubr.msk.bf16.gmra.mrb[92].mxu1 %vm432_vm0, %v3035_v38  ;;  %s4331_s13 = scalar_lea.vmem %s5654_s25, 2048  ;;  %p4338_p0 = scmp.lt.s32.totalorder %s5654_s25, %s4336_s15 }
 0x5ad   : > { %3949 = vmatmul.mubr.bf16.gmra.mrb[92].mxu0 %v2645_v46  ;;  %p4332_p11 = scmp.ne.s32.totalorder %s5654_s25, %s4331_s13  ;;  %p4339_p1 = scmp.lt.s32.totalorder %s4337_s22, %s4331_s13 }
 0x5af   : > { %p4333_p12 = pnand %p4332_p11, %p4497_p5  ;;  %p4340_p2 = por %p4339_p1, %p4338_p0 }
 0x5b1   : > { %p4334_p13 = pneg %p4333_p12 }
 0x5b3   : > { %p4341_p3 = pnand %p4340_p2, %p4334_p13 }
 0x664   : > { %v3938_v47 = vpop.f32.mrb[80].mxu0 }
 0x665   : > { %v2757_v0 = vadd.f32 %v3938_v47, %v2665_v35  ;;  %v2748_v7 = vpop.f32.mrb[81].mxu0 }
 0x666   : > { %v3939_v2 = vpop.f32.mrb[82].mxu0  ;;  %v2749_v22 = vadd.f32 %v2748_v7, %v2665_v35 }
 0x667   : > { %2815 = vadd.xlane.f32.xlu0 %v2757_v0  ;;  %v2751_v58 = vpop.f32.mrb[83].mxu0  ;;  %v2760_v53 = vadd.f32 %v3939_v2, %v2665_v35 }
 0x668   : > { %v2752_v8 = vadd.f32 %v2751_v58, %v2665_v35 }
 0x66a   : > { %2813 = vadd.xlane.f32.xlu1 %v2752_v8 }
 0x66b   : > { %2811 = vadd.xlane.f32.xlu0 %v2749_v22 }
 0x66c   : > { %v3942_v13 = vpop.f32.mrb[84].mxu0 }
 0x66d   : > { %v2773_v16 = vadd.f32 %v3942_v13, %v2665_v35  ;;  %v2764_v55 = vpop.f32.mrb[85].mxu0 }
 0x66e   : > { %v3943_v26 = vpop.f32.mrb[86].mxu0  ;;  %v2765_v59 = vadd.f32 %v2764_v55, %v2665_v35 }
 0x66f   : > { %v2767_v5 = vpop.f32.mrb[87].mxu0  ;;  %2823 = vadd.xlane.f32.xlu1 %v2773_v16  ;;  %2817 = vadd.xlane.f32.xlu0 %v2760_v53  ;;  %v2776_v32 = vadd.f32 %v3943_v26, %v2665_v35 }
 0x670   : > { %v5410_v24 = vadd.f32 %v2767_v5, %v2665_v35 }
 0x673   : > { %2819 = vadd.xlane.f32.xlu1 %v2765_v59  ;;  %2825 = vadd.xlane.f32.xlu0 %v2776_v32 }
 0x675   : > { %v3946_v9 = vpop.f32.mrb[88].mxu0 }
 0x676   : > { %v2789_v37 = vadd.f32 %v3946_v9, %v2665_v35  ;;  %v2780_v14 = vpop.f32.mrb[89].mxu0 }
 0x677   : > { %v3947_v50 = vpop.f32.mrb[90].mxu0  ;;  %2821 = vadd.xlane.f32.xlu0 %v5410_v24  ;;  %v5413_v15 = vadd.f32 %v2780_v14, %v2665_v35 }
 0x678   : > { %v2783_v30 = vpop.f32.mrb[91].mxu0  ;;  %2831 = vadd.xlane.f32.xlu1 %v2789_v37  ;;  %v5415_v36 = vadd.f32 %v3947_v50, %v2665_v35 }
 0x679   : > { %v5419_v33 = vadd.f32 %v2783_v30, %v2665_v35 }
 0x67b   : > { %2833 = vadd.xlane.f32.xlu0 %v5415_v36 }
 0x67c   : > { %2827 = vadd.xlane.f32.xlu1 %v5413_v15 }
 0x67f   : > { %2829 = vadd.xlane.f32.xlu0 %v5419_v33 }
 0x680   : > { %v3950_v61 = vpop.f32.mrb[92].mxu0 }
 0x681   : > { %v2796_v21 = vpop.f32.mrb[93].mxu0  ;;  %v5427_v4 = vadd.f32 %v3950_v61, %v2665_v35 }
 0x682   : > { %v5422_v17 = vadd.f32 %v2796_v21, %v2665_v35  ;;  %v3951_v52 = vpop.f32.mrb[94].mxu0 }
 0x683   : > { %v2799_v31 = vpop.f32.mrb[95].mxu0  ;;  %v5430_v25 = vadd.f32 %v3951_v52, %v2665_v35 }
 0x684   : > { %v5424_v42 = vadd.f32 %v2799_v31, %v2665_v35  ;;  %2835 = vadd.xlane.f32.xlu1 %v5422_v17 }
 0x686   : > { %2837 = vadd.xlane.f32.xlu0 %v5424_v42 }
 0x688   : > { %2839 = vadd.xlane.f32.xlu1 %v5427_v4 }
 0x68a   : > { %2841 = vadd.xlane.f32.xlu0 %v5430_v25 }
 0x6f4   : > { %v2816_v46 = vpop.xlane.xlu0 %2815 }
 0x6f5   : > { %v2846_v48 = vmul.f32 0.0078125, %v2816_v46 }
 0x6f7   : > { %v5434_v39 = vsub.f32 %v2757_v0, %v2846_v48  ;;  %v2814_v44 = vpop.xlane.xlu1 %2813 }
 0x6f8   : > { %v2812_v40 = vpop.xlane.xlu0 %2811  ;;  %v2845_v20 = vmul.f32 0.0078125, %v2814_v44 }
 0x6f9   : > { %v2844_v3 = vmul.f32 0.0078125, %v2812_v40  ;;  %v2878_v54 = vmul.f32 %v5434_v39, %v5434_v39 }
 0x6fa   : > { %v5446_v43 = vsub.f32 %v2752_v8, %v2845_v20 }
 0x6fb   : > { %v5438_v51 = vsub.f32 %v2749_v22, %v2844_v3  ;;  %2896 = vadd.xlane.f32.xlu1 %v2878_v54  ;;  %v3958_v3 = vpop.f32.mrb[80].mxu1 }
 0x6fc   : > { %v2824_v23 = vpop.xlane.xlu1 %2823  ;;  %v2818_v56 = vpop.xlane.xlu0 %2817  ;;  %v2877_v35 = vmul.f32 %v5446_v43, %v5446_v43 }
 0x6fd   : > { %v2850_v12 = vmul.f32 0.0078125, %v2824_v23  ;;  %v2847_v18 = vmul.f32 0.0078125, %v2818_v56  ;;  %v2876_v45 = vmul.f32 %v5438_v51, %v5438_v51 }
 0x6ff   : > { %v5442_v34 = vsub.f32 %v2773_v16, %v2850_v12  ;;  %v5444_v57 = vsub.f32 %v2760_v53, %v2847_v18  ;;  %2892 = vadd.xlane.f32.xlu1 %v2876_v45 }
 0x700   : > { %v2820_v29 = vpop.xlane.xlu1 %2819  ;;  %v2826_v19 = vpop.xlane.xlu0 %2825 }
 0x701   : > { %v2848_v6 = vmul.f32 0.0078125, %v2820_v29  ;;  %v2851_v28 = vmul.f32 0.0078125, %v2826_v19  ;;  %v2879_v63 = vmul.f32 %v5444_v57, %v5444_v57  ;;  %v2882_v27 = vmul.f32 %v5442_v34, %v5442_v34 }
 0x703   : > { %v5452_v1 = vsub.f32 %v2765_v59, %v2848_v6  ;;  %2898 = vadd.xlane.f32.xlu0 %v2879_v63  ;;  %2904 = vadd.xlane.f32.xlu1 %v2882_v27  ;;  %v5454_v41 = vsub.f32 %v2776_v32, %v2851_v28 }
 0x704   : > { %v2822_v11 = vpop.xlane.xlu0 %2821 }
 0x705   : > { %v2832_v62 = vpop.xlane.xlu1 %2831  ;;  %v2849_v10 = vmul.f32 0.0078125, %v2822_v11  ;;  %v2880_v47 = vmul.f32 %v5452_v1, %v5452_v1  ;;  %v2883_v58 = vmul.f32 %v5454_v41, %v5454_v41 }
 0x706   : > { %v2854_v38 = vmul.f32 0.0078125, %v2832_v62 }
 0x707   : > { %2894 = vadd.xlane.f32.xlu0 %v2877_v35  ;;  %2900 = vadd.xlane.f32.xlu1 %v2880_v47  ;;  %v5465_v8 = vsub.f32 %v5410_v24, %v2849_v10 }
 0x708   : > { %v5460_v0 = vsub.f32 %v2789_v37, %v2854_v38  ;;  %v2834_v2 = vpop.xlane.xlu0 %2833 }
 0x709   : > { %v2828_v7 = vpop.xlane.xlu1 %2827  ;;  %v2855_v13 = vmul.f32 0.0078125, %v2834_v2  ;;  %v2881_v59 = vmul.f32 %v5465_v8, %v5465_v8 }
 0x70a   : > { %v2852_v22 = vmul.f32 0.0078125, %v2828_v7  ;;  %v2886_v53 = vmul.f32 %v5460_v0, %v5460_v0 }
 0x70b   : > { %2906 = vadd.xlane.f32.xlu0 %v2883_v58  ;;  %v5473_v26 = vsub.f32 %v5415_v36, %v2855_v13  ;;  %v2990_v13 = vsub.s32 6, %v4920_v49 }
 0x70c   : > { %v5470_v16 = vsub.f32 %v5413_v15, %v2852_v22  ;;  %2912 = vadd.xlane.f32.xlu1 %v2886_v53  ;;  %v2830_v55 = vpop.xlane.xlu0 %2829  ;;  %v3042_v53 = vsub.s32 4, %v4920_v49 }
 0x70d   : > { %v2853_v5 = vmul.f32 0.0078125, %v2830_v55  ;;  %v2887_v14 = vmul.f32 %v5473_v26, %v5473_v26 }
 0x70e   : > { %v2884_v32 = vmul.f32 %v5470_v16, %v5470_v16 }
 0x70f   : > { %2902 = vadd.xlane.f32.xlu0 %v2881_v59  ;;  %v5480_v24 = vsub.f32 %v5419_v33, %v2853_v5 }
 0x710   : > { %2908 = vadd.xlane.f32.xlu1 %v2884_v32 }
 0x711   : > { %v2836_v9 = vpop.xlane.xlu1 %2835  ;;  %v2885_v33 = vmul.f32 %v5480_v24, %v5480_v24 }
 0x712   : > { %v2856_v37 = vmul.f32 0.0078125, %v2836_v9  ;;  %v3010_v9 = vsub.s32 7, %v4920_v49 }
 0x713   : > { %v2838_v50 = vpop.xlane.xlu0 %2837  ;;  %2914 = vadd.xlane.f32.xlu0 %v2887_v14 }
 0x714   : > { %v5485_v30 = vsub.f32 %v5422_v17, %v2856_v37  ;;  %v2857_v15 = vmul.f32 0.0078125, %v2838_v50  ;;  %v5540_v50 = vrot.slane %v5286_v60, %v2990_v13  ;;  %v5548_v49 = vrot.slane %v5286_v60, %v3010_v9 }
 0x715   : > { %v2840_v36 = vpop.xlane.xlu1 %2839 }
 0x716   : > { %v5488_v61 = vsub.f32 %v5424_v42, %v2857_v15  ;;  %v2858_v21 = vmul.f32 0.0078125, %v2840_v36  ;;  %v2888_v52 = vmul.f32 %v5485_v30, %v5485_v30  ;;  %v5543_v15 = vrot.slane %v5286_v60, %v3042_v53 }
 0x717   : > { %v2842_v31 = vpop.xlane.xlu0 %2841  ;;  %2910 = vadd.xlane.f32.xlu0 %v2885_v33 }
 0x718   : > { %v5495_v46 = vsub.f32 %v5427_v4, %v2858_v21  ;;  %v2859_v48 = vmul.f32 0.0078125, %v2842_v31  ;;  %2916 = vadd.xlane.f32.xlu1 %v2888_v52  ;;  %v2889_v44 = vmul.f32 %v5488_v61, %v5488_v61  ;;  %v5506_v4 = vpop.f32.mrb[81].mxu1 }
 0x719   : > { %v5508_v54 = vpop.f32.mrb[82].mxu1  ;;  %v3115_v13 = vadd.f32 %v5506_v4, %v5543_v15 }
 0x71a   : > { %v5498_v17 = vsub.f32 %v5430_v25, %v2859_v48  ;;  %v2890_v42 = vmul.f32 %v5495_v46, %v5495_v46  ;;  %v5510_v20 = vpop.f32.mrb[83].mxu1 }
 0x71b   : > { %2918 = vadd.xlane.f32.xlu0 %v2889_v44  ;;  %v5512_v25 = vpop.f32.mrb[84].mxu1 }
 0x71c   : > { %2920 = vadd.xlane.f32.xlu1 %v2890_v42  ;;  %v2891_v40 = vmul.f32 %v5498_v17, %v5498_v17  ;;  %v5514_v23 = vpop.f32.mrb[85].mxu1 }
 0x71d   : > { %v5516_v56 = vpop.f32.mrb[86].mxu1 }
 0x71e   : > { %v5518_v12 = vpop.f32.mrb[87].mxu1 }
 0x71f   : > { %2922 = vadd.xlane.f32.xlu0 %v2891_v40  ;;  %v5520_v18 = vpop.f32.mrb[88].mxu1 }
 0x720   : > { %v5522_v45 = vpop.f32.mrb[89].mxu1 }
 0x721   : > { %v5524_v29 = vpop.f32.mrb[90].mxu1 }
 0x722   : > { %v5526_v19 = vpop.f32.mrb[91].mxu1 }
 0x723   : > { %v5528_v6 = vpop.f32.mrb[92].mxu1 }
 0x724   : > { %v5530_v28 = vpop.f32.mrb[93].mxu1 }
 0x725   : > { %v5532_v63 = vpop.f32.mrb[94].mxu1 }
 0x726   : > { %v5534_v27 = vpop.f32.mrb[95].mxu1 }
 0x788   : > { %v2897_v62 = vpop.xlane.xlu1 %2896 }
 0x789   : > { %v2926_v11 = vmul.f32 0.0078125, %v2897_v62  ;;  %v3123_v62 = vadd.f32 %v3958_v3, %v5543_v15 }
 0x78b   : > { %v2942_v38 = vadd.f32 1e-05, %v2926_v11 }
 0x78c   : > { %v2893_v10 = vpop.xlane.xlu1 %2892 }
 0x78d   : > { %4282 = vrsqrt.f32 %v2942_v38  ;;  %v2924_v35 = vmul.f32 0.0078125, %v2893_v10 }
 0x78f   : > { %v2940_v47 = vadd.f32 1e-05, %v2924_v35 }
 0x790   : > { %v2899_v7 = vpop.xlane.xlu0 %2898  ;;  %v2905_v2 = vpop.xlane.xlu1 %2904 }
 0x791   : > { %4284 = vrsqrt.f32 %v2940_v47  ;;  %v2927_v58 = vmul.f32 0.0078125, %v2899_v7  ;;  %v2930_v22 = vmul.f32 0.0078125, %v2905_v2 }
 0x793   : > { %v2943_v55 = vadd.f32 1e-05, %v2927_v58  ;;  %v2946_v5 = vadd.f32 1e-05, %v2930_v22 }
 0x794   : > { %v2895_v59 = vpop.xlane.xlu0 %2894  ;;  %v2901_v32 = vpop.xlane.xlu1 %2900 }
 0x795   : > { %4286 = vrsqrt.f32 %v2943_v55  ;;  %v2925_v37 = vmul.f32 0.0078125, %v2895_v59  ;;  %v2928_v14 = vmul.f32 0.0078125, %v2901_v32 }
 0x796   : > { %4288 = vrsqrt.f32 %v2946_v5 }
 0x797   : > { %v4283_v36 = vpop.eup %4282  ;;  %v2941_v21 = vadd.f32 1e-05, %v2925_v37  ;;  %v2944_v52 = vadd.f32 1e-05, %v2928_v14 }
 0x798   : > { %v2907_v33 = vpop.xlane.xlu0 %2906  ;;  %v2974_v48 = vmul.f32 %v4283_v36, %v5434_v39  ;;  %v3126_v36 = vadd.f32 %v5508_v54, %v5543_v15 }
 0x799   : > { %v2913_v31 = vpop.xlane.xlu1 %2912  ;;  %4290 = vrsqrt.f32 %v2941_v21  ;;  %v2931_v42 = vmul.f32 0.0078125, %v2907_v33 }
 0x79a   : > { %v2934_v44 = vmul.f32 0.0078125, %v2913_v31  ;;  %4292 = vrsqrt.f32 %v2944_v52  ;;  %v2994_v40 = vmul.f32 %v5540_v50, %v2974_v48  ;;  %v3139_v31 = vadd.f32 %v5512_v25, %v5543_v15 }
 0x79b   : > { %v4285_v11 = vpop.eup %4284  ;;  %v2947_v38 = vadd.f32 1e-05, %v2931_v42  ;;  %v3118_v25 = vadd.f32 %v5510_v20, %v5543_v15 }
 0x79c   : > { %v2950_v10 = vadd.f32 1e-05, %v2934_v44  ;;  %v3014_v35 = vadd.f32 %v5548_v49, %v2994_v40  ;;  %v2903_v47 = vpop.xlane.xlu0 %2902  ;;  %v2972_v60 = vmul.f32 %v4285_v11, %v5438_v51 }
 0x79d   : > { %v2909_v39 = vpop.xlane.xlu1 %2908  ;;  %4294 = vrsqrt.f32 %v2947_v38  ;;  %v2929_v7 = vmul.f32 0.0078125, %v2903_v47 }
 0x79e   : > { %v2932_v2 = vmul.f32 0.0078125, %v2909_v39  ;;  %4296 = vrsqrt.f32 %v2950_v10  ;;  %v3179_v58 = vadd.f32 %v3123_v62, %v3014_v35  ;;  %v2992_v22 = vmul.f32 %v5540_v50, %v2972_v60 }
 0x79f   : > { %v4287_v3 = vpop.eup %4286  ;;  %v2945_v53 = vadd.f32 1e-05, %v2929_v7  ;;  %v3131_v60 = vadd.f32 %v5514_v23, %v5543_v15 }
 0x7a0   : > { %v2948_v55 = vadd.f32 1e-05, %v2932_v2  ;;  %v4289_v5 = vpop.eup %4288  ;;  %3195 = vst [vmem:[%s5559_s24 + $0x10] sm:$0xff] %v3179_v58  ;;  %v3012_v51 = vadd.f32 %v5548_v49, %v2992_v22  ;;  %v2915_v59 = vpop.xlane.xlu0 %2914  ;;  %v2975_v32 = vmul.f32 %v4287_v3, %v5444_v57 }
 0x7a1   : > { %4298 = vrsqrt.f32 %v2945_v53  ;;  %v2935_v9 = vmul.f32 0.0078125, %v2915_v59  ;;  %v2978_v37 = vmul.f32 %v4289_v5, %v5442_v34 }
 0x7a2   : > { %4300 = vrsqrt.f32 %v2948_v55  ;;  %v3177_v4 = vadd.f32 %v3115_v13, %v3012_v51  ;;  %v2995_v14 = vmul.f32 %v5540_v50, %v2975_v32 }
 0x7a3   : > { %v4291_v21 = vpop.eup %4290  ;;  %v2951_v52 = vadd.f32 1e-05, %v2935_v9  ;;  %v2998_v33 = vmul.f32 %v5540_v50, %v2978_v37 }
 0x7a4   : > { %v4293_v48 = vpop.eup %4292  ;;  %3193 = vst [vmem:[%s5559_s24] sm:$0xff] %v3177_v4  ;;  %v3015_v57 = vadd.f32 %v5548_v49, %v2995_v14  ;;  %v2973_v34 = vmul.f32 %v4291_v21, %v5446_v43  ;;  %v2911_v44 = vpop.xlane.xlu0 %2910 }
 0x7a5   : > { %v2917_v42 = vpop.xlane.xlu1 %2916  ;;  %4302 = vrsqrt.f32 %v2951_v52  ;;  %v3018_v54 = vadd.f32 %v5548_v49, %v2998_v33  ;;  %v2933_v62 = vmul.f32 0.0078125, %v2911_v44  ;;  %v2976_v10 = vmul.f32 %v4293_v48, %v5452_v1 }
 0x7a6   : > { %v2936_v40 = vmul.f32 0.0078125, %v2917_v42  ;;  %v3180_v11 = vadd.f32 %v3126_v36, %v3015_v57  ;;  %v2993_v38 = vmul.f32 %v5540_v50, %v2973_v34  ;;  %v3142_v1 = vadd.f32 %v5516_v56, %v5543_v15 }
 0x7a7   : > { %v4295_v35 = vpop.eup %4294  ;;  %v3183_v39 = vadd.f32 %v3139_v31, %v3018_v54  ;;  %v2949_v43 = vadd.f32 1e-05, %v2933_v62  ;;  %v2996_v22 = vmul.f32 %v5540_v50, %v2976_v10  ;;  %v3155_v56 = vadd.f32 %v5520_v18, %v5543_v15 }
 0x7a8   : > { %v2952_v47 = vadd.f32 1e-05, %v2936_v40  ;;  %v4297_v7 = vpop.eup %4296  ;;  %3196 = vst [vmem:[%s5559_s24 + $0x18] sm:$0xff] %v3180_v11  ;;  %v3013_v2 = vadd.f32 %v5548_v49, %v2993_v38  ;;  %v2919_v13 = vpop.xlane.xlu0 %2918  ;;  %v2979_v20 = vmul.f32 %v4295_v35, %v5454_v41 }
 0x7a9   : > { %v2921_v58 = vpop.xlane.xlu1 %2920  ;;  %3199 = vst [vmem:[%s5559_s24 + $0x30] sm:$0xff] %v3183_v39  ;;  %v2937_v53 = vmul.f32 0.0078125, %v2919_v13  ;;  %v2982_v23 = vmul.f32 %v4297_v7, %v5460_v0  ;;  %v3016_v5 = vadd.f32 %v5548_v49, %v2996_v22  ;;  %v3171_v13 = vadd.f32 %v5528_v6, %v5543_v15 }
 0x7aa   : > { %4304 = vrsqrt.f32 %v2952_v47  ;;  %v2938_v3 = vmul.f32 0.0078125, %v2921_v58  ;;  %v3178_v55 = vadd.f32 %v3118_v25, %v3013_v2  ;;  %v2999_v51 = vmul.f32 %v5540_v50, %v2979_v20 }
 0x7ab   : > { %4306 = vrsqrt.f32 %v2949_v43  ;;  %v4299_v59 = vpop.eup %4298  ;;  %v2953_v41 = vadd.f32 1e-05, %v2937_v53  ;;  %v3002_v9 = vmul.f32 %v5540_v50, %v2982_v23  ;;  %v3181_v4 = vadd.f32 %v3131_v60, %v3016_v5 }
 0x7ac   : > { %v2954_v32 = vadd.f32 1e-05, %v2938_v3  ;;  %v4301_v37 = vpop.eup %4300  ;;  %3194 = vst [vmem:[%s5559_s24 + $0x8] sm:$0xff] %v3178_v55  ;;  %v3019_v0 = vadd.f32 %v5548_v49, %v2999_v51  ;;  %v2977_v14 = vmul.f32 %v4299_v59, %v5465_v8  ;;  %v2923_v36 = vpop.xlane.xlu0 %2922  ;;  %v3147_v8 = vadd.f32 %v5522_v45, %v5543_v15 }
 0x7ad   : > { %v3022_v21 = vadd.f32 %v5548_v49, %v3002_v9  ;;  %v2939_v52 = vmul.f32 0.0078125, %v2923_v36  ;;  %v2980_v33 = vmul.f32 %v4301_v37, %v5470_v16  ;;  %3197 = vst [vmem:[%s5559_s24 + $0x20] sm:$0xff] %v3181_v4  ;;  %v3134_v16 = vadd.f32 %v5518_v12, %v5543_v15 }
 0x7ae   : > { %4308 = vrsqrt.f32 %v2954_v32  ;;  %v3184_v31 = vadd.f32 %v3142_v1, %v3019_v0  ;;  %v2997_v18 = vmul.f32 %v5540_v50, %v2977_v14  ;;  %v3158_v45 = vadd.f32 %v5524_v29, %v5543_v15 }
 0x7af   : > { %4310 = vrsqrt.f32 %v2953_v41  ;;  %v4303_v48 = vpop.eup %4302  ;;  %v3187_v57 = vadd.f32 %v3155_v56, %v3022_v21  ;;  %v2955_v42 = vadd.f32 1e-05, %v2939_v52  ;;  %v3000_v34 = vmul.f32 %v5540_v50, %v2980_v33 }
 0x7b0   : > { %3200 = vst [vmem:[%s5559_s24 + $0x38] sm:$0xff] %v3184_v31  ;;  %v3017_v44 = vadd.f32 %v5548_v49, %v2997_v18  ;;  %v2983_v40 = vmul.f32 %v4303_v48, %v5473_v26  ;;  %v3163_v43 = vadd.f32 %v5530_v28, %v5543_v15  ;;  %v3166_v53 = vadd.f32 %v5534_v27, %v5543_v15 }
 0x7b1   : > { %3203 = vst [vmem:[%s5559_s24 + $0x50] sm:$0xff] %v3187_v57  ;;  %4312 = vrsqrt.f32 %v2955_v42  ;;  %v3020_v54 = vadd.f32 %v5548_v49, %v3000_v34  ;;  %v3174_v51 = vadd.f32 %v5532_v63, %v5543_v15 }
 0x7b2   : > { %v3182_v62 = vadd.f32 %v3134_v16, %v3017_v44  ;;  %v3003_v11 = vmul.f32 %v5540_v50, %v2983_v40 }
 0x7b3   : > { %v3185_v25 = vadd.f32 %v3147_v8, %v3020_v54 }
 0x7b4   : > { %v4305_v38 = vpop.eup %4304  ;;  %3198 = vst [vmem:[%s5559_s24 + $0x28] sm:$0xff] %v3182_v62  ;;  %v3023_v35 = vadd.f32 %v5548_v49, %v3003_v11 }
 0x7b5   : > { %v4307_v10 = vpop.eup %4306  ;;  %v2984_v12 = vmul.f32 %v4305_v38, %v5485_v30  ;;  %3201 = vst [vmem:[%s5559_s24 + $0x40] sm:$0xff] %v3185_v25 }
 0x7b6   : > { %v2981_v26 = vmul.f32 %v4307_v10, %v5480_v24  ;;  %v3188_v47 = vadd.f32 %v3158_v45, %v3023_v35  ;;  %v3150_v24 = vadd.f32 %v5526_v19, %v5543_v15 }
 0x7b7   : > { %v3004_v39 = vmul.f32 %v5540_v50, %v2984_v12 }
 0x7b8   : > { %v4309_v60 = vpop.eup %4308  ;;  %v3001_v29 = vmul.f32 %v5540_v50, %v2981_v26  ;;  %3204 = vst [vmem:[%s5559_s24 + $0x58] sm:$0xff] %v3188_v47 }
 0x7b9   : > { %v4311_v7 = vpop.eup %4310  ;;  %v2986_v2 = vmul.f32 %v4309_v60, %v5495_v46  ;;  %v3024_v30 = vadd.f32 %v5548_v49, %v3004_v39 }
 0x7ba   : > { %v3021_v58 = vadd.f32 %v5548_v49, %v3001_v29  ;;  %v2985_v22 = vmul.f32 %v4311_v7, %v5488_v61 }
 0x7bb   : > { %v3006_v28 = vmul.f32 %v5540_v50, %v2986_v2  ;;  %v3189_v20 = vadd.f32 %v3163_v43, %v3024_v30  ;;  %v4313_v1 = vpop.eup %4312 }
 0x7bc   : > { %v3186_v46 = vadd.f32 %v3150_v24, %v3021_v58  ;;  %v3005_v3 = vmul.f32 %v5540_v50, %v2985_v22  ;;  %v2987_v61 = vmul.f32 %v4313_v1, %v5498_v17 }
 0x7bd   : > { %v3026_v19 = vadd.f32 %v5548_v49, %v3006_v28  ;;  %3205 = vst [vmem:[%s5559_s24 + $0x60] sm:$0xff] %v3189_v20 }
 0x7be   : > { %3202 = vst [vmem:[%s5559_s24 + $0x48] sm:$0xff] %v3186_v46  ;;  %v3025_v6 = vadd.f32 %v5548_v49, %v3005_v3  ;;  %v3007_v55 = vmul.f32 %v5540_v50, %v2987_v61 }
 0x7bf   : > { %v3191_v23 = vadd.f32 %v3171_v13, %v3026_v19 }
 0x7c0   : > { %v3190_v5 = vadd.f32 %v3166_v53, %v3025_v6  ;;  %v3027_v27 = vadd.f32 %v5548_v49, %v3007_v55 }
 0x7c1   : > { %3207 = vst [vmem:[%s5559_s24 + $0x70] sm:$0xff] %v3191_v23 }
 0x7c2   : > { %3206 = vst [vmem:[%s5559_s24 + $0x68] sm:$0xff] %v3190_v5  ;;  %v3192_v17 = vadd.f32 %v3174_v51, %v3027_v27 }
 0x7c4   : > { %3208 = vst [vmem:[%s5559_s24 + $0x78] sm:$0xff] %v3192_v17 }
 0x7c5   : > { %4344 = shalt.err (!%p4341_p3)
}
 0x7c6   : > { %s4345_s14 = scalar_lea.hbm %s5652_s12, 2048  ;;  %s4349_s29 = scalar_lea.hbm %s5711_s11, 4096 }
 0x7c7   : > { %p4346_p4 = scmp.ne.s32.totalorder %s5652_s12, %s4345_s14  ;;  %p4350_p9 = scmp.lt.u32.totalorder %s5652_s12, %s5711_s11 }
 0x7c8   : > { %p4351_p10 = scmp.lt.u32.totalorder %s4349_s29, %s4345_s14  ;;  %p4353_p12 = scmp.lt.u32.totalorder %s4345_s14, %s5652_s12 }
 0x7c9   : > { %p4347_p7 = pnand %p4346_p4, %p4497_p5 }
 0x7ca   : > { %p4352_p11 = por %p4351_p10, %p4350_p9 }
 0x7cb   : > { %p4348_p8 = pneg %p4347_p7 }
 0x7cc   : > { %p4354_p13 = por %p4353_p12, %p4352_p11 }
 0x7ce   : > { %p4355_p0 = pnand %p4354_p13, %p4348_p8 }
 0x7d0   : > { %4358 = shalt.err (!%p4355_p0)
}
 0x7d1   : > { %s4397_s13 = smov 128   ;;  %s4398_s15 = smov 8  }
 0x7d2   : > { %4056 = dma.vmem_to_hbm [thread:$0]  (%p4497_p5), %s5654_s25, 2048, %s5652_s12, %s5659_s21, %s4397_s13, %s4397_s13, %s4398_s15  }
 0x7d3 PF: > { %p4062_p1 = scmp.ge.s32.totalorder %s4393_s20, 2  ;;  %s3238_s22 = sand.u32 1, %s4381_s17  }
 0x7d4   : > { %s3239_s14 = scalar_lea.sflag [#allocation3], %s3238_s22 }
 0x7d5   : > { %p4059_p2 = pnand %p4062_p1, %p4501_p6 }
 0x7d7   : > { %4376 = dma.done.wait (!%p4059_p2), %s3239_s14, 2048  }
 0x7d8   : > { %4378 = vsyncadd (!%p4059_p2), %s3239_s14, 4294965248  ;;  %p21_p3 = scmp.ge.s32.totalorder %s4484_s23, 4   ;;  %s5716_s17 = smov %s4385_s18 }
 0x7d9   : > { %s5717_s18 = smov %s4389_s19  ;;  %s5718_s19 = smov %s4495_s26 }
 0x7da   : > { %s5719_s20 = smov %s4484_s23  ;;  %23 = sbr.rel (!%p21_p3) target bundleno = 5 (0x5), region = 102 }
 0x7e1   :  { %3244 = vsyncpa [#allocation3], 1 }
 0x7e2   :  { %3246 = vsyncpa [#allocation3 + $0x1], 1 }

</bundles_post_ra>
